<compile_context>
chip_gen: v7x
topology: tpu7x:2x2x1
jax: 0.10.0
libtpu: 0.0.40
codegen_flags: <defaults>
</compile_context>

<pallas_src>
import math

import jax
import jax.numpy as jnp
import numpy as np
from jax.experimental import pallas as pl
from jax.experimental.pallas import tpu as pltpu

LEAKY_SLOPE = 0.1   # nanodet act_layers("LeakyReLU")
BN_EPS = 1e-5


def _leaky(x):
    # mul + max (2 VALU ops) instead of cmp + mul + select (3).
    return jnp.maximum(x, LEAKY_SLOPE * x)


# ----------------------------------------------------------------------------
# Host-side parameter packing: one f32 slab, static (row, rows, cols) offsets.
# ----------------------------------------------------------------------------

class _SlabPacker:
    """Packs 2-D f32 parameters into a single (rows, width) slab.

    Every entry's rows are padded to a multiple of 8 so all in-kernel static
    row slices stay sublane aligned.
    """

    def __init__(self):
        self._entries = []
        self._row = 0
        self._width = 1

    def add(self, arr):
        arr = jnp.asarray(arr, jnp.float32)
        r, c = arr.shape
        off = (self._row, r, c)
        rp = -(-r // 8) * 8
        self._entries.append((arr, rp))
        self._row += rp
        self._width = max(self._width, c)
        return off

    def finalize(self):
        width = -(-self._width // 128) * 128        # lane-dense slab
        mats = [jnp.pad(a, ((0, rp - a.shape[0]), (0, width - a.shape[1])))
                for a, rp in self._entries]
        return jnp.concatenate(mats, axis=0)


# ----------------------------------------------------------------------------
# Fused GhostBlocks kernel
# ----------------------------------------------------------------------------

def _make_kernel(*, W_img, plan, mask_off, use_res, res_off, cout):
    """Fused GhostBlocks kernel over one (C, Mb) lane block (g images)."""

    def kernel(x_ref, m_ref, p_ref, o_ref):
        Mb = x_ref.shape[1]

        def pslice(off):
            r0, rr, cc = off
            return p_ref[r0:r0 + rr, 0:cc]

        def dwconv3(inp, w_off, b_off, act):
            """Depthwise 3x3, stride 1, zero padding 1, on (C, Mb)."""
            w = pslice(w_off)                     # (C, 9): hoisted, one load
            b = pslice(b_off)                     # (C, 1)
            m0 = mask_off[3]
            mk = m_ref[m0:m0 + 9, :]              # (9, Mb): hoisted
            acc = None
            t = 0
            for dh in (-1, 0, 1):
                for dw in (-1, 0, 1):
                    s = dh * W_img + dw
                    src = inp if s == 0 else pltpu.roll(inp, shift=(-s) % Mb,
                                                        axis=1)
                    term = src * mk[t:t + 1, :] * w[:, t:t + 1]
                    acc = term if acc is None else acc + term
                    t += 1
            y = acc + b
            return _leaky(y) if act else y

        def dense_conv(inp, K, w_off, b_off):
            """Dense KxK conv (the folded dw+pw shortcut) via per-tap MXU
            matmuls; zero padding is applied to the (cout, Mb) OUTPUT (masks
            commute with the channel contraction), not the wider input."""
            r0, _, cc = w_off
            b = pslice(b_off)
            m0 = mask_off[K]
            p = K // 2
            acc = None
            t = 0
            for dh in range(-p, p + 1):
                for dw in range(-p, p + 1):
                    s = dh * W_img + dw
                    src = inp if s == 0 else pltpu.roll(inp, shift=(-s) % Mb,
                                                        axis=1)
                    wt = p_ref[r0 + t * cout:r0 + (t + 1) * cout, 0:cc]
                    d = jnp.dot(wt, src, preferred_element_type=jnp.float32)
                    d = d * m_ref[m0 + t:m0 + t + 1, :]   # per-tap ref load
                    acc = d if acc is None else acc + d
                    t += 1
            return acc + b

        x = x_ref[...]                            # (Cin, Mb)
        for blk in plan:
            c1, c2, mid = blk["c1"], blk["c2"], blk["mid"]

            # Shortcut first so x1..x4 are not live across its tap loop.
            if blk["conv_shortcut"]:
                sc = dense_conv(x, blk["k"], blk["sc_w"], blk["sc_b"])
            else:
                sc = x                            # identity (cin == cout)

            # GhostModule 1 (LeakyReLU).
            x1 = _leaky(jnp.dot(pslice(blk["g1_pw_w"]), x,
                                preferred_element_type=jnp.float32)
                        + pslice(blk["g1_pw_b"]))
            x2 = dwconv3(x1, blk["g1_dw_w"], blk["g1_dw_b"], act=True)

            # GhostModule 2 (no act): single K=mid matmul on the sublane-
            # aligned concat == cat(x1, x2)[:mid].
            x12 = x1 if mid == c1 else jnp.concatenate([x1, x2[:mid - c1]],
                                                       axis=0)
            x3 = (jnp.dot(pslice(blk["g2_pw_w"]), x12,
                          preferred_element_type=jnp.float32)
                  + pslice(blk["g2_pw_b"]))
            x4 = dwconv3(x3, blk["g2_dw_w"], blk["g2_dw_b"], act=False)

            # out = cat(x3, x4)[:cout] + shortcut
            top = x3 + sc[:c2]
            if cout > c2:
                bot = x4[:cout - c2] + sc[c2:cout]
                x = jnp.concatenate([top, bot], axis=0)
            else:
                x = top

        if use_res:
            # Re-read the stack input instead of holding it live (vreg relief).
            r = (jnp.dot(pslice(res_off["w"]), x_ref[...],
                         preferred_element_type=jnp.float32)
                 + pslice(res_off["b"]))
            x = x + _leaky(r)

        o_ref[...] = x

    return kernel


# ----------------------------------------------------------------------------
# Wrapper: host-side packing + pallas_call
# ----------------------------------------------------------------------------

def make_ghost_blocks_forward(params, *, out_channels, kernel_size=5,
                              use_res=False):
    """Packs parameters host-side once; returns a jittable forward(x_nchw)."""
    packer = _SlabPacker()
    plan = []
    for blk in params["blocks"]:
        c1 = blk["g1_pw"]["w"].shape[0]
        c2, mid = blk["g2_pw"]["w"].shape
        bp = {"c1": c1, "c2": c2, "mid": mid, "k": kernel_size,
              "conv_shortcut": "sc_pw" in blk,
              "g1_pw_w": packer.add(blk["g1_pw"]["w"]),
              "g1_pw_b": packer.add(blk["g1_pw"]["b"]),
              "g1_dw_w": packer.add(blk["g1_dw"]["w"]),
              "g1_dw_b": packer.add(blk["g1_dw"]["b"]),
              "g2_pw_w": packer.add(blk["g2_pw"]["w"]),
              "g2_pw_b": packer.add(blk["g2_pw"]["b"]),
              "g2_dw_w": packer.add(blk["g2_dw"]["w"]),
              "g2_dw_b": packer.add(blk["g2_dw"]["b"])}
        if bp["conv_shortcut"]:
            # Fold dw(kxk)+BN and pw(1x1)+BN (linear, no act between) into ONE
            # dense kxk conv: Wc[t][o,c] = Wpw[o,c]*Wdw[c,t]; bc = Wpw@bdw+bpw.
            # Stored tap-major: rows [t*cout, (t+1)*cout).
            wdw, bdw = blk["sc_dw"]["w"], blk["sc_dw"]["b"]   # (cin,K*K),(cin,1)
            wpw, bpw = blk["sc_pw"]["w"], blk["sc_pw"]["b"]   # (cout,cin),(cout,1)
            kk = wdw.shape[1]
            cin_b = wdw.shape[0]
            wc = (wpw[None, :, :] *
                  jnp.transpose(wdw)[:, None, :]).reshape(kk * out_channels,
                                                          cin_b)
            bc = jnp.dot(wpw, bdw) + bpw
            bp["sc_w"] = packer.add(wc)
            bp["sc_b"] = packer.add(bc)
        plan.append(bp)

    res_off = None
    if use_res:
        res_off = {"w": packer.add(params["reduce"]["w"]),
                   "b": packer.add(params["reduce"]["b"])}
    slab = packer.finalize()

    def forward(x_nchw):
        N, Cin, H, W = x_nchw.shape
        HW = H * W
        M = N * HW
        # Group images per lane block so the block lane width is a multiple of
        # 128 (unmasked, lane-dense stores); fall back to a single block.
        g = N
        for cand in range(1, N + 1):
            if N % cand == 0 and (cand * HW) % 128 == 0:
                g = cand
                break
        Mb = g * HW
        n_grid = N // g

        # Layout plumbing: channels on sublanes, batch folded into the flat
        # spatial (lane) axis.
        xm = jnp.transpose(x_nchw, (1, 0, 2, 3)).reshape(Cin, M)
        xm = xm.astype(jnp.float32)

        # Host-precomputed zero-padding masks, one (taps, Mb) slab.
        pix = np.arange(HW, dtype=np.int64)
        hh = np.tile(pix // W, g)
        ww = np.tile(pix % W, g)
        sizes = [3]
        if any(b["conv_shortcut"] for b in plan) and kernel_size != 3:
            sizes.append(kernel_size)
        mask_off = {}
        rows = []
        for K in sizes:
            p = K // 2
            mask_off[K] = len(rows)
            for dh in range(-p, p + 1):
                for dw in range(-p, p + 1):
                    rows.append(((hh + dh >= 0) & (hh + dh < H) &
                                 (ww + dw >= 0) & (ww + dw < W)
                                 ).astype(np.float32))
        masks = jnp.asarray(np.stack(rows, axis=0))        # (taps, Mb)

        kernel = _make_kernel(W_img=W, plan=plan, mask_off=mask_off,
                              use_res=use_res, res_off=res_off,
                              cout=out_channels)

        y = pl.pallas_call(
            kernel,
            out_shape=jax.ShapeDtypeStruct((out_channels, M), jnp.float32),
            grid=(n_grid,),
            in_specs=[
                pl.BlockSpec((Cin, Mb), lambda n: (0, n)),
                pl.BlockSpec(masks.shape, lambda n: (0, 0)),
                pl.BlockSpec(slab.shape, lambda n: (0, 0)),
            ],
            out_specs=pl.BlockSpec((out_channels, Mb), lambda n: (0, n)),
            compiler_params=pltpu.CompilerParams(
                dimension_semantics=("parallel",),
                vmem_limit_bytes=32 * 1024 * 1024),
        )(xm, masks, slab)

        # (Cout, N*H*W) -> (N, Cout, H, W)
        return jnp.transpose(y.reshape(out_channels, N, H, W), (1, 0, 2, 3))

    return forward


# ----------------------------------------------------------------------------
# Deterministic synthetic parameters (bias-free conv + BN, folded)
# ----------------------------------------------------------------------------

class _Rng:
    def __init__(self, key):
        self._key = key

    def next(self):
        self._key, sub = jax.random.split(self._key)
        return sub


def _init_bn(rng, c):
    gamma = 1.0 + 0.1 * jax.random.normal(rng.next(), (c,), jnp.float32)
    beta = 0.1 * jax.random.normal(rng.next(), (c,), jnp.float32)
    mean = 0.1 * jax.random.normal(rng.next(), (c,), jnp.float32)
    var = 0.5 + jax.random.uniform(rng.next(), (c,), jnp.float32)
    scale = gamma / jnp.sqrt(var + BN_EPS)
    bias = beta - mean * scale
    return scale, bias


def init_pw(rng, cin, cout):
    """1x1 conv + BN folded.  w: (cout, cin), b: (cout, 1)."""
    w = 0.05 * jax.random.normal(rng.next(), (cout, cin), jnp.float32)
    s, b = _init_bn(rng, cout)
    return {"w": w * s[:, None], "b": b[:, None]}


def init_dw(rng, c, ksz):
    """Depthwise ksz x ksz conv + BN folded.  w: (c, ksz*ksz), tap t=kh*ksz+kw."""
    w = 0.05 * jax.random.normal(rng.next(), (c, ksz * ksz), jnp.float32)
    s, b = _init_bn(rng, c)
    return {"w": w * s[:, None], "b": b[:, None]}


def init_ghost_bottleneck(rng, cin, mid, cout, k):
    c1 = math.ceil(mid / 2)          # ghost1 primary width (ratio=2)
    c2 = math.ceil(cout / 2)         # ghost2 primary width
    p = {
        "g1_pw": init_pw(rng, cin, c1),
        "g1_dw": init_dw(rng, c1, 3),                 # GhostModule cheap op: 3x3
        "g2_pw": init_pw(rng, mid, c2),
        "g2_dw": init_dw(rng, c2, 3),
    }
    if cin != cout:                  # stride==1 -> identity shortcut iff cin==cout
        p["sc_dw"] = init_dw(rng, cin, k)
        p["sc_pw"] = init_pw(rng, cin, cout)
    return p


def init_ghost_blocks(key, in_channels, out_channels, *, expand=1, kernel_size=5,
                      num_blocks=1, use_res=False):
    rng = _Rng(key)
    p = {}
    if use_res:
        p["reduce"] = init_pw(rng, in_channels, out_channels)
    # Matching the PyTorch module: every block is built with `in_channels` as
    # its input width (num_blocks > 1 requires in_channels == out_channels).
    p["blocks"] = [
        init_ghost_bottleneck(rng, in_channels, int(out_channels * expand),
                              out_channels, kernel_size)
        for _ in range(num_blocks)
    ]
    return p


# ----------------------------------------------------------------------------
# Pure-JAX reference (NCHW, lax.conv) for correctness checking
# ----------------------------------------------------------------------------

def _ref_act(y, act):
    return jnp.where(y > 0, y, LEAKY_SLOPE * y) if act else y


def _ref_pw(x, w, b, act):
    y = jax.lax.conv_general_dilated(
        x, w[:, :, None, None], (1, 1), "VALID",
        dimension_numbers=("NCHW", "OIHW", "NCHW"))
    return _ref_act(y + b.reshape(1, -1, 1, 1), act)


def _ref_dw(x, w, b, ksz, act):
    c = x.shape[1]
    y = jax.lax.conv_general_dilated(
        x, w.reshape(c, 1, ksz, ksz), (1, 1), [(ksz // 2, ksz // 2)] * 2,
        dimension_numbers=("NCHW", "OIHW", "NCHW"), feature_group_count=c)
    return _ref_act(y + b.reshape(1, -1, 1, 1), act)


def ghost_blocks_reference(params, x, *, out_channels, kernel_size=5,
                           use_res=False):
    x0 = x
    for blk in params["blocks"]:
        x1 = _ref_pw(x, blk["g1_pw"]["w"], blk["g1_pw"]["b"], True)
        x2 = _ref_dw(x1, blk["g1_dw"]["w"], blk["g1_dw"]["b"], 3, True)
        mid = blk["g2_pw"]["w"].shape[1]
        y1 = jnp.concatenate([x1, x2], axis=1)[:, :mid]
        x3 = _ref_pw(y1, blk["g2_pw"]["w"], blk["g2_pw"]["b"], False)
        x4 = _ref_dw(x3, blk["g2_dw"]["w"], blk["g2_dw"]["b"], 3, False)
        y2 = jnp.concatenate([x3, x4], axis=1)[:, :out_channels]
        if "sc_pw" in blk:
            sd = _ref_dw(x, blk["sc_dw"]["w"], blk["sc_dw"]["b"], kernel_size,
                         False)
            sc = _ref_pw(sd, blk["sc_pw"]["w"], blk["sc_pw"]["b"], False)
        else:
            sc = x
        x = y2 + sc
    if use_res:
        x = x + _ref_pw(x0, params["reduce"]["w"], params["reduce"]["b"], True)
    return x


# ----------------------------------------------------------------------------

if __name__ == "__main__":
    key = jax.random.PRNGKey(0)
    kp, kx, kp2, kx2 = jax.random.split(key, 4)

    # Config 1: GhostPAN-style GhostBlocks (in_channels = 2*out_channels so the
    # dw(5x5)+pw conv shortcut is active; num_blocks=1, use_res=False).
    cin, cout, ksz = 32, 16, 5
    params = init_ghost_blocks(kp, cin, cout, expand=1, kernel_size=ksz,
                               num_blocks=1, use_res=False)
    x = jax.random.normal(kx, (2, cin, 16, 16), jnp.float32)
    fwd = jax.jit(make_ghost_blocks_forward(params, out_channels=cout,
                                            kernel_size=ksz, use_res=False))
    out = jax.block_until_ready(fwd(x))
    assert out.shape == (2, cout, 16, 16)
    ref = ghost_blocks_reference(params, x, out_channels=cout, kernel_size=ksz,
                                 use_res=False)
    np.testing.assert_allclose(np.asarray(out), np.asarray(ref),
                               rtol=2e-2, atol=2e-2)

    # Config 2: identity shortcut (cin == cout), 2 stacked blocks, use_res=True.
    params2 = init_ghost_blocks(kp2, 16, 16, expand=1, kernel_size=3,
                                num_blocks=2, use_res=True)
    x2 = jax.random.normal(kx2, (2, 16, 8, 8), jnp.float32)
    fwd2 = jax.jit(make_ghost_blocks_forward(params2, out_channels=16,
                                             kernel_size=3, use_res=True))
    out2 = jax.block_until_ready(fwd2(x2))
    assert out2.shape == (2, 16, 8, 8)
    ref2 = ghost_blocks_reference(params2, x2, out_channels=16, kernel_size=3,
                                  use_res=True)
    np.testing.assert_allclose(np.asarray(out2), np.asarray(ref2),
                               rtol=2e-2, atol=2e-2)

    print("KERNEL_OK")
</pallas_src>

<mosaic_0001>
module attributes {stable_mosaic.version = 11 : i64} {
  func.func @kernel(%arg0: i32, %arg1: memref<32x256xf32, #tpu.memory_space<vmem>>, %arg2: memref<34x256xf32, #tpu.memory_space<vmem>>, %arg3: memref<480x128xf32, #tpu.memory_space<vmem>>, %arg4: memref<16x256xf32, #tpu.memory_space<vmem>>) attributes {dimension_semantics = [#tpu.dimension_semantics<parallel>], iteration_bounds = array<i64: 2>, scalar_prefetch = 0 : i64, scratch_operands = 0 : i64, tpu.core_type = #tpu.core_type<tc>, window_params = [{transform_indices = @transform_0, window_bounds = array<i64: 32, 256>}, {pipeline_mode = #tpu.pipeline_mode<synchronous>, transform_indices = @transform_1, window_bounds = array<i64: 34, 256>}, {pipeline_mode = #tpu.pipeline_mode<synchronous>, transform_indices = @transform_2, window_bounds = array<i64: 480, 128>}, {transform_indices = @transform_3, window_bounds = array<i64: 16, 256>}]} {
    %c0 = arith.constant 0 : index
    %c0_0 = arith.constant 0 : index
    %0 = vector.load %arg1[%c0, %c0_0] : memref<32x256xf32, #tpu.memory_space<vmem>>, vector<32x256xf32>
    %c464 = arith.constant 464 : index
    %c0_1 = arith.constant 0 : index
    %1 = vector.load %arg3[%c464, %c0_1] : memref<480x128xf32, #tpu.memory_space<vmem>>, vector<16x1xf32>
    %c34_i32 = arith.constant 34 : i32
    %2 = tpu.dynamic_rotate %0 by %c34_i32 dim 1 : vector<32x256xf32>, i32 -> vector<32x256xf32>
    %c64 = arith.constant 64 : index
    %c0_2 = arith.constant 0 : index
    %3 = vector.load %arg3[%c64, %c0_2] : memref<480x128xf32, #tpu.memory_space<vmem>>, vector<16x32xf32>
    %cst = arith.constant dense<0.000000e+00> : vector<16x256xf32>
    %4 = tpu.matmul %3, %2, %cst {dimension_numbers = #tpu.dot_dimension_numbers<[1], [0], [0], [1], [0, 0, 1, 1], [], []>} : vector<16x32xf32>, vector<32x256xf32>, vector<16x256xf32> -> vector<16x256xf32>
    %c9 = arith.constant 9 : index
    %c0_3 = arith.constant 0 : index
    %5 = vector.load %arg2[%c9, %c0_3] : memref<34x256xf32, #tpu.memory_space<vmem>>, vector<1x256xf32>
    %6 = vector.broadcast %5 : vector<1x256xf32> to vector<16x256xf32>
    %7 = arith.mulf %4, %6 : vector<16x256xf32>
    %c33_i32 = arith.constant 33 : i32
    %8 = tpu.dynamic_rotate %0 by %c33_i32 dim 1 : vector<32x256xf32>, i32 -> vector<32x256xf32>
    %c80 = arith.constant 80 : index
    %c0_4 = arith.constant 0 : index
    %9 = vector.load %arg3[%c80, %c0_4] : memref<480x128xf32, #tpu.memory_space<vmem>>, vector<16x32xf32>
    %cst_5 = arith.constant dense<0.000000e+00> : vector<16x256xf32>
    %10 = tpu.matmul %9, %8, %cst_5 {dimension_numbers = #tpu.dot_dimension_numbers<[1], [0], [0], [1], [0, 0, 1, 1], [], []>} : vector<16x32xf32>, vector<32x256xf32>, vector<16x256xf32> -> vector<16x256xf32>
    %c10 = arith.constant 10 : index
    %c0_6 = arith.constant 0 : index
    %11 = vector.load %arg2[%c10, %c0_6] : memref<34x256xf32, #tpu.memory_space<vmem>>, vector<1x256xf32>
    %12 = vector.broadcast %11 : vector<1x256xf32> to vector<16x256xf32>
    %13 = arith.mulf %10, %12 : vector<16x256xf32>
    %14 = arith.addf %7, %13 : vector<16x256xf32>
    %c32_i32 = arith.constant 32 : i32
    %15 = tpu.dynamic_rotate %0 by %c32_i32 dim 1 : vector<32x256xf32>, i32 -> vector<32x256xf32>
    %c96 = arith.constant 96 : index
    %c0_7 = arith.constant 0 : index
    %16 = vector.load %arg3[%c96, %c0_7] : memref<480x128xf32, #tpu.memory_space<vmem>>, vector<16x32xf32>
    %cst_8 = arith.constant dense<0.000000e+00> : vector<16x256xf32>
    %17 = tpu.matmul %16, %15, %cst_8 {dimension_numbers = #tpu.dot_dimension_numbers<[1], [0], [0], [1], [0, 0, 1, 1], [], []>} : vector<16x32xf32>, vector<32x256xf32>, vector<16x256xf32> -> vector<16x256xf32>
    %c11 = arith.constant 11 : index
    %c0_9 = arith.constant 0 : index
    %18 = vector.load %arg2[%c11, %c0_9] : memref<34x256xf32, #tpu.memory_space<vmem>>, vector<1x256xf32>
    %19 = vector.broadcast %18 : vector<1x256xf32> to vector<16x256xf32>
    %20 = arith.mulf %17, %19 : vector<16x256xf32>
    %21 = arith.addf %14, %20 : vector<16x256xf32>
    %c31_i32 = arith.constant 31 : i32
    %22 = tpu.dynamic_rotate %0 by %c31_i32 dim 1 : vector<32x256xf32>, i32 -> vector<32x256xf32>
    %c112 = arith.constant 112 : index
    %c0_10 = arith.constant 0 : index
    %23 = vector.load %arg3[%c112, %c0_10] : memref<480x128xf32, #tpu.memory_space<vmem>>, vector<16x32xf32>
    %cst_11 = arith.constant dense<0.000000e+00> : vector<16x256xf32>
    %24 = tpu.matmul %23, %22, %cst_11 {dimension_numbers = #tpu.dot_dimension_numbers<[1], [0], [0], [1], [0, 0, 1, 1], [], []>} : vector<16x32xf32>, vector<32x256xf32>, vector<16x256xf32> -> vector<16x256xf32>
    %c12 = arith.constant 12 : index
    %c0_12 = arith.constant 0 : index
    %25 = vector.load %arg2[%c12, %c0_12] : memref<34x256xf32, #tpu.memory_space<vmem>>, vector<1x256xf32>
    %26 = vector.broadcast %25 : vector<1x256xf32> to vector<16x256xf32>
    %27 = arith.mulf %24, %26 : vector<16x256xf32>
    %28 = arith.addf %21, %27 : vector<16x256xf32>
    %c30_i32 = arith.constant 30 : i32
    %29 = tpu.dynamic_rotate %0 by %c30_i32 dim 1 : vector<32x256xf32>, i32 -> vector<32x256xf32>
    %c128 = arith.constant 128 : index
    %c0_13 = arith.constant 0 : index
    %30 = vector.load %arg3[%c128, %c0_13] : memref<480x128xf32, #tpu.memory_space<vmem>>, vector<16x32xf32>
    %cst_14 = arith.constant dense<0.000000e+00> : vector<16x256xf32>
    %31 = tpu.matmul %30, %29, %cst_14 {dimension_numbers = #tpu.dot_dimension_numbers<[1], [0], [0], [1], [0, 0, 1, 1], [], []>} : vector<16x32xf32>, vector<32x256xf32>, vector<16x256xf32> -> vector<16x256xf32>
    %c13 = arith.constant 13 : index
    %c0_15 = arith.constant 0 : index
    %32 = vector.load %arg2[%c13, %c0_15] : memref<34x256xf32, #tpu.memory_space<vmem>>, vector<1x256xf32>
    %33 = vector.broadcast %32 : vector<1x256xf32> to vector<16x256xf32>
    %34 = arith.mulf %31, %33 : vector<16x256xf32>
    %35 = arith.addf %28, %34 : vector<16x256xf32>
    %c18_i32 = arith.constant 18 : i32
    %36 = tpu.dynamic_rotate %0 by %c18_i32 dim 1 : vector<32x256xf32>, i32 -> vector<32x256xf32>
    %c144 = arith.constant 144 : index
    %c0_16 = arith.constant 0 : index
    %37 = vector.load %arg3[%c144, %c0_16] : memref<480x128xf32, #tpu.memory_space<vmem>>, vector<16x32xf32>
    %cst_17 = arith.constant dense<0.000000e+00> : vector<16x256xf32>
    %38 = tpu.matmul %37, %36, %cst_17 {dimension_numbers = #tpu.dot_dimension_numbers<[1], [0], [0], [1], [0, 0, 1, 1], [], []>} : vector<16x32xf32>, vector<32x256xf32>, vector<16x256xf32> -> vector<16x256xf32>
    %c14 = arith.constant 14 : index
    %c0_18 = arith.constant 0 : index
    %39 = vector.load %arg2[%c14, %c0_18] : memref<34x256xf32, #tpu.memory_space<vmem>>, vector<1x256xf32>
    %40 = vector.broadcast %39 : vector<1x256xf32> to vector<16x256xf32>
    %41 = arith.mulf %38, %40 : vector<16x256xf32>
    %42 = arith.addf %35, %41 : vector<16x256xf32>
    %c17_i32 = arith.constant 17 : i32
    %43 = tpu.dynamic_rotate %0 by %c17_i32 dim 1 : vector<32x256xf32>, i32 -> vector<32x256xf32>
    %c160 = arith.constant 160 : index
    %c0_19 = arith.constant 0 : index
    %44 = vector.load %arg3[%c160, %c0_19] : memref<480x128xf32, #tpu.memory_space<vmem>>, vector<16x32xf32>
    %cst_20 = arith.constant dense<0.000000e+00> : vector<16x256xf32>
    %45 = tpu.matmul %44, %43, %cst_20 {dimension_numbers = #tpu.dot_dimension_numbers<[1], [0], [0], [1], [0, 0, 1, 1], [], []>} : vector<16x32xf32>, vector<32x256xf32>, vector<16x256xf32> -> vector<16x256xf32>
    %c15 = arith.constant 15 : index
    %c0_21 = arith.constant 0 : index
    %46 = vector.load %arg2[%c15, %c0_21] : memref<34x256xf32, #tpu.memory_space<vmem>>, vector<1x256xf32>
    %47 = vector.broadcast %46 : vector<1x256xf32> to vector<16x256xf32>
    %48 = arith.mulf %45, %47 : vector<16x256xf32>
    %49 = arith.addf %42, %48 : vector<16x256xf32>
    %c16_i32 = arith.constant 16 : i32
    %50 = tpu.dynamic_rotate %0 by %c16_i32 dim 1 : vector<32x256xf32>, i32 -> vector<32x256xf32>
    %c176 = arith.constant 176 : index
    %c0_22 = arith.constant 0 : index
    %51 = vector.load %arg3[%c176, %c0_22] : memref<480x128xf32, #tpu.memory_space<vmem>>, vector<16x32xf32>
    %cst_23 = arith.constant dense<0.000000e+00> : vector<16x256xf32>
    %52 = tpu.matmul %51, %50, %cst_23 {dimension_numbers = #tpu.dot_dimension_numbers<[1], [0], [0], [1], [0, 0, 1, 1], [], []>} : vector<16x32xf32>, vector<32x256xf32>, vector<16x256xf32> -> vector<16x256xf32>
    %c16 = arith.constant 16 : index
    %c0_24 = arith.constant 0 : index
    %53 = vector.load %arg2[%c16, %c0_24] : memref<34x256xf32, #tpu.memory_space<vmem>>, vector<1x256xf32>
    %54 = vector.broadcast %53 : vector<1x256xf32> to vector<16x256xf32>
    %55 = arith.mulf %52, %54 : vector<16x256xf32>
    %56 = arith.addf %49, %55 : vector<16x256xf32>
    %c15_i32 = arith.constant 15 : i32
    %57 = tpu.dynamic_rotate %0 by %c15_i32 dim 1 : vector<32x256xf32>, i32 -> vector<32x256xf32>
    %c192 = arith.constant 192 : index
    %c0_25 = arith.constant 0 : index
    %58 = vector.load %arg3[%c192, %c0_25] : memref<480x128xf32, #tpu.memory_space<vmem>>, vector<16x32xf32>
    %cst_26 = arith.constant dense<0.000000e+00> : vector<16x256xf32>
    %59 = tpu.matmul %58, %57, %cst_26 {dimension_numbers = #tpu.dot_dimension_numbers<[1], [0], [0], [1], [0, 0, 1, 1], [], []>} : vector<16x32xf32>, vector<32x256xf32>, vector<16x256xf32> -> vector<16x256xf32>
    %c17 = arith.constant 17 : index
    %c0_27 = arith.constant 0 : index
    %60 = vector.load %arg2[%c17, %c0_27] : memref<34x256xf32, #tpu.memory_space<vmem>>, vector<1x256xf32>
    %61 = vector.broadcast %60 : vector<1x256xf32> to vector<16x256xf32>
    %62 = arith.mulf %59, %61 : vector<16x256xf32>
    %63 = arith.addf %56, %62 : vector<16x256xf32>
    %c14_i32 = arith.constant 14 : i32
    %64 = tpu.dynamic_rotate %0 by %c14_i32 dim 1 : vector<32x256xf32>, i32 -> vector<32x256xf32>
    %c208 = arith.constant 208 : index
    %c0_28 = arith.constant 0 : index
    %65 = vector.load %arg3[%c208, %c0_28] : memref<480x128xf32, #tpu.memory_space<vmem>>, vector<16x32xf32>
    %cst_29 = arith.constant dense<0.000000e+00> : vector<16x256xf32>
    %66 = tpu.matmul %65, %64, %cst_29 {dimension_numbers = #tpu.dot_dimension_numbers<[1], [0], [0], [1], [0, 0, 1, 1], [], []>} : vector<16x32xf32>, vector<32x256xf32>, vector<16x256xf32> -> vector<16x256xf32>
    %c18 = arith.constant 18 : index
    %c0_30 = arith.constant 0 : index
    %67 = vector.load %arg2[%c18, %c0_30] : memref<34x256xf32, #tpu.memory_space<vmem>>, vector<1x256xf32>
    %68 = vector.broadcast %67 : vector<1x256xf32> to vector<16x256xf32>
    %69 = arith.mulf %66, %68 : vector<16x256xf32>
    %70 = arith.addf %63, %69 : vector<16x256xf32>
    %c2_i32 = arith.constant 2 : i32
    %71 = tpu.dynamic_rotate %0 by %c2_i32 dim 1 : vector<32x256xf32>, i32 -> vector<32x256xf32>
    %c224 = arith.constant 224 : index
    %c0_31 = arith.constant 0 : index
    %72 = vector.load %arg3[%c224, %c0_31] : memref<480x128xf32, #tpu.memory_space<vmem>>, vector<16x32xf32>
    %cst_32 = arith.constant dense<0.000000e+00> : vector<16x256xf32>
    %73 = tpu.matmul %72, %71, %cst_32 {dimension_numbers = #tpu.dot_dimension_numbers<[1], [0], [0], [1], [0, 0, 1, 1], [], []>} : vector<16x32xf32>, vector<32x256xf32>, vector<16x256xf32> -> vector<16x256xf32>
    %c19 = arith.constant 19 : index
    %c0_33 = arith.constant 0 : index
    %74 = vector.load %arg2[%c19, %c0_33] : memref<34x256xf32, #tpu.memory_space<vmem>>, vector<1x256xf32>
    %75 = vector.broadcast %74 : vector<1x256xf32> to vector<16x256xf32>
    %76 = arith.mulf %73, %75 : vector<16x256xf32>
    %77 = arith.addf %70, %76 : vector<16x256xf32>
    %c1_i32 = arith.constant 1 : i32
    %78 = tpu.dynamic_rotate %0 by %c1_i32 dim 1 : vector<32x256xf32>, i32 -> vector<32x256xf32>
    %c240 = arith.constant 240 : index
    %c0_34 = arith.constant 0 : index
    %79 = vector.load %arg3[%c240, %c0_34] : memref<480x128xf32, #tpu.memory_space<vmem>>, vector<16x32xf32>
    %cst_35 = arith.constant dense<0.000000e+00> : vector<16x256xf32>
    %80 = tpu.matmul %79, %78, %cst_35 {dimension_numbers = #tpu.dot_dimension_numbers<[1], [0], [0], [1], [0, 0, 1, 1], [], []>} : vector<16x32xf32>, vector<32x256xf32>, vector<16x256xf32> -> vector<16x256xf32>
    %c20 = arith.constant 20 : index
    %c0_36 = arith.constant 0 : index
    %81 = vector.load %arg2[%c20, %c0_36] : memref<34x256xf32, #tpu.memory_space<vmem>>, vector<1x256xf32>
    %82 = vector.broadcast %81 : vector<1x256xf32> to vector<16x256xf32>
    %83 = arith.mulf %80, %82 : vector<16x256xf32>
    %84 = arith.addf %77, %83 : vector<16x256xf32>
    %c256 = arith.constant 256 : index
    %c0_37 = arith.constant 0 : index
    %85 = vector.load %arg3[%c256, %c0_37] : memref<480x128xf32, #tpu.memory_space<vmem>>, vector<16x32xf32>
    %cst_38 = arith.constant dense<0.000000e+00> : vector<16x256xf32>
    %86 = tpu.matmul %85, %0, %cst_38 {dimension_numbers = #tpu.dot_dimension_numbers<[1], [0], [0], [1], [0, 0, 1, 1], [], []>} : vector<16x32xf32>, vector<32x256xf32>, vector<16x256xf32> -> vector<16x256xf32>
    %c21 = arith.constant 21 : index
    %c0_39 = arith.constant 0 : index
    %87 = vector.load %arg2[%c21, %c0_39] : memref<34x256xf32, #tpu.memory_space<vmem>>, vector<1x256xf32>
    %88 = vector.broadcast %87 : vector<1x256xf32> to vector<16x256xf32>
    %89 = arith.mulf %86, %88 : vector<16x256xf32>
    %90 = arith.addf %84, %89 : vector<16x256xf32>
    %c255_i32 = arith.constant 255 : i32
    %91 = tpu.dynamic_rotate %0 by %c255_i32 dim 1 : vector<32x256xf32>, i32 -> vector<32x256xf32>
    %c272 = arith.constant 272 : index
    %c0_40 = arith.constant 0 : index
    %92 = vector.load %arg3[%c272, %c0_40] : memref<480x128xf32, #tpu.memory_space<vmem>>, vector<16x32xf32>
    %cst_41 = arith.constant dense<0.000000e+00> : vector<16x256xf32>
    %93 = tpu.matmul %92, %91, %cst_41 {dimension_numbers = #tpu.dot_dimension_numbers<[1], [0], [0], [1], [0, 0, 1, 1], [], []>} : vector<16x32xf32>, vector<32x256xf32>, vector<16x256xf32> -> vector<16x256xf32>
    %c22 = arith.constant 22 : index
    %c0_42 = arith.constant 0 : index
    %94 = vector.load %arg2[%c22, %c0_42] : memref<34x256xf32, #tpu.memory_space<vmem>>, vector<1x256xf32>
    %95 = vector.broadcast %94 : vector<1x256xf32> to vector<16x256xf32>
    %96 = arith.mulf %93, %95 : vector<16x256xf32>
    %97 = arith.addf %90, %96 : vector<16x256xf32>
    %c254_i32 = arith.constant 254 : i32
    %98 = tpu.dynamic_rotate %0 by %c254_i32 dim 1 : vector<32x256xf32>, i32 -> vector<32x256xf32>
    %c288 = arith.constant 288 : index
    %c0_43 = arith.constant 0 : index
    %99 = vector.load %arg3[%c288, %c0_43] : memref<480x128xf32, #tpu.memory_space<vmem>>, vector<16x32xf32>
    %cst_44 = arith.constant dense<0.000000e+00> : vector<16x256xf32>
    %100 = tpu.matmul %99, %98, %cst_44 {dimension_numbers = #tpu.dot_dimension_numbers<[1], [0], [0], [1], [0, 0, 1, 1], [], []>} : vector<16x32xf32>, vector<32x256xf32>, vector<16x256xf32> -> vector<16x256xf32>
    %c23 = arith.constant 23 : index
    %c0_45 = arith.constant 0 : index
    %101 = vector.load %arg2[%c23, %c0_45] : memref<34x256xf32, #tpu.memory_space<vmem>>, vector<1x256xf32>
    %102 = vector.broadcast %101 : vector<1x256xf32> to vector<16x256xf32>
    %103 = arith.mulf %100, %102 : vector<16x256xf32>
    %104 = arith.addf %97, %103 : vector<16x256xf32>
    %c242_i32 = arith.constant 242 : i32
    %105 = tpu.dynamic_rotate %0 by %c242_i32 dim 1 : vector<32x256xf32>, i32 -> vector<32x256xf32>
    %c304 = arith.constant 304 : index
    %c0_46 = arith.constant 0 : index
    %106 = vector.load %arg3[%c304, %c0_46] : memref<480x128xf32, #tpu.memory_space<vmem>>, vector<16x32xf32>
    %cst_47 = arith.constant dense<0.000000e+00> : vector<16x256xf32>
    %107 = tpu.matmul %106, %105, %cst_47 {dimension_numbers = #tpu.dot_dimension_numbers<[1], [0], [0], [1], [0, 0, 1, 1], [], []>} : vector<16x32xf32>, vector<32x256xf32>, vector<16x256xf32> -> vector<16x256xf32>
    %c24 = arith.constant 24 : index
    %c0_48 = arith.constant 0 : index
    %108 = vector.load %arg2[%c24, %c0_48] : memref<34x256xf32, #tpu.memory_space<vmem>>, vector<1x256xf32>
    %109 = vector.broadcast %108 : vector<1x256xf32> to vector<16x256xf32>
    %110 = arith.mulf %107, %109 : vector<16x256xf32>
    %111 = arith.addf %104, %110 : vector<16x256xf32>
    %c241_i32 = arith.constant 241 : i32
    %112 = tpu.dynamic_rotate %0 by %c241_i32 dim 1 : vector<32x256xf32>, i32 -> vector<32x256xf32>
    %c320 = arith.constant 320 : index
    %c0_49 = arith.constant 0 : index
    %113 = vector.load %arg3[%c320, %c0_49] : memref<480x128xf32, #tpu.memory_space<vmem>>, vector<16x32xf32>
    %cst_50 = arith.constant dense<0.000000e+00> : vector<16x256xf32>
    %114 = tpu.matmul %113, %112, %cst_50 {dimension_numbers = #tpu.dot_dimension_numbers<[1], [0], [0], [1], [0, 0, 1, 1], [], []>} : vector<16x32xf32>, vector<32x256xf32>, vector<16x256xf32> -> vector<16x256xf32>
    %c25 = arith.constant 25 : index
    %c0_51 = arith.constant 0 : index
    %115 = vector.load %arg2[%c25, %c0_51] : memref<34x256xf32, #tpu.memory_space<vmem>>, vector<1x256xf32>
    %116 = vector.broadcast %115 : vector<1x256xf32> to vector<16x256xf32>
    %117 = arith.mulf %114, %116 : vector<16x256xf32>
    %118 = arith.addf %111, %117 : vector<16x256xf32>
    %c240_i32 = arith.constant 240 : i32
    %119 = tpu.dynamic_rotate %0 by %c240_i32 dim 1 : vector<32x256xf32>, i32 -> vector<32x256xf32>
    %c336 = arith.constant 336 : index
    %c0_52 = arith.constant 0 : index
    %120 = vector.load %arg3[%c336, %c0_52] : memref<480x128xf32, #tpu.memory_space<vmem>>, vector<16x32xf32>
    %cst_53 = arith.constant dense<0.000000e+00> : vector<16x256xf32>
    %121 = tpu.matmul %120, %119, %cst_53 {dimension_numbers = #tpu.dot_dimension_numbers<[1], [0], [0], [1], [0, 0, 1, 1], [], []>} : vector<16x32xf32>, vector<32x256xf32>, vector<16x256xf32> -> vector<16x256xf32>
    %c26 = arith.constant 26 : index
    %c0_54 = arith.constant 0 : index
    %122 = vector.load %arg2[%c26, %c0_54] : memref<34x256xf32, #tpu.memory_space<vmem>>, vector<1x256xf32>
    %123 = vector.broadcast %122 : vector<1x256xf32> to vector<16x256xf32>
    %124 = arith.mulf %121, %123 : vector<16x256xf32>
    %125 = arith.addf %118, %124 : vector<16x256xf32>
    %c239_i32 = arith.constant 239 : i32
    %126 = tpu.dynamic_rotate %0 by %c239_i32 dim 1 : vector<32x256xf32>, i32 -> vector<32x256xf32>
    %c352 = arith.constant 352 : index
    %c0_55 = arith.constant 0 : index
    %127 = vector.load %arg3[%c352, %c0_55] : memref<480x128xf32, #tpu.memory_space<vmem>>, vector<16x32xf32>
    %cst_56 = arith.constant dense<0.000000e+00> : vector<16x256xf32>
    %128 = tpu.matmul %127, %126, %cst_56 {dimension_numbers = #tpu.dot_dimension_numbers<[1], [0], [0], [1], [0, 0, 1, 1], [], []>} : vector<16x32xf32>, vector<32x256xf32>, vector<16x256xf32> -> vector<16x256xf32>
    %c27 = arith.constant 27 : index
    %c0_57 = arith.constant 0 : index
    %129 = vector.load %arg2[%c27, %c0_57] : memref<34x256xf32, #tpu.memory_space<vmem>>, vector<1x256xf32>
    %130 = vector.broadcast %129 : vector<1x256xf32> to vector<16x256xf32>
    %131 = arith.mulf %128, %130 : vector<16x256xf32>
    %132 = arith.addf %125, %131 : vector<16x256xf32>
    %c238_i32 = arith.constant 238 : i32
    %133 = tpu.dynamic_rotate %0 by %c238_i32 dim 1 : vector<32x256xf32>, i32 -> vector<32x256xf32>
    %c368 = arith.constant 368 : index
    %c0_58 = arith.constant 0 : index
    %134 = vector.load %arg3[%c368, %c0_58] : memref<480x128xf32, #tpu.memory_space<vmem>>, vector<16x32xf32>
    %cst_59 = arith.constant dense<0.000000e+00> : vector<16x256xf32>
    %135 = tpu.matmul %134, %133, %cst_59 {dimension_numbers = #tpu.dot_dimension_numbers<[1], [0], [0], [1], [0, 0, 1, 1], [], []>} : vector<16x32xf32>, vector<32x256xf32>, vector<16x256xf32> -> vector<16x256xf32>
    %c28 = arith.constant 28 : index
    %c0_60 = arith.constant 0 : index
    %136 = vector.load %arg2[%c28, %c0_60] : memref<34x256xf32, #tpu.memory_space<vmem>>, vector<1x256xf32>
    %137 = vector.broadcast %136 : vector<1x256xf32> to vector<16x256xf32>
    %138 = arith.mulf %135, %137 : vector<16x256xf32>
    %139 = arith.addf %132, %138 : vector<16x256xf32>
    %c226_i32 = arith.constant 226 : i32
    %140 = tpu.dynamic_rotate %0 by %c226_i32 dim 1 : vector<32x256xf32>, i32 -> vector<32x256xf32>
    %c384 = arith.constant 384 : index
    %c0_61 = arith.constant 0 : index
    %141 = vector.load %arg3[%c384, %c0_61] : memref<480x128xf32, #tpu.memory_space<vmem>>, vector<16x32xf32>
    %cst_62 = arith.constant dense<0.000000e+00> : vector<16x256xf32>
    %142 = tpu.matmul %141, %140, %cst_62 {dimension_numbers = #tpu.dot_dimension_numbers<[1], [0], [0], [1], [0, 0, 1, 1], [], []>} : vector<16x32xf32>, vector<32x256xf32>, vector<16x256xf32> -> vector<16x256xf32>
    %c29 = arith.constant 29 : index
    %c0_63 = arith.constant 0 : index
    %143 = vector.load %arg2[%c29, %c0_63] : memref<34x256xf32, #tpu.memory_space<vmem>>, vector<1x256xf32>
    %144 = vector.broadcast %143 : vector<1x256xf32> to vector<16x256xf32>
    %145 = arith.mulf %142, %144 : vector<16x256xf32>
    %146 = arith.addf %139, %145 : vector<16x256xf32>
    %c225_i32 = arith.constant 225 : i32
    %147 = tpu.dynamic_rotate %0 by %c225_i32 dim 1 : vector<32x256xf32>, i32 -> vector<32x256xf32>
    %c400 = arith.constant 400 : index
    %c0_64 = arith.constant 0 : index
    %148 = vector.load %arg3[%c400, %c0_64] : memref<480x128xf32, #tpu.memory_space<vmem>>, vector<16x32xf32>
    %cst_65 = arith.constant dense<0.000000e+00> : vector<16x256xf32>
    %149 = tpu.matmul %148, %147, %cst_65 {dimension_numbers = #tpu.dot_dimension_numbers<[1], [0], [0], [1], [0, 0, 1, 1], [], []>} : vector<16x32xf32>, vector<32x256xf32>, vector<16x256xf32> -> vector<16x256xf32>
    %c30 = arith.constant 30 : index
    %c0_66 = arith.constant 0 : index
    %150 = vector.load %arg2[%c30, %c0_66] : memref<34x256xf32, #tpu.memory_space<vmem>>, vector<1x256xf32>
    %151 = vector.broadcast %150 : vector<1x256xf32> to vector<16x256xf32>
    %152 = arith.mulf %149, %151 : vector<16x256xf32>
    %153 = arith.addf %146, %152 : vector<16x256xf32>
    %c224_i32 = arith.constant 224 : i32
    %154 = tpu.dynamic_rotate %0 by %c224_i32 dim 1 : vector<32x256xf32>, i32 -> vector<32x256xf32>
    %c416 = arith.constant 416 : index
    %c0_67 = arith.constant 0 : index
    %155 = vector.load %arg3[%c416, %c0_67] : memref<480x128xf32, #tpu.memory_space<vmem>>, vector<16x32xf32>
    %cst_68 = arith.constant dense<0.000000e+00> : vector<16x256xf32>
    %156 = tpu.matmul %155, %154, %cst_68 {dimension_numbers = #tpu.dot_dimension_numbers<[1], [0], [0], [1], [0, 0, 1, 1], [], []>} : vector<16x32xf32>, vector<32x256xf32>, vector<16x256xf32> -> vector<16x256xf32>
    %c31 = arith.constant 31 : index
    %c0_69 = arith.constant 0 : index
    %157 = vector.load %arg2[%c31, %c0_69] : memref<34x256xf32, #tpu.memory_space<vmem>>, vector<1x256xf32>
    %158 = vector.broadcast %157 : vector<1x256xf32> to vector<16x256xf32>
    %159 = arith.mulf %156, %158 : vector<16x256xf32>
    %160 = arith.addf %153, %159 : vector<16x256xf32>
    %c223_i32 = arith.constant 223 : i32
    %161 = tpu.dynamic_rotate %0 by %c223_i32 dim 1 : vector<32x256xf32>, i32 -> vector<32x256xf32>
    %c432 = arith.constant 432 : index
    %c0_70 = arith.constant 0 : index
    %162 = vector.load %arg3[%c432, %c0_70] : memref<480x128xf32, #tpu.memory_space<vmem>>, vector<16x32xf32>
    %cst_71 = arith.constant dense<0.000000e+00> : vector<16x256xf32>
    %163 = tpu.matmul %162, %161, %cst_71 {dimension_numbers = #tpu.dot_dimension_numbers<[1], [0], [0], [1], [0, 0, 1, 1], [], []>} : vector<16x32xf32>, vector<32x256xf32>, vector<16x256xf32> -> vector<16x256xf32>
    %c32 = arith.constant 32 : index
    %c0_72 = arith.constant 0 : index
    %164 = vector.load %arg2[%c32, %c0_72] : memref<34x256xf32, #tpu.memory_space<vmem>>, vector<1x256xf32>
    %165 = vector.broadcast %164 : vector<1x256xf32> to vector<16x256xf32>
    %166 = arith.mulf %163, %165 : vector<16x256xf32>
    %167 = arith.addf %160, %166 : vector<16x256xf32>
    %c222_i32 = arith.constant 222 : i32
    %168 = tpu.dynamic_rotate %0 by %c222_i32 dim 1 : vector<32x256xf32>, i32 -> vector<32x256xf32>
    %c448 = arith.constant 448 : index
    %c0_73 = arith.constant 0 : index
    %169 = vector.load %arg3[%c448, %c0_73] : memref<480x128xf32, #tpu.memory_space<vmem>>, vector<16x32xf32>
    %cst_74 = arith.constant dense<0.000000e+00> : vector<16x256xf32>
    %170 = tpu.matmul %169, %168, %cst_74 {dimension_numbers = #tpu.dot_dimension_numbers<[1], [0], [0], [1], [0, 0, 1, 1], [], []>} : vector<16x32xf32>, vector<32x256xf32>, vector<16x256xf32> -> vector<16x256xf32>
    %c33 = arith.constant 33 : index
    %c0_75 = arith.constant 0 : index
    %171 = vector.load %arg2[%c33, %c0_75] : memref<34x256xf32, #tpu.memory_space<vmem>>, vector<1x256xf32>
    %172 = vector.broadcast %171 : vector<1x256xf32> to vector<16x256xf32>
    %173 = arith.mulf %170, %172 : vector<16x256xf32>
    %174 = arith.addf %167, %173 : vector<16x256xf32>
    %175 = vector.broadcast %1 : vector<16x1xf32> to vector<16x256xf32>
    %176 = arith.addf %174, %175 : vector<16x256xf32>
    %c0_76 = arith.constant 0 : index
    %c0_77 = arith.constant 0 : index
    %177 = vector.load %arg3[%c0_76, %c0_77] : memref<480x128xf32, #tpu.memory_space<vmem>>, vector<8x32xf32>
    %cst_78 = arith.constant dense<0.000000e+00> : vector<8x256xf32>
    %178 = tpu.matmul %177, %0, %cst_78 {dimension_numbers = #tpu.dot_dimension_numbers<[1], [0], [0], [1], [0, 0, 1, 1], [], []>} : vector<8x32xf32>, vector<32x256xf32>, vector<8x256xf32> -> vector<8x256xf32>
    %c8 = arith.constant 8 : index
    %c0_79 = arith.constant 0 : index
    %179 = vector.load %arg3[%c8, %c0_79] : memref<480x128xf32, #tpu.memory_space<vmem>>, vector<8x1xf32>
    %180 = vector.broadcast %179 : vector<8x1xf32> to vector<8x256xf32>
    %181 = arith.addf %178, %180 : vector<8x256xf32>
    %cst_80 = arith.constant 1.000000e-01 : f32
    %182 = vector.broadcast %cst_80 : f32 to vector<8x256xf32>
    %183 = arith.mulf %182, %181 : vector<8x256xf32>
    %184 = arith.maximumf %181, %183 : vector<8x256xf32>
    %c16_81 = arith.constant 16 : index
    %c0_82 = arith.constant 0 : index
    %185 = vector.load %arg3[%c16_81, %c0_82] : memref<480x128xf32, #tpu.memory_space<vmem>>, vector<8x9xf32>
    %c24_83 = arith.constant 24 : index
    %c0_84 = arith.constant 0 : index
    %186 = vector.load %arg3[%c24_83, %c0_84] : memref<480x128xf32, #tpu.memory_space<vmem>>, vector<8x1xf32>
    %c0_85 = arith.constant 0 : index
    %c0_86 = arith.constant 0 : index
    %187 = vector.load %arg2[%c0_85, %c0_86] : memref<34x256xf32, #tpu.memory_space<vmem>>, vector<9x256xf32>
    %c17_i32_87 = arith.constant 17 : i32
    %188 = tpu.dynamic_rotate %184 by %c17_i32_87 dim 1 : vector<8x256xf32>, i32 -> vector<8x256xf32>
    %189 = vector.extract_strided_slice %187 {offsets = [0, 0], sizes = [1, 256], strides = [1, 1]} : vector<9x256xf32> to vector<1x256xf32>
    %190 = vector.broadcast %189 : vector<1x256xf32> to vector<8x256xf32>
    %191 = arith.mulf %188, %190 : vector<8x256xf32>
    %192 = vector.extract_strided_slice %185 {offsets = [0, 0], sizes = [8, 1], strides = [1, 1]} : vector<8x9xf32> to vector<8x1xf32>
    %193 = vector.broadcast %192 : vector<8x1xf32> to vector<8x256xf32>
    %194 = arith.mulf %191, %193 : vector<8x256xf32>
    %c16_i32_88 = arith.constant 16 : i32
    %195 = tpu.dynamic_rotate %184 by %c16_i32_88 dim 1 : vector<8x256xf32>, i32 -> vector<8x256xf32>
    %196 = vector.extract_strided_slice %187 {offsets = [1, 0], sizes = [1, 256], strides = [1, 1]} : vector<9x256xf32> to vector<1x256xf32>
    %197 = vector.broadcast %196 : vector<1x256xf32> to vector<8x256xf32>
    %198 = arith.mulf %195, %197 : vector<8x256xf32>
    %199 = vector.extract_strided_slice %185 {offsets = [0, 1], sizes = [8, 1], strides = [1, 1]} : vector<8x9xf32> to vector<8x1xf32>
    %200 = vector.broadcast %199 : vector<8x1xf32> to vector<8x256xf32>
    %201 = arith.mulf %198, %200 : vector<8x256xf32>
    %202 = arith.addf %194, %201 : vector<8x256xf32>
    %c15_i32_89 = arith.constant 15 : i32
    %203 = tpu.dynamic_rotate %184 by %c15_i32_89 dim 1 : vector<8x256xf32>, i32 -> vector<8x256xf32>
    %204 = vector.extract_strided_slice %187 {offsets = [2, 0], sizes = [1, 256], strides = [1, 1]} : vector<9x256xf32> to vector<1x256xf32>
    %205 = vector.broadcast %204 : vector<1x256xf32> to vector<8x256xf32>
    %206 = arith.mulf %203, %205 : vector<8x256xf32>
    %207 = vector.extract_strided_slice %185 {offsets = [0, 2], sizes = [8, 1], strides = [1, 1]} : vector<8x9xf32> to vector<8x1xf32>
    %208 = vector.broadcast %207 : vector<8x1xf32> to vector<8x256xf32>
    %209 = arith.mulf %206, %208 : vector<8x256xf32>
    %210 = arith.addf %202, %209 : vector<8x256xf32>
    %c1_i32_90 = arith.constant 1 : i32
    %211 = tpu.dynamic_rotate %184 by %c1_i32_90 dim 1 : vector<8x256xf32>, i32 -> vector<8x256xf32>
    %212 = vector.extract_strided_slice %187 {offsets = [3, 0], sizes = [1, 256], strides = [1, 1]} : vector<9x256xf32> to vector<1x256xf32>
    %213 = vector.broadcast %212 : vector<1x256xf32> to vector<8x256xf32>
    %214 = arith.mulf %211, %213 : vector<8x256xf32>
    %215 = vector.extract_strided_slice %185 {offsets = [0, 3], sizes = [8, 1], strides = [1, 1]} : vector<8x9xf32> to vector<8x1xf32>
    %216 = vector.broadcast %215 : vector<8x1xf32> to vector<8x256xf32>
    %217 = arith.mulf %214, %216 : vector<8x256xf32>
    %218 = arith.addf %210, %217 : vector<8x256xf32>
    %219 = vector.extract_strided_slice %187 {offsets = [4, 0], sizes = [1, 256], strides = [1, 1]} : vector<9x256xf32> to vector<1x256xf32>
    %220 = vector.broadcast %219 : vector<1x256xf32> to vector<8x256xf32>
    %221 = arith.mulf %184, %220 : vector<8x256xf32>
    %222 = vector.extract_strided_slice %185 {offsets = [0, 4], sizes = [8, 1], strides = [1, 1]} : vector<8x9xf32> to vector<8x1xf32>
    %223 = vector.broadcast %222 : vector<8x1xf32> to vector<8x256xf32>
    %224 = arith.mulf %221, %223 : vector<8x256xf32>
    %225 = arith.addf %218, %224 : vector<8x256xf32>
    %c255_i32_91 = arith.constant 255 : i32
    %226 = tpu.dynamic_rotate %184 by %c255_i32_91 dim 1 : vector<8x256xf32>, i32 -> vector<8x256xf32>
    %227 = vector.extract_strided_slice %187 {offsets = [5, 0], sizes = [1, 256], strides = [1, 1]} : vector<9x256xf32> to vector<1x256xf32>
    %228 = vector.broadcast %227 : vector<1x256xf32> to vector<8x256xf32>
    %229 = arith.mulf %226, %228 : vector<8x256xf32>
    %230 = vector.extract_strided_slice %185 {offsets = [0, 5], sizes = [8, 1], strides = [1, 1]} : vector<8x9xf32> to vector<8x1xf32>
    %231 = vector.broadcast %230 : vector<8x1xf32> to vector<8x256xf32>
    %232 = arith.mulf %229, %231 : vector<8x256xf32>
    %233 = arith.addf %225, %232 : vector<8x256xf32>
    %c241_i32_92 = arith.constant 241 : i32
    %234 = tpu.dynamic_rotate %184 by %c241_i32_92 dim 1 : vector<8x256xf32>, i32 -> vector<8x256xf32>
    %235 = vector.extract_strided_slice %187 {offsets = [6, 0], sizes = [1, 256], strides = [1, 1]} : vector<9x256xf32> to vector<1x256xf32>
    %236 = vector.broadcast %235 : vector<1x256xf32> to vector<8x256xf32>
    %237 = arith.mulf %234, %236 : vector<8x256xf32>
    %238 = vector.extract_strided_slice %185 {offsets = [0, 6], sizes = [8, 1], strides = [1, 1]} : vector<8x9xf32> to vector<8x1xf32>
    %239 = vector.broadcast %238 : vector<8x1xf32> to vector<8x256xf32>
    %240 = arith.mulf %237, %239 : vector<8x256xf32>
    %241 = arith.addf %233, %240 : vector<8x256xf32>
    %c240_i32_93 = arith.constant 240 : i32
    %242 = tpu.dynamic_rotate %184 by %c240_i32_93 dim 1 : vector<8x256xf32>, i32 -> vector<8x256xf32>
    %243 = vector.extract_strided_slice %187 {offsets = [7, 0], sizes = [1, 256], strides = [1, 1]} : vector<9x256xf32> to vector<1x256xf32>
    %244 = vector.broadcast %243 : vector<1x256xf32> to vector<8x256xf32>
    %245 = arith.mulf %242, %244 : vector<8x256xf32>
    %246 = vector.extract_strided_slice %185 {offsets = [0, 7], sizes = [8, 1], strides = [1, 1]} : vector<8x9xf32> to vector<8x1xf32>
    %247 = vector.broadcast %246 : vector<8x1xf32> to vector<8x256xf32>
    %248 = arith.mulf %245, %247 : vector<8x256xf32>
    %249 = arith.addf %241, %248 : vector<8x256xf32>
    %c239_i32_94 = arith.constant 239 : i32
    %250 = tpu.dynamic_rotate %184 by %c239_i32_94 dim 1 : vector<8x256xf32>, i32 -> vector<8x256xf32>
    %251 = vector.extract_strided_slice %187 {offsets = [8, 0], sizes = [1, 256], strides = [1, 1]} : vector<9x256xf32> to vector<1x256xf32>
    %252 = vector.broadcast %251 : vector<1x256xf32> to vector<8x256xf32>
    %253 = arith.mulf %250, %252 : vector<8x256xf32>
    %254 = vector.extract_strided_slice %185 {offsets = [0, 8], sizes = [8, 1], strides = [1, 1]} : vector<8x9xf32> to vector<8x1xf32>
    %255 = vector.broadcast %254 : vector<8x1xf32> to vector<8x256xf32>
    %256 = arith.mulf %253, %255 : vector<8x256xf32>
    %257 = arith.addf %249, %256 : vector<8x256xf32>
    %258 = vector.broadcast %186 : vector<8x1xf32> to vector<8x256xf32>
    %259 = arith.addf %257, %258 : vector<8x256xf32>
    %cst_95 = arith.constant 1.000000e-01 : f32
    %260 = vector.broadcast %cst_95 : f32 to vector<8x256xf32>
    %261 = arith.mulf %260, %259 : vector<8x256xf32>
    %262 = arith.maximumf %259, %261 : vector<8x256xf32>
    %263 = tpu.concatenate %184, %262 in 0 : vector<8x256xf32>, vector<8x256xf32> -> vector<16x256xf32>
    %c32_96 = arith.constant 32 : index
    %c0_97 = arith.constant 0 : index
    %264 = vector.load %arg3[%c32_96, %c0_97] : memref<480x128xf32, #tpu.memory_space<vmem>>, vector<8x16xf32>
    %cst_98 = arith.constant dense<0.000000e+00> : vector<8x256xf32>
    %265 = tpu.matmul %264, %263, %cst_98 {dimension_numbers = #tpu.dot_dimension_numbers<[1], [0], [0], [1], [0, 0, 1, 1], [], []>} : vector<8x16xf32>, vector<16x256xf32>, vector<8x256xf32> -> vector<8x256xf32>
    %c40 = arith.constant 40 : index
    %c0_99 = arith.constant 0 : index
    %266 = vector.load %arg3[%c40, %c0_99] : memref<480x128xf32, #tpu.memory_space<vmem>>, vector<8x1xf32>
    %267 = vector.broadcast %266 : vector<8x1xf32> to vector<8x256xf32>
    %268 = arith.addf %265, %267 : vector<8x256xf32>
    %c48 = arith.constant 48 : index
    %c0_100 = arith.constant 0 : index
    %269 = vector.load %arg3[%c48, %c0_100] : memref<480x128xf32, #tpu.memory_space<vmem>>, vector<8x9xf32>
    %c56 = arith.constant 56 : index
    %c0_101 = arith.constant 0 : index
    %270 = vector.load %arg3[%c56, %c0_101] : memref<480x128xf32, #tpu.memory_space<vmem>>, vector<8x1xf32>
    %c0_102 = arith.constant 0 : index
    %c0_103 = arith.constant 0 : index
    %271 = vector.load %arg2[%c0_102, %c0_103] : memref<34x256xf32, #tpu.memory_space<vmem>>, vector<9x256xf32>
    %c17_i32_104 = arith.constant 17 : i32
    %272 = tpu.dynamic_rotate %268 by %c17_i32_104 dim 1 : vector<8x256xf32>, i32 -> vector<8x256xf32>
    %273 = vector.extract_strided_slice %271 {offsets = [0, 0], sizes = [1, 256], strides = [1, 1]} : vector<9x256xf32> to vector<1x256xf32>
    %274 = vector.broadcast %273 : vector<1x256xf32> to vector<8x256xf32>
    %275 = arith.mulf %272, %274 : vector<8x256xf32>
    %276 = vector.extract_strided_slice %269 {offsets = [0, 0], sizes = [8, 1], strides = [1, 1]} : vector<8x9xf32> to vector<8x1xf32>
    %277 = vector.broadcast %276 : vector<8x1xf32> to vector<8x256xf32>
    %278 = arith.mulf %275, %277 : vector<8x256xf32>
    %c16_i32_105 = arith.constant 16 : i32
    %279 = tpu.dynamic_rotate %268 by %c16_i32_105 dim 1 : vector<8x256xf32>, i32 -> vector<8x256xf32>
    %280 = vector.extract_strided_slice %271 {offsets = [1, 0], sizes = [1, 256], strides = [1, 1]} : vector<9x256xf32> to vector<1x256xf32>
    %281 = vector.broadcast %280 : vector<1x256xf32> to vector<8x256xf32>
    %282 = arith.mulf %279, %281 : vector<8x256xf32>
    %283 = vector.extract_strided_slice %269 {offsets = [0, 1], sizes = [8, 1], strides = [1, 1]} : vector<8x9xf32> to vector<8x1xf32>
    %284 = vector.broadcast %283 : vector<8x1xf32> to vector<8x256xf32>
    %285 = arith.mulf %282, %284 : vector<8x256xf32>
    %286 = arith.addf %278, %285 : vector<8x256xf32>
    %c15_i32_106 = arith.constant 15 : i32
    %287 = tpu.dynamic_rotate %268 by %c15_i32_106 dim 1 : vector<8x256xf32>, i32 -> vector<8x256xf32>
    %288 = vector.extract_strided_slice %271 {offsets = [2, 0], sizes = [1, 256], strides = [1, 1]} : vector<9x256xf32> to vector<1x256xf32>
    %289 = vector.broadcast %288 : vector<1x256xf32> to vector<8x256xf32>
    %290 = arith.mulf %287, %289 : vector<8x256xf32>
    %291 = vector.extract_strided_slice %269 {offsets = [0, 2], sizes = [8, 1], strides = [1, 1]} : vector<8x9xf32> to vector<8x1xf32>
    %292 = vector.broadcast %291 : vector<8x1xf32> to vector<8x256xf32>
    %293 = arith.mulf %290, %292 : vector<8x256xf32>
    %294 = arith.addf %286, %293 : vector<8x256xf32>
    %c1_i32_107 = arith.constant 1 : i32
    %295 = tpu.dynamic_rotate %268 by %c1_i32_107 dim 1 : vector<8x256xf32>, i32 -> vector<8x256xf32>
    %296 = vector.extract_strided_slice %271 {offsets = [3, 0], sizes = [1, 256], strides = [1, 1]} : vector<9x256xf32> to vector<1x256xf32>
    %297 = vector.broadcast %296 : vector<1x256xf32> to vector<8x256xf32>
    %298 = arith.mulf %295, %297 : vector<8x256xf32>
    %299 = vector.extract_strided_slice %269 {offsets = [0, 3], sizes = [8, 1], strides = [1, 1]} : vector<8x9xf32> to vector<8x1xf32>
    %300 = vector.broadcast %299 : vector<8x1xf32> to vector<8x256xf32>
    %301 = arith.mulf %298, %300 : vector<8x256xf32>
    %302 = arith.addf %294, %301 : vector<8x256xf32>
    %303 = vector.extract_strided_slice %271 {offsets = [4, 0], sizes = [1, 256], strides = [1, 1]} : vector<9x256xf32> to vector<1x256xf32>
    %304 = vector.broadcast %303 : vector<1x256xf32> to vector<8x256xf32>
    %305 = arith.mulf %268, %304 : vector<8x256xf32>
    %306 = vector.extract_strided_slice %269 {offsets = [0, 4], sizes = [8, 1], strides = [1, 1]} : vector<8x9xf32> to vector<8x1xf32>
    %307 = vector.broadcast %306 : vector<8x1xf32> to vector<8x256xf32>
    %308 = arith.mulf %305, %307 : vector<8x256xf32>
    %309 = arith.addf %302, %308 : vector<8x256xf32>
    %c255_i32_108 = arith.constant 255 : i32
    %310 = tpu.dynamic_rotate %268 by %c255_i32_108 dim 1 : vector<8x256xf32>, i32 -> vector<8x256xf32>
    %311 = vector.extract_strided_slice %271 {offsets = [5, 0], sizes = [1, 256], strides = [1, 1]} : vector<9x256xf32> to vector<1x256xf32>
    %312 = vector.broadcast %311 : vector<1x256xf32> to vector<8x256xf32>
    %313 = arith.mulf %310, %312 : vector<8x256xf32>
    %314 = vector.extract_strided_slice %269 {offsets = [0, 5], sizes = [8, 1], strides = [1, 1]} : vector<8x9xf32> to vector<8x1xf32>
    %315 = vector.broadcast %314 : vector<8x1xf32> to vector<8x256xf32>
    %316 = arith.mulf %313, %315 : vector<8x256xf32>
    %317 = arith.addf %309, %316 : vector<8x256xf32>
    %c241_i32_109 = arith.constant 241 : i32
    %318 = tpu.dynamic_rotate %268 by %c241_i32_109 dim 1 : vector<8x256xf32>, i32 -> vector<8x256xf32>
    %319 = vector.extract_strided_slice %271 {offsets = [6, 0], sizes = [1, 256], strides = [1, 1]} : vector<9x256xf32> to vector<1x256xf32>
    %320 = vector.broadcast %319 : vector<1x256xf32> to vector<8x256xf32>
    %321 = arith.mulf %318, %320 : vector<8x256xf32>
    %322 = vector.extract_strided_slice %269 {offsets = [0, 6], sizes = [8, 1], strides = [1, 1]} : vector<8x9xf32> to vector<8x1xf32>
    %323 = vector.broadcast %322 : vector<8x1xf32> to vector<8x256xf32>
    %324 = arith.mulf %321, %323 : vector<8x256xf32>
    %325 = arith.addf %317, %324 : vector<8x256xf32>
    %c240_i32_110 = arith.constant 240 : i32
    %326 = tpu.dynamic_rotate %268 by %c240_i32_110 dim 1 : vector<8x256xf32>, i32 -> vector<8x256xf32>
    %327 = vector.extract_strided_slice %271 {offsets = [7, 0], sizes = [1, 256], strides = [1, 1]} : vector<9x256xf32> to vector<1x256xf32>
    %328 = vector.broadcast %327 : vector<1x256xf32> to vector<8x256xf32>
    %329 = arith.mulf %326, %328 : vector<8x256xf32>
    %330 = vector.extract_strided_slice %269 {offsets = [0, 7], sizes = [8, 1], strides = [1, 1]} : vector<8x9xf32> to vector<8x1xf32>
    %331 = vector.broadcast %330 : vector<8x1xf32> to vector<8x256xf32>
    %332 = arith.mulf %329, %331 : vector<8x256xf32>
    %333 = arith.addf %325, %332 : vector<8x256xf32>
    %c239_i32_111 = arith.constant 239 : i32
    %334 = tpu.dynamic_rotate %268 by %c239_i32_111 dim 1 : vector<8x256xf32>, i32 -> vector<8x256xf32>
    %335 = vector.extract_strided_slice %271 {offsets = [8, 0], sizes = [1, 256], strides = [1, 1]} : vector<9x256xf32> to vector<1x256xf32>
    %336 = vector.broadcast %335 : vector<1x256xf32> to vector<8x256xf32>
    %337 = arith.mulf %334, %336 : vector<8x256xf32>
    %338 = vector.extract_strided_slice %269 {offsets = [0, 8], sizes = [8, 1], strides = [1, 1]} : vector<8x9xf32> to vector<8x1xf32>
    %339 = vector.broadcast %338 : vector<8x1xf32> to vector<8x256xf32>
    %340 = arith.mulf %337, %339 : vector<8x256xf32>
    %341 = arith.addf %333, %340 : vector<8x256xf32>
    %342 = vector.broadcast %270 : vector<8x1xf32> to vector<8x256xf32>
    %343 = arith.addf %341, %342 : vector<8x256xf32>
    %344 = vector.extract_strided_slice %176 {offsets = [0, 0], sizes = [8, 256], strides = [1, 1]} : vector<16x256xf32> to vector<8x256xf32>
    %345 = arith.addf %268, %344 : vector<8x256xf32>
    %346 = vector.extract_strided_slice %176 {offsets = [8, 0], sizes = [8, 256], strides = [1, 1]} : vector<16x256xf32> to vector<8x256xf32>
    %347 = arith.addf %343, %346 : vector<8x256xf32>
    %348 = tpu.concatenate %345, %347 in 0 : vector<8x256xf32>, vector<8x256xf32> -> vector<16x256xf32>
    %c0_112 = arith.constant 0 : index
    %c0_113 = arith.constant 0 : index
    %349 = vector.load %arg4[%c0_112, %c0_113] : memref<16x256xf32, #tpu.memory_space<vmem>>, vector<16x256xf32>
    tpu.vector_store %arg4[%c0_112, %c0_113], %348 {strides = array<i32>} : memref<16x256xf32, #tpu.memory_space<vmem>>, vector<16x256xf32>,
    return
  }
  func.func @transform_0(%arg0: i32) -> (i32, i32) {
    %c0_i32 = arith.constant 0 : i32
    %c0_i32_0 = arith.constant 0 : i32
    return %c0_i32, %arg0 : i32, i32
  }
  func.func @transform_1(%arg0: i32) -> (i32, i32) {
    %c0_i32 = arith.constant 0 : i32
    %c0_i32_0 = arith.constant 0 : i32
    %c0_i32_1 = arith.constant 0 : i32
    return %c0_i32, %c0_i32_0 : i32, i32
  }
  func.func @transform_2(%arg0: i32) -> (i32, i32) {
    %c0_i32 = arith.constant 0 : i32
    %c0_i32_0 = arith.constant 0 : i32
    %c0_i32_1 = arith.constant 0 : i32
    return %c0_i32, %c0_i32_0 : i32, i32
  }
  func.func @transform_3(%arg0: i32) -> (i32, i32) {
    %c0_i32 = arith.constant 0 : i32
    %c0_i32_0 = arith.constant 0 : i32
    return %c0_i32, %arg0 : i32, i32
  }
}

</mosaic_0001>

<bundles_post_ra>
// kernel: forward.1
= control target key start
LH: loop header
LB: loop body
LE: loop exit
PB: predicated region body
PF: predicated region fallthrough
CT: control target
= control target key end

     0   :  { %s5067_s12 = smov 0   ;;  %s5069_s13 = smov 0   ;;  %s6715_s0 = inlined_call_operand.vmem [shape: f32[32,512], index: 0, kind: input, shape index: {}]   ;;  %s6716_s1 = inlined_call_operand.vmem [shape: f32[34,256], index: 1, kind: input, shape index: {}]   ;;  %s6717_s2 = inlined_call_operand.vmem [shape: f32[480,128], index: 2, kind: input, shape index: {}]   ;;  %s6718_s3 = inlined_call_operand.vmem [shape: f32[16,512], index: 3, kind: output, shape index: {}]  }
   0x1   :  { %s5071_s14 = smov 0  }
   0x2 LB: > { %s4110_s15 = sadd.s32 4294967295, %s5011_s14   ;;  %s5084_s16 = sadd.s32 1, %s5011_s14   ;;  %s5011_s14 = sphi %s5071_s14, %s6824_s14   ;;  %s5007_s13 = sphi %s5069_s13, %s6823_s13   ;;  %s5003_s12 = sphi %s5067_s12, %s6822_s12  }
   0x3   : > { %s17_s17 = ssub.s32 %s5011_s14, %s5084_s16  ;;  %s20_s18 = sadd.s32 1, %s5007_s13 }
   0x4   : > { %p18_p0 = scmp.eq.s32.totalorder %s17_s17, 0  ;;  %p27_p1 = scmp.ne.s32.totalorder %s5007_s13, %s5003_s12 }
   0x5   : > { %p28_p2 = scmp.eq.s32.totalorder %s5011_s14, 0  ;;  %p99_p3 = scmp.eq.s32.totalorder %s4110_s15, 1 }
   0x6   : > { %s5095_s19 = scalar_select %p18_p0, %s5007_s13, %s20_s18  }
   0x7   : > { %p29_p4 = por %p28_p2, %p27_p1  ;;  %p5097_p5 = por %p99_p3, %p27_p1 }
   0x8   : > { %p4113_p6 = scmp.ge.s32.totalorder %s5011_s14, 2 }
   0xa   : > { %127 = sbr.rel (%p4113_p6) target bundleno = 25 (0x19), region = 24 }
  0x11   : > { %130 = sbr.rel (!%p29_p4) target bundleno = 25 (0x19), region = 28  ;;  %s132_s21 = sand.u32 (%p29_p4), 1, %s5007_s13  }
  0x12   : > { %s4204_s22 = sshll.u32 (%p29_p4), %s5011_s14, 4  ;;  %s4114_s23 = sshll.u32 (%p29_p4), %s132_s21, 6 }
  0x13   : > { %s137_s26 = scalar_lea.vmem (%p29_p4), %s6715_s0, %s4204_s22  ;;  %s134_s27 = scalar_lea.vmem (%p29_p4), [#allocation2], %s4114_s23 }
  0x14   : > { %v150_v0 = vld [vmem:[%s137_s26] sm:$0xff] (%p29_p4)  ;;  %v152_v1 = vld [vmem:[%s137_s26 + $0x8] sm:$0xff] (%p29_p4) }
  0x15   : > { %v154_v2 = vld [vmem:[%s137_s26 + $0x20] sm:$0xff] (%p29_p4)  ;;  %151 = vst [vmem:[%s134_s27] sm:$0xff] (%p29_p4), %v150_v0  ;;  %153 = vst [vmem:[%s134_s27 + $0x8] sm:$0xff] (%p29_p4), %v152_v1  ;;  %v156_v3 = vld [vmem:[%s137_s26 + $0x28] sm:$0xff] (%p29_p4) }
  0x16   : > { %155 = vst [vmem:[%s134_s27 + $0x10] sm:$0xff] (%p29_p4), %v154_v2  ;;  %v158_v4 = vld [vmem:[%s137_s26 + $0x40] sm:$0xff] (%p29_p4)  ;;  %v160_v5 = vld [vmem:[%s137_s26 + $0x48] sm:$0xff] (%p29_p4)  ;;  %157 = vst [vmem:[%s134_s27 + $0x18] sm:$0xff] (%p29_p4), %v156_v3 }
  0x17   : > { %159 = vst [vmem:[%s134_s27 + $0x20] sm:$0xff] (%p29_p4), %v158_v4  ;;  %161 = vst [vmem:[%s134_s27 + $0x28] sm:$0xff] (%p29_p4), %v160_v5  ;;  %v162_v6 = vld [vmem:[%s137_s26 + $0x60] sm:$0xff] (%p29_p4)  ;;  %v164_v7 = vld [vmem:[%s137_s26 + $0x68] sm:$0xff] (%p29_p4) }
  0x18   : > { %163 = vst [vmem:[%s134_s27 + $0x30] sm:$0xff] %v162_v6  ;;  %165 = vst [vmem:[%s134_s27 + $0x38] sm:$0xff] %v164_v7 }
  0x19 PF: > { %p4117_p7 = scmp.ge.s32.totalorder %s5011_s14, 1  ;;  %p170_p8 = scmp.lt.s32.totalorder %s5011_s14, 3 }
  0x1b   : > { %p171_p9 = pnand %p4117_p7, %p170_p8 }
  0x1d   : > { %174 = sbr.rel (%p171_p9) target bundleno = 1064 (0x428), region = 51 }
  0x24   : > { %s177_s28 = sand.u32 1, %s5003_s12   ;;  %v6721_v8 = vmov 0   ;;  %s5014_s4 = smov 33   ;;  %v6719_v21 = vmov 0.0   ;;  %v5200_v22 = vld [vmem:[%s6717_s2 + $0x10] sm:$0xff]  ;;  %v3475_v23 = vld [vmem:[%s6717_s2 + $0x8] sm:$0xff]  ;;  %v6731_v28 = vlaneseq }
  0x25   : > { %s4118_s29 = sshll.u32 %s177_s28, 6  ;;  %4717 = vset.pattern.permute.xlu1 %v6721_v8  ;;  %4716 = vset.pattern.permute.xlu0 %v6721_v8  ;;  %s5015_s5 = smov 31   ;;  %v6730_v24 = vmov 1   ;;  %v6728_v25 = vmov 2   ;;  %v6727_v26 = vmov 3   ;;  %v6725_v27 = vmov 6  }
  0x26   : > { %s5114_s30 = scalar_lea.vmem [#allocation2], %s4118_s29  ;;  %438 = vmatprep.mubr.f32.mxu1 %v6719_v21  ;;  %311 = vmatprep.mubr.f32.mxu0 %v6719_v21  ;;  %s5017_s6 = smov 18   ;;  %v6729_v29 = vmov 4   ;;  %v5220_v31 = vand.u32 127, %v6731_v28  ;;  %v6726_v33 = vmov 5   ;;  %v6723_v62 = vmov 7  }
  0x27   : > { %v205_v9 = vld [vmem:[%s5114_s30 + $0x20] sm:$0xff]  ;;  %v207_v10 = vld [vmem:[%s5114_s30 + $0x30] sm:$0xff]  ;;  %v206_v14 = vld [vmem:[%s5114_s30 + $0x28] sm:$0xff]  ;;  %s5018_s7 = smov 16   ;;  %s5019_s8 = smov 14   ;;  %vm240_vm2 = vcmask 261120  }
  0x28   : > { %v201_v11 = vld [vmem:[%s5114_s30] sm:$0xff]  ;;  %v5119_v12 = vpack.i.bf16 %v207_v10, %v205_v9  ;;  %v203_v13 = vld [vmem:[%s5114_s30 + $0x10] sm:$0xff]  ;;  %v208_v15 = vld [vmem:[%s5114_s30 + $0x38] sm:$0xff]  ;;  %s5020_s9 = smov 1   ;;  %s5021_s10 = smov 127   ;;  %vm357_vm0 = vcmp.lt.s32.totalorder %v5220_v31, 33 }
  0x29   : > { %v5124_v16 = vpack.i.bf16 %v203_v13, %v201_v11  ;;  %v202_v17 = vld [vmem:[%s5114_s30 + $0x8] sm:$0xff]  ;;  %v204_v18 = vld [vmem:[%s5114_s30 + $0x18] sm:$0xff]  ;;  %v5129_v19 = vpack.i.bf16 %v208_v15, %v206_v14  ;;  %s5022_s11 = smov 114   ;;  %s5023_s17 = smov 112   ;;  %vm619_vm1 = vcmp.lt.s32.totalorder %v5220_v31, 31  ;;  %vm881_vm3 = vcmp.lt.s32.totalorder %v5220_v31, 18 }
  0x2a   : > { %4487 = vrot.lane.b32.xlu1 %v5119_v12, %s5014_s4  ;;  %v5132_v20 = vpack.i.bf16 %v204_v18, %v202_v17  ;;  %s5024_s18 = smov 110   ;;  %s5025_s21 = smov 97   ;;  %v366_v13 = vld [vmem:[%s6717_s2 + $0x50] sm:$0xff]  ;;  %vm1143_vm4 = vcmp.lt.s32.totalorder %v5220_v31, 16  ;;  %vm1405_vm5 = vcmp.lt.s32.totalorder %v5220_v31, 14  ;;  %vm1667_vm6 = vcmp.lt.s32.totalorder %v5220_v31, 1 }
  0x2b   : > { %4477 = vrot.lane.b32.xlu0 %v5124_v16, %s5014_s4  ;;  %s5026_s22 = smov 95   ;;  %s5029_s27 = smov 34   ;;  %vm1904_vm7 = vcmp.lt.s32.totalorder %v5220_v31, 127  ;;  %vm2166_vm8 = vcmp.lt.s32.totalorder %v5220_v31, 114  ;;  %vm2428_vm9 = vcmp.lt.s32.totalorder %v5220_v31, 112  ;;  %vm2690_vm10 = vcmp.lt.s32.totalorder %v5220_v31, 110 }
  0x2c   : > { %s5034_s29 = smov 32   ;;  %vm2952_vm11 = vcmp.lt.s32.totalorder %v5220_v31, 97  ;;  %vm3214_vm12 = vcmp.lt.s32.totalorder %v5220_v31, 95  ;;  %vm229_vm13 = vcmp.lt.s32.totalorder %v5220_v31, 34  ;;  %vm488_vm14 = vcmp.lt.s32.totalorder %v5220_v31, 32  ;;  %s5040_s24 = smov 30  }
  0x2d   : > { %s5041_s25 = smov 111   ;;  %s5045_s23 = smov 96   ;;  %vm1012_vm15 = vcmp.lt.s32.totalorder %v5220_v31, 17 }
  0x2e   : > { %4492 = vrot.lane.b32.xlu1 %v5129_v19, %s5014_s4 }
  0x2f   : > { %4482 = vrot.lane.b32.xlu0 %v5132_v20, %s5014_s4 }
  0x32   : > { %4502 = vrot.lane.b32.xlu1 %v5132_v20, %s5015_s5 }
  0x33   : > { %4497 = vrot.lane.b32.xlu0 %v5124_v16, %s5015_s5 }
  0x36   : > { %4512 = vrot.lane.b32.xlu1 %v5129_v19, %s5015_s5 }
  0x37   : > { %4507 = vrot.lane.b32.xlu0 %v5119_v12, %s5015_s5 }
  0x3a   : > { %4522 = vrot.lane.b32.xlu1 %v5132_v20, %s5017_s6 }
  0x3b   : > { %4517 = vrot.lane.b32.xlu0 %v5124_v16, %s5017_s6 }
  0x3e   : > { %4532 = vrot.lane.b32.xlu1 %v5129_v19, %s5017_s6 }
  0x3f   : > { %4527 = vrot.lane.b32.xlu0 %v5119_v12, %s5017_s6  ;;  %s4205_s6 = sshll.u32 (%p5097_p5), %s4110_s15, 4 }
  0x42   : > { %4542 = vrot.lane.b32.xlu1 %v5132_v20, %s5018_s7 }
  0x43   : > { %4537 = vrot.lane.b32.xlu0 %v5124_v16, %s5018_s7 }
  0x46   : > { %4552 = vrot.lane.b32.xlu1 %v5129_v19, %s5018_s7 }
  0x47   : > { %4547 = vrot.lane.b32.xlu0 %v5119_v12, %s5018_s7 }
  0x4a   : > { %4562 = vrot.lane.b32.xlu1 %v5132_v20, %s5019_s8 }
  0x4b   : > { %4557 = vrot.lane.b32.xlu0 %v5124_v16, %s5019_s8 }
  0x4e   : > { %4572 = vrot.lane.b32.xlu1 %v5129_v19, %s5019_s8 }
  0x4f   : > { %4567 = vrot.lane.b32.xlu0 %v5119_v12, %s5019_s8  ;;  %s5037_s8 = smov 15  }
  0x52   : > { %4582 = vrot.lane.b32.xlu1 %v5132_v20, %s5020_s9 }
  0x53   : > { %4577 = vrot.lane.b32.xlu0 %v5124_v16, %s5020_s9 }
  0x56   : > { %4592 = vrot.lane.b32.xlu1 %v5129_v19, %s5020_s9 }
  0x57   : > { %4587 = vrot.lane.b32.xlu0 %v5119_v12, %s5020_s9 }
  0x5a   : > { %4602 = vrot.lane.b32.xlu1 %v5132_v20, %s5021_s10 }
  0x5b   : > { %4597 = vrot.lane.b32.xlu0 %v5124_v16, %s5021_s10 }
  0x5e   : > { %4612 = vrot.lane.b32.xlu1 %v5129_v19, %s5021_s10 }
  0x5f   : > { %4607 = vrot.lane.b32.xlu0 %v5119_v12, %s5021_s10 }
  0x62   : > { %4622 = vrot.lane.b32.xlu1 %v5132_v20, %s5022_s11 }
  0x63   : > { %4617 = vrot.lane.b32.xlu0 %v5124_v16, %s5022_s11 }
  0x66   : > { %4632 = vrot.lane.b32.xlu1 %v5129_v19, %s5022_s11 }
  0x67   : > { %4627 = vrot.lane.b32.xlu0 %v5119_v12, %s5022_s11  ;;  %s5038_s11 = smov 17  }
  0x6a   : > { %4642 = vrot.lane.b32.xlu1 %v5132_v20, %s5023_s17 }
  0x6b   : > { %4637 = vrot.lane.b32.xlu0 %v5124_v16, %s5023_s17 }
  0x6e   : > { %4652 = vrot.lane.b32.xlu1 %v5129_v19, %s5023_s17 }
  0x6f   : > { %4647 = vrot.lane.b32.xlu0 %v5119_v12, %s5023_s17 }
  0x72   : > { %4662 = vrot.lane.b32.xlu1 %v5132_v20, %s5024_s18 }
  0x73   : > { %4657 = vrot.lane.b32.xlu0 %v5124_v16, %s5024_s18 }
  0x76   : > { %4672 = vrot.lane.b32.xlu1 %v5129_v19, %s5024_s18 }
  0x77   : > { %4667 = vrot.lane.b32.xlu0 %v5119_v12, %s5024_s18  ;;  %s5042_s18 = smov 2  }
  0x7a   : > { %4682 = vrot.lane.b32.xlu1 %v5132_v20, %s5025_s21 }
  0x7b   : > { %4677 = vrot.lane.b32.xlu0 %v5124_v16, %s5025_s21 }
  0x7e   : > { %4692 = vrot.lane.b32.xlu1 %v5129_v19, %s5025_s21 }
  0x7f   : > { %4687 = vrot.lane.b32.xlu0 %v5119_v12, %s5025_s21  ;;  %s5043_s21 = smov 126  }
  0x82   : > { %4702 = vrot.lane.b32.xlu1 %v5132_v20, %s5026_s22 }
  0x83   : > { %4697 = vrot.lane.b32.xlu0 %v5124_v16, %s5026_s22 }
  0x86   : > { %4712 = vrot.lane.b32.xlu1 %v5129_v19, %s5026_s22 }
  0x87   : > { %4707 = vrot.lane.b32.xlu0 %v5119_v12, %s5026_s22  ;;  %s5039_s22 = smov 113  }
  0x8a   : > { %3583 = vperm.xlu1 %4717, %v5200_v22  }
  0x8b   : > { %3478 = vperm.xlu0 %4716, %v3475_v23  }
  0x8e   : > { %4718 = vset.pattern.permute.xlu1 %v6730_v24 }
  0x8f   : > { %3605 = vperm.xlu1 %4718, %v5200_v22   ;;  %4719 = vset.pattern.permute.xlu0 %v6728_v25 }
  0x90   : > { %3629 = vperm.xlu0 %4719, %v5200_v22  }
  0x93   : > { %4721 = vrot.lane.b32.xlu1 %v5124_v16, %s5029_s27 }
  0x94   : > { %4730 = vset.pattern.permute.xlu0 %v6727_v26  ;;  %4743 = vset.pattern.permute.xlu1 %v6725_v27 }
  0x95   : > { %3653 = vperm.xlu0 %4730, %v5200_v22  }
  0x97   : > { %4726 = vrot.lane.b32.xlu1 %v5132_v20, %s5029_s27 }
  0x99   : > { %4731 = vset.pattern.permute.xlu0 %v6729_v29 }
  0x9a   : > { %3671 = vperm.xlu0 %4731, %v5200_v22  }
  0x9b   : > { %4733 = vrot.lane.b32.xlu1 %v5119_v12, %s5029_s27 }
  0x9c   : > { %v4488_v30 = vpop.permute.xlu1 %4487 }
  0x9d   : > { %v4478_v32 = vpop.permute.xlu0 %4477  ;;  %v4490_v34 = vunpack.i.h.bf16 %v4488_v30  ;;  %v4489_v35 = vunpack.i.l.bf16 %v4488_v30 }
  0x9e   : > { %4742 = vset.pattern.permute.xlu0 %v6726_v33  ;;  %v4480_v40 = vunpack.i.h.bf16 %v4478_v32  ;;  %v4479_v41 = vunpack.i.l.bf16 %v4478_v32 }
  0x9f   : > { %4738 = vrot.lane.b32.xlu1 %v5129_v19, %s5029_s27  ;;  %3695 = vperm.xlu0 %4742, %v5200_v22  }
  0xa0   : > { %v4493_v36 = vpop.permute.xlu1 %4492 }
  0xa1   : > { %v4495_v37 = vunpack.i.h.bf16 %v4493_v36  ;;  %v4494_v38 = vunpack.i.l.bf16 %v4493_v36  ;;  %v4483_v39 = vpop.permute.xlu0 %4482  ;;  %v367_v36 = vld [vmem:[%s6717_s2 + $0x58] sm:$0xff] }
  0xa2   : > { %v4485_v42 = vunpack.i.h.bf16 %v4483_v39  ;;  %v4484_v43 = vunpack.i.l.bf16 %v4483_v39 }
  0xa3   : > { %3719 = vperm.xlu1 %4743, %v5200_v22   ;;  %v360_v44 = vsel %vm357_vm0, %v4489_v35, %v4494_v38  ;;  %v361_v45 = vsel %vm357_vm0, %v4490_v34, %v4495_v37  ;;  %4750 = vrot.lane.b32.xlu0 %v5132_v20, %s5034_s29  ;;  %v364_v59 = vsel %vm357_vm0, %v4494_v38, %v4489_v35 }
  0xa4   : > { %v358_v46 = vsel %vm357_vm0, %v4479_v41, %v4484_v43  ;;  %v359_v47 = vsel %vm357_vm0, %v4480_v40, %v4485_v42  ;;  %v362_v48 = vsel %vm357_vm0, %v4484_v43, %v4479_v41  ;;  %v363_v49 = vsel %vm357_vm0, %v4485_v42, %v4480_v40  ;;  %v4503_v50 = vpop.permute.xlu1 %4502 }
  0xa5   : > { %v4214_v51 = vpack.c.bf16 %v359_v47, %v358_v46  ;;  %v4216_v52 = vpack.c.bf16 %v363_v49, %v362_v48  ;;  %v4505_v53 = vunpack.i.h.bf16 %v4503_v50  ;;  %v4504_v54 = vunpack.i.l.bf16 %v4503_v50  ;;  %v4498_v55 = vpop.permute.xlu0 %4497  ;;  %v628_v48 = vld [vmem:[%s6717_s2 + $0x70] sm:$0xff] }
  0xa6   : > { %v4500_v56 = vunpack.i.h.bf16 %v4498_v55  ;;  %v4499_v57 = vunpack.i.l.bf16 %v4498_v55  ;;  %v4218_v58 = vpack.c.bf16 %v361_v45, %v360_v44  ;;  %v365_v60 = vsel %vm357_vm0, %v4495_v37, %v4490_v34 }
  0xa7   : > { %4215 = vmatprep.subr.bf16.mxu1 %v4214_v51  ;;  %4745 = vrot.lane.b32.xlu1 %v5124_v16, %s5034_s29  ;;  %v4220_v6 = vpack.c.bf16 %v365_v60, %v364_v59  ;;  %v629_v60 = vld [vmem:[%s6717_s2 + $0x78] sm:$0xff]  ;;  %vm1274_vm0 = vcmp.lt.s32.totalorder %v5220_v31, 15 }
  0xa8   : > { %4217 = vmatpush1.bf16.msra.mxu1 %v4216_v52  ;;  %v625_v61 = vsel %vm619_vm1, %v4505_v53, %v4500_v56  ;;  %4754 = vset.pattern.permute.xlu1 %v6723_v62  ;;  %v4513_v63 = vpop.permute.xlu1 %4512  ;;  %v620_v0 = vsel %vm619_vm1, %v4499_v57, %v4504_v54  ;;  %v624_v1 = vsel %vm619_vm1, %v4504_v54, %v4499_v57 }
  0xa9   : > { %4219 = vmatprep.subr.bf16.mxu1 %v4218_v58  ;;  %v4515_v2 = vunpack.i.h.bf16 %v4513_v63  ;;  %v4514_v3 = vunpack.i.l.bf16 %v4513_v63  ;;  %v4508_v4 = vpop.permute.xlu0 %4507  ;;  %v621_v5 = vsel %vm619_vm1, %v4500_v56, %v4505_v53  ;;  %v4232_v14 = vpack.c.bf16 %v625_v61, %v624_v1 }
  0xaa   : > { %v4510_v7 = vunpack.i.h.bf16 %v4508_v4  ;;  %v4509_v9 = vunpack.i.l.bf16 %v4508_v4  ;;  %v4230_v10 = vpack.c.bf16 %v621_v5, %v620_v0 }
  0xab   : > { %3743 = vperm.xlu1 %4754, %v5200_v22  }
  0xac   : > { %4221 = vmatpush1.bf16.msra.mxu1 %v4220_v6  ;;  %v627_v11 = vsel %vm619_vm1, %v4515_v2, %v4510_v7  ;;  %v4523_v15 = vpop.permute.xlu1 %4522  ;;  %v622_v16 = vsel %vm619_vm1, %v4509_v9, %v4514_v3  ;;  %v623_v17 = vsel %vm619_vm1, %v4510_v7, %v4515_v2  ;;  %v626_v18 = vsel %vm619_vm1, %v4514_v3, %v4509_v9 }
  0xad   : > { %4231 = vmatprep.subr.bf16.mxu1 %v4230_v10  ;;  %v4525_v20 = vunpack.i.h.bf16 %v4523_v15  ;;  %v4524_v22 = vunpack.i.l.bf16 %v4523_v15  ;;  %v4518_v23 = vpop.permute.xlu0 %4517  ;;  %v4234_v30 = vpack.c.bf16 %v623_v17, %v622_v16  ;;  %v4236_v37 = vpack.c.bf16 %v627_v11, %v626_v18  ;;  %v890_v11 = vld [vmem:[%s6717_s2 + $0x90] sm:$0xff] }
  0xae   : > { %v4520_v32 = vunpack.i.h.bf16 %v4518_v23  ;;  %v4519_v34 = vunpack.i.l.bf16 %v4518_v23  ;;  %vm2297_vm1 = vcmp.lt.s32.totalorder %v5220_v31, 113 }
  0xaf   : > { %4123 = vmatmul.mubr.msk.f32.vlgmr.msra.gmra.mrb[0].mxu1 %vm240_vm2, %v366_v13  ;;  %4757 = vrot.lane.b32.xlu1 %v5119_v12, %s5034_s29 }
  0xb0   : > { %4233 = vmatpush1.bf16.msra.mxu1 %v4232_v14  ;;  %v887_v35 = vsel %vm881_vm3, %v4525_v20, %v4520_v32  ;;  %444 = vmatprep.mubr.f32.mxu1 %v6719_v21  ;;  %v4533_v38 = vpop.permute.xlu1 %4532  ;;  %v882_v39 = vsel %vm881_vm3, %v4519_v34, %v4524_v22  ;;  %v886_v40 = vsel %vm881_vm3, %v4524_v22, %v4519_v34 }
  0xb1   : > { %4235 = vmatprep.subr.bf16.mxu1 %v4234_v30  ;;  %v4535_v12 = vunpack.i.h.bf16 %v4533_v38  ;;  %v4534_v41 = vunpack.i.l.bf16 %v4533_v38  ;;  %v4528_v42 = vpop.permute.xlu0 %4527  ;;  %v883_v43 = vsel %vm881_vm3, %v4520_v32, %v4525_v20  ;;  %4967 = vset.pattern.permute.xlu1 %v6721_v8  ;;  %v4248_v49 = vpack.c.bf16 %v887_v35, %v886_v40  ;;  %v891_v35 = vld [vmem:[%s6717_s2 + $0x98] sm:$0xff] }
  0xb2   : > { %v4530_v44 = vunpack.i.h.bf16 %v4528_v42  ;;  %v4529_v45 = vunpack.i.l.bf16 %v4528_v42  ;;  %v4246_v46 = vpack.c.bf16 %v883_v43, %v882_v39 }
  0xb3   : > { %4124 = vmatmul.mubr.msk.f32.gmra.mrb[2].mxu1 %vm240_vm2, %v367_v36  ;;  %4762 = vrot.lane.b32.xlu1 %v5129_v19, %s5034_s29 }
  0xb4   : > { %4237 = vmatpush1.bf16.msra.mxu1 %v4236_v37  ;;  %v889_v47 = vsel %vm881_vm3, %v4535_v12, %v4530_v44  ;;  %700 = vmatprep.mubr.f32.mxu1 %v6719_v21  ;;  %v4543_v50 = vpop.permute.xlu1 %4542  ;;  %v884_v51 = vsel %vm881_vm3, %v4529_v45, %v4534_v41  ;;  %v888_v19 = vsel %vm881_vm3, %v4534_v41, %v4529_v45 }
  0xb5   : > { %4247 = vmatprep.subr.bf16.mxu1 %v4246_v46  ;;  %v4545_v52 = vunpack.i.h.bf16 %v4543_v50  ;;  %v4544_v53 = vunpack.i.l.bf16 %v4543_v50  ;;  %v4538_v54 = vpop.permute.xlu0 %4537  ;;  %v885_v55 = vsel %vm881_vm3, %v4530_v44, %v4535_v12  ;;  %v4252_v61 = vpack.c.bf16 %v889_v47, %v888_v19  ;;  %v1152_v47 = vld [vmem:[%s6717_s2 + $0xb0] sm:$0xff] }
  0xb6   : > { %v4540_v56 = vunpack.i.h.bf16 %v4538_v54  ;;  %v4539_v57 = vunpack.i.l.bf16 %v4538_v54  ;;  %v4250_v58 = vpack.c.bf16 %v885_v55, %v884_v51  ;;  %vm2559_vm3 = vcmp.lt.s32.totalorder %v5220_v31, 111 }
  0xb7   : > { %4129 = vmatmul.mubr.msk.f32.vlgmr.msra.gmra.mrb[4].mxu1 %vm240_vm2, %v628_v48 }
  0xb8   : > { %4249 = vmatpush1.bf16.msra.mxu1 %v4248_v49  ;;  %v1149_v59 = vsel %vm1143_vm4, %v4545_v52, %v4540_v56  ;;  %706 = vmatprep.mubr.f32.mxu1 %v6719_v21  ;;  %v4553_v63 = vpop.permute.xlu1 %4552  ;;  %v1144_v0 = vsel %vm1143_vm4, %v4539_v57, %v4544_v53  ;;  %v1148_v1 = vsel %vm1143_vm4, %v4544_v53, %v4539_v57 }
  0xb9   : > { %4251 = vmatprep.subr.bf16.mxu1 %v4250_v58  ;;  %v4555_v2 = vunpack.i.h.bf16 %v4553_v63  ;;  %v4554_v3 = vunpack.i.l.bf16 %v4553_v63  ;;  %v4548_v4 = vpop.permute.xlu0 %4547  ;;  %v1145_v5 = vsel %vm1143_vm4, %v4540_v56, %v4545_v52  ;;  %v4264_v13 = vpack.c.bf16 %v1149_v59, %v1148_v1  ;;  %v1153_v59 = vld [vmem:[%s6717_s2 + $0xb8] sm:$0xff] }
  0xba   : > { %v4550_v6 = vunpack.i.h.bf16 %v4548_v4  ;;  %v4549_v7 = vunpack.i.l.bf16 %v4548_v4  ;;  %v4262_v9 = vpack.c.bf16 %v1145_v5, %v1144_v0 }
  0xbb   : > { %4130 = vmatmul.mubr.msk.f32.gmra.mrb[6].mxu1 %vm240_vm2, %v629_v60 }
  0xbc   : > { %4253 = vmatpush1.bf16.msra.mxu1 %v4252_v61  ;;  %v1151_v10 = vsel %vm1143_vm4, %v4555_v2, %v4550_v6  ;;  %962 = vmatprep.mubr.f32.mxu1 %v6719_v21  ;;  %v4563_v14 = vpop.permute.xlu1 %4562  ;;  %v1146_v15 = vsel %vm1143_vm4, %v4549_v7, %v4554_v3  ;;  %v1150_v16 = vsel %vm1143_vm4, %v4554_v3, %v4549_v7 }
  0xbd   : > { %4263 = vmatprep.subr.bf16.mxu1 %v4262_v9  ;;  %v4565_v17 = vunpack.i.h.bf16 %v4563_v14  ;;  %v4564_v18 = vunpack.i.l.bf16 %v4563_v14  ;;  %v4558_v20 = vpop.permute.xlu0 %4557  ;;  %v1147_v22 = vsel %vm1143_vm4, %v4550_v6, %v4555_v2  ;;  %v4268_v36 = vpack.c.bf16 %v1151_v10, %v1150_v16  ;;  %v1414_v10 = vld [vmem:[%s6717_s2 + $0xd0] sm:$0xff] }
  0xbe   : > { %v4560_v23 = vunpack.i.h.bf16 %v4558_v20  ;;  %v4559_v30 = vunpack.i.l.bf16 %v4558_v20  ;;  %v4266_v32 = vpack.c.bf16 %v1147_v22, %v1146_v15 }
  0xbf   : > { %4135 = vmatmul.mubr.msk.f32.vlgmr.msra.gmra.mrb[8].mxu1 %vm240_vm2, %v890_v11 }
  0xc0   : > { %4265 = vmatpush1.bf16.msra.mxu1 %v4264_v13  ;;  %v1411_v34 = vsel %vm1405_vm5, %v4565_v17, %v4560_v23  ;;  %968 = vmatprep.mubr.f32.mxu1 %v6719_v21  ;;  %v4573_v37 = vpop.permute.xlu1 %4572  ;;  %v1406_v38 = vsel %vm1405_vm5, %v4559_v30, %v4564_v18  ;;  %v1410_v39 = vsel %vm1405_vm5, %v4564_v18, %v4559_v30 }
  0xc1   : > { %4267 = vmatprep.subr.bf16.mxu1 %v4266_v32  ;;  %v4575_v40 = vunpack.i.h.bf16 %v4573_v37  ;;  %v4574_v12 = vunpack.i.l.bf16 %v4573_v37  ;;  %v4568_v41 = vpop.permute.xlu0 %4567  ;;  %v1407_v42 = vsel %vm1405_vm5, %v4560_v23, %v4565_v17  ;;  %v4280_v48 = vpack.c.bf16 %v1411_v34, %v1410_v39  ;;  %v1415_v34 = vld [vmem:[%s6717_s2 + $0xd8] sm:$0xff] }
  0xc2   : > { %v4570_v43 = vunpack.i.h.bf16 %v4568_v41  ;;  %v4569_v44 = vunpack.i.l.bf16 %v4568_v41  ;;  %v4278_v45 = vpack.c.bf16 %v1407_v42, %v1406_v38 }
  0xc3   : > { %4136 = vmatmul.mubr.msk.f32.gmra.mrb[10].mxu1 %vm240_vm2, %v891_v35 }
  0xc4   : > { %4269 = vmatpush1.bf16.msra.mxu1 %v4268_v36  ;;  %v1413_v46 = vsel %vm1405_vm5, %v4575_v40, %v4570_v43  ;;  %1224 = vmatprep.mubr.f32.mxu1 %v6719_v21  ;;  %v4583_v49 = vpop.permute.xlu1 %4582  ;;  %v1408_v50 = vsel %vm1405_vm5, %v4569_v44, %v4574_v12  ;;  %v1412_v51 = vsel %vm1405_vm5, %v4574_v12, %v4569_v44 }
  0xc5   : > { %4279 = vmatprep.subr.bf16.mxu1 %v4278_v45  ;;  %v4585_v19 = vunpack.i.h.bf16 %v4583_v49  ;;  %v4584_v52 = vunpack.i.l.bf16 %v4583_v49  ;;  %v4578_v53 = vpop.permute.xlu0 %4577  ;;  %v1409_v54 = vsel %vm1405_vm5, %v4570_v43, %v4575_v40  ;;  %v4284_v60 = vpack.c.bf16 %v1413_v46, %v1412_v51  ;;  %v1676_v46 = vld [vmem:[%s6717_s2 + $0xf0] sm:$0xff] }
  0xc6   : > { %v4580_v55 = vunpack.i.h.bf16 %v4578_v53  ;;  %v4579_v56 = vunpack.i.l.bf16 %v4578_v53  ;;  %v4282_v57 = vpack.c.bf16 %v1409_v54, %v1408_v50  ;;  %vm750_vm5 = vcmp.lt.s32.totalorder %v5220_v31, 30 }
  0xc7   : > { %4141 = vmatmul.mubr.msk.f32.vlgmr.msra.gmra.mrb[12].mxu1 %vm240_vm2, %v1152_v47 }
  0xc8   : > { %4281 = vmatpush1.bf16.msra.mxu1 %v4280_v48  ;;  %v1673_v58 = vsel %vm1667_vm6, %v4585_v19, %v4580_v55  ;;  %1230 = vmatprep.mubr.f32.mxu1 %v6719_v21  ;;  %v4593_v61 = vpop.permute.xlu1 %4592  ;;  %v1668_v63 = vsel %vm1667_vm6, %v4579_v56, %v4584_v52  ;;  %v1672_v0 = vsel %vm1667_vm6, %v4584_v52, %v4579_v56 }
  0xc9   : > { %4283 = vmatprep.subr.bf16.mxu1 %v4282_v57  ;;  %v4595_v1 = vunpack.i.h.bf16 %v4593_v61  ;;  %v4594_v2 = vunpack.i.l.bf16 %v4593_v61  ;;  %v4588_v3 = vpop.permute.xlu0 %4587  ;;  %v1669_v4 = vsel %vm1667_vm6, %v4580_v55, %v4585_v19  ;;  %v4296_v11 = vpack.c.bf16 %v1673_v58, %v1672_v0  ;;  %v1677_v58 = vld [vmem:[%s6717_s2 + $0xf8] sm:$0xff] }
  0xca   : > { %v4590_v5 = vunpack.i.h.bf16 %v4588_v3  ;;  %v4589_v6 = vunpack.i.l.bf16 %v4588_v3  ;;  %v4294_v7 = vpack.c.bf16 %v1669_v4, %v1668_v63 }
  0xcb   : > { %4142 = vmatmul.mubr.msk.f32.gmra.mrb[14].mxu1 %vm240_vm2, %v1153_v59 }
  0xcc   : > { %4285 = vmatpush1.bf16.msra.mxu1 %v4284_v60  ;;  %v1675_v9 = vsel %vm1667_vm6, %v4595_v1, %v4590_v5  ;;  %1486 = vmatprep.mubr.f32.mxu1 %v6719_v21  ;;  %v4603_v13 = vpop.permute.xlu1 %4602  ;;  %v1670_v14 = vsel %vm1667_vm6, %v4589_v6, %v4594_v2  ;;  %v1674_v15 = vsel %vm1667_vm6, %v4594_v2, %v4589_v6 }
  0xcd   : > { %4295 = vmatprep.subr.bf16.mxu1 %v4294_v7  ;;  %v4605_v16 = vunpack.i.h.bf16 %v4603_v13  ;;  %v4604_v17 = vunpack.i.l.bf16 %v4603_v13  ;;  %v4598_v18 = vpop.permute.xlu0 %4597  ;;  %v1671_v20 = vsel %vm1667_vm6, %v4590_v5, %v4595_v1  ;;  %v4300_v35 = vpack.c.bf16 %v1675_v9, %v1674_v15  ;;  %v1913_v9 = vld [vmem:[%s6717_s2 + $0x110] sm:$0xff] }
  0xce   : > { %v4600_v22 = vunpack.i.h.bf16 %v4598_v18  ;;  %v4599_v23 = vunpack.i.l.bf16 %v4598_v18  ;;  %v4298_v30 = vpack.c.bf16 %v1671_v20, %v1670_v14 }
  0xcf   : > { %4147 = vmatmul.mubr.msk.f32.vlgmr.msra.gmra.mrb[16].mxu1 %vm240_vm2, %v1414_v10 }
  0xd0   : > { %4297 = vmatpush1.bf16.msra.mxu1 %v4296_v11  ;;  %v1906_v32 = vsel %vm1904_vm7, %v4600_v22, %v4605_v16  ;;  %1492 = vmatprep.mubr.f32.mxu1 %v6719_v21  ;;  %v4613_v36 = vpop.permute.xlu1 %4612  ;;  %v1909_v37 = vsel %vm1904_vm7, %v4604_v17, %v4599_v23  ;;  %v1905_v38 = vsel %vm1904_vm7, %v4599_v23, %v4604_v17 }
  0xd1   : > { %4299 = vmatprep.subr.bf16.mxu1 %v4298_v30  ;;  %v4615_v39 = vunpack.i.h.bf16 %v4613_v36  ;;  %v4614_v40 = vunpack.i.l.bf16 %v4613_v36  ;;  %v4608_v12 = vpop.permute.xlu0 %4607  ;;  %v1910_v41 = vsel %vm1904_vm7, %v4605_v16, %v4600_v22  ;;  %v4312_v47 = vpack.c.bf16 %v1906_v32, %v1905_v38  ;;  %v1914_v32 = vld [vmem:[%s6717_s2 + $0x118] sm:$0xff] }
  0xd2   : > { %v4610_v42 = vunpack.i.h.bf16 %v4608_v12  ;;  %v4609_v43 = vunpack.i.l.bf16 %v4608_v12  ;;  %v4310_v44 = vpack.c.bf16 %v1910_v41, %v1909_v37 }
  0xd3   : > { %4148 = vmatmul.mubr.msk.f32.gmra.mrb[18].mxu1 %vm240_vm2, %v1415_v34 }
  0xd4   : > { %4301 = vmatpush1.bf16.msra.mxu1 %v4300_v35  ;;  %v1908_v45 = vsel %vm1904_vm7, %v4610_v42, %v4615_v39  ;;  %1748 = vmatprep.mubr.f32.mxu1 %v6719_v21  ;;  %v4623_v48 = vpop.permute.xlu1 %4622  ;;  %v1911_v49 = vsel %vm1904_vm7, %v4614_v40, %v4609_v43  ;;  %v1907_v50 = vsel %vm1904_vm7, %v4609_v43, %v4614_v40 }
  0xd5   : > { %4311 = vmatprep.subr.bf16.mxu1 %v4310_v44  ;;  %v4625_v51 = vunpack.i.h.bf16 %v4623_v48  ;;  %v4624_v19 = vunpack.i.l.bf16 %v4623_v48  ;;  %v4618_v52 = vpop.permute.xlu0 %4617  ;;  %v1912_v53 = vsel %vm1904_vm7, %v4615_v39, %v4610_v42  ;;  %v4316_v59 = vpack.c.bf16 %v1908_v45, %v1907_v50  ;;  %v2175_v45 = vld [vmem:[%s6717_s2 + $0x130] sm:$0xff] }
  0xd6   : > { %v4620_v54 = vunpack.i.h.bf16 %v4618_v52  ;;  %v4619_v55 = vunpack.i.l.bf16 %v4618_v52  ;;  %v4314_v56 = vpack.c.bf16 %v1912_v53, %v1911_v49 }
  0xd7   : > { %4153 = vmatmul.mubr.msk.f32.vlgmr.msra.gmra.mrb[20].mxu1 %vm240_vm2, %v1676_v46 }
  0xd8   : > { %4313 = vmatpush1.bf16.msra.mxu1 %v4312_v47  ;;  %v2168_v57 = vsel %vm2166_vm8, %v4620_v54, %v4625_v51  ;;  %1754 = vmatprep.mubr.f32.mxu1 %v6719_v21  ;;  %v4633_v60 = vpop.permute.xlu1 %4632  ;;  %v2171_v61 = vsel %vm2166_vm8, %v4624_v19, %v4619_v55  ;;  %v2167_v63 = vsel %vm2166_vm8, %v4619_v55, %v4624_v19 }
  0xd9   : > { %4315 = vmatprep.subr.bf16.mxu1 %v4314_v56  ;;  %v4635_v0 = vunpack.i.h.bf16 %v4633_v60  ;;  %v4634_v1 = vunpack.i.l.bf16 %v4633_v60  ;;  %v4628_v2 = vpop.permute.xlu0 %4627  ;;  %v2172_v3 = vsel %vm2166_vm8, %v4625_v51, %v4620_v54  ;;  %v4328_v10 = vpack.c.bf16 %v2168_v57, %v2167_v63  ;;  %v2176_v57 = vld [vmem:[%s6717_s2 + $0x138] sm:$0xff] }
  0xda   : > { %v4630_v4 = vunpack.i.h.bf16 %v4628_v2  ;;  %v4629_v5 = vunpack.i.l.bf16 %v4628_v2  ;;  %v4326_v6 = vpack.c.bf16 %v2172_v3, %v2171_v61 }
  0xdb   : > { %4154 = vmatmul.mubr.msk.f32.gmra.mrb[22].mxu1 %vm240_vm2, %v1677_v58 }
  0xdc   : > { %4317 = vmatpush1.bf16.msra.mxu1 %v4316_v59  ;;  %v2170_v7 = vsel %vm2166_vm8, %v4630_v4, %v4635_v0  ;;  %1985 = vmatprep.mubr.f32.mxu1 %v6719_v21  ;;  %v4643_v11 = vpop.permute.xlu1 %4642  ;;  %v2173_v13 = vsel %vm2166_vm8, %v4634_v1, %v4629_v5  ;;  %v2169_v14 = vsel %vm2166_vm8, %v4629_v5, %v4634_v1 }
  0xdd   : > { %4327 = vmatprep.subr.bf16.mxu1 %v4326_v6  ;;  %v4645_v15 = vunpack.i.h.bf16 %v4643_v11  ;;  %v4644_v16 = vunpack.i.l.bf16 %v4643_v11  ;;  %v4638_v17 = vpop.permute.xlu0 %4637  ;;  %v2174_v18 = vsel %vm2166_vm8, %v4635_v0, %v4630_v4  ;;  %v4332_v34 = vpack.c.bf16 %v2170_v7, %v2169_v14  ;;  %v2437_v7 = vld [vmem:[%s6717_s2 + $0x150] sm:$0xff] }
  0xde   : > { %v4640_v20 = vunpack.i.h.bf16 %v4638_v17  ;;  %v4639_v22 = vunpack.i.l.bf16 %v4638_v17  ;;  %v4330_v23 = vpack.c.bf16 %v2174_v18, %v2173_v13  ;;  %vm3792_vm8 = vcmask 130048  }
  0xdf   : > { %4159 = vmatmul.mubr.msk.f32.vlgmr.msra.gmra.mrb[24].mxu1 %vm240_vm2, %v1913_v9 }
  0xe0   : > { %4329 = vmatpush1.bf16.msra.mxu1 %v4328_v10  ;;  %v2430_v30 = vsel %vm2428_vm9, %v4640_v20, %v4645_v15  ;;  %1991 = vmatprep.mubr.f32.mxu1 %v6719_v21  ;;  %v4653_v35 = vpop.permute.xlu1 %4652  ;;  %v2433_v36 = vsel %vm2428_vm9, %v4644_v16, %v4639_v22  ;;  %v2429_v37 = vsel %vm2428_vm9, %v4639_v22, %v4644_v16 }
  0xe1   : > { %4331 = vmatprep.subr.bf16.mxu1 %v4330_v23  ;;  %v4655_v38 = vunpack.i.h.bf16 %v4653_v35  ;;  %v4654_v39 = vunpack.i.l.bf16 %v4653_v35  ;;  %v4648_v40 = vpop.permute.xlu0 %4647  ;;  %v2434_v12 = vsel %vm2428_vm9, %v4645_v15, %v4640_v20  ;;  %v4344_v46 = vpack.c.bf16 %v2430_v30, %v2429_v37  ;;  %v2438_v30 = vld [vmem:[%s6717_s2 + $0x158] sm:$0xff] }
  0xe2   : > { %v4650_v41 = vunpack.i.h.bf16 %v4648_v40  ;;  %v4649_v42 = vunpack.i.l.bf16 %v4648_v40  ;;  %v4342_v43 = vpack.c.bf16 %v2434_v12, %v2433_v36 }
  0xe3   : > { %4160 = vmatmul.mubr.msk.f32.gmra.mrb[26].mxu1 %vm240_vm2, %v1914_v32 }
  0xe4   : > { %4333 = vmatpush1.bf16.msra.mxu1 %v4332_v34  ;;  %v2432_v44 = vsel %vm2428_vm9, %v4650_v41, %v4655_v38  ;;  %2247 = vmatprep.mubr.f32.mxu1 %v6719_v21  ;;  %v4663_v47 = vpop.permute.xlu1 %4662  ;;  %v2435_v48 = vsel %vm2428_vm9, %v4654_v39, %v4649_v42  ;;  %v2431_v49 = vsel %vm2428_vm9, %v4649_v42, %v4654_v39 }
  0xe5   : > { %4343 = vmatprep.subr.bf16.mxu1 %v4342_v43  ;;  %v4665_v50 = vunpack.i.h.bf16 %v4663_v47  ;;  %v4664_v51 = vunpack.i.l.bf16 %v4663_v47  ;;  %v4658_v19 = vpop.permute.xlu0 %4657  ;;  %v2436_v52 = vsel %vm2428_vm9, %v4655_v38, %v4650_v41  ;;  %v4348_v58 = vpack.c.bf16 %v2432_v44, %v2431_v49  ;;  %v2699_v44 = vld [vmem:[%s6717_s2 + $0x170] sm:$0xff] }
  0xe6   : > { %v4660_v53 = vunpack.i.h.bf16 %v4658_v19  ;;  %v4659_v54 = vunpack.i.l.bf16 %v4658_v19  ;;  %v4346_v55 = vpack.c.bf16 %v2436_v52, %v2435_v48 }
  0xe7   : > { %4165 = vmatmul.mubr.msk.f32.vlgmr.msra.gmra.mrb[28].mxu1 %vm240_vm2, %v2175_v45 }
  0xe8   : > { %4345 = vmatpush1.bf16.msra.mxu1 %v4344_v46  ;;  %v2692_v56 = vsel %vm2690_vm10, %v4660_v53, %v4665_v50  ;;  %2253 = vmatprep.mubr.f32.mxu1 %v6719_v21  ;;  %v4673_v59 = vpop.permute.xlu1 %4672  ;;  %v2695_v60 = vsel %vm2690_vm10, %v4664_v51, %v4659_v54  ;;  %v2691_v61 = vsel %vm2690_vm10, %v4659_v54, %v4664_v51 }
  0xe9   : > { %4347 = vmatprep.subr.bf16.mxu1 %v4346_v55  ;;  %v4675_v63 = vunpack.i.h.bf16 %v4673_v59  ;;  %v4674_v0 = vunpack.i.l.bf16 %v4673_v59  ;;  %v4668_v1 = vpop.permute.xlu0 %4667  ;;  %v2696_v2 = vsel %vm2690_vm10, %v4665_v50, %v4660_v53  ;;  %v4360_v9 = vpack.c.bf16 %v2692_v56, %v2691_v61 }
  0xea   : > { %v4670_v3 = vunpack.i.h.bf16 %v4668_v1  ;;  %v4669_v4 = vunpack.i.l.bf16 %v4668_v1  ;;  %v4358_v5 = vpack.c.bf16 %v2696_v2, %v2695_v60 }
  0xeb   : > { %4166 = vmatmul.mubr.msk.f32.gmra.mrb[30].mxu1 %vm240_vm2, %v2176_v57  ;;  %v2700_v57 = vld [vmem:[%s6717_s2 + $0x178] sm:$0xff] }
  0xec   : > { %4349 = vmatpush1.bf16.msra.mxu1 %v4348_v58  ;;  %v2694_v6 = vsel %vm2690_vm10, %v4670_v3, %v4675_v63  ;;  %2509 = vmatprep.mubr.f32.mxu1 %v6719_v21  ;;  %v4683_v10 = vpop.permute.xlu1 %4682  ;;  %v2697_v11 = vsel %vm2690_vm10, %v4674_v0, %v4669_v4  ;;  %v2693_v13 = vsel %vm2690_vm10, %v4669_v4, %v4674_v0 }
  0xed   : > { %4359 = vmatprep.subr.bf16.mxu1 %v4358_v5  ;;  %v4685_v14 = vunpack.i.h.bf16 %v4683_v10  ;;  %v4684_v15 = vunpack.i.l.bf16 %v4683_v10  ;;  %v4678_v16 = vpop.permute.xlu0 %4677  ;;  %v2698_v17 = vsel %vm2690_vm10, %v4675_v63, %v4670_v3  ;;  %v4364_v32 = vpack.c.bf16 %v2694_v6, %v2693_v13  ;;  %v2961_v6 = vld [vmem:[%s6717_s2 + $0x190] sm:$0xff] }
  0xee   : > { %v4680_v18 = vunpack.i.h.bf16 %v4678_v16  ;;  %v4679_v20 = vunpack.i.l.bf16 %v4678_v16  ;;  %v4362_v22 = vpack.c.bf16 %v2698_v17, %v2697_v11  ;;  %v5550_v16 = vld [vmem:[%s5114_s30 + $0x8] sm:$0xff]  ;;  %v5553_v17 = vld [vmem:[%s5114_s30 + $0x18] sm:$0xff]  ;;  %vm1536_vm10 = vcmp.lt.s32.totalorder %v5220_v31, 2 }
  0xef   : > { %4171 = vmatmul.mubr.msk.f32.vlgmr.msra.gmra.mrb[32].mxu1 %vm240_vm2, %v2437_v7 }
  0xf0   : > { %4361 = vmatpush1.bf16.msra.mxu1 %v4360_v9  ;;  %v2954_v23 = vsel %vm2952_vm11, %v4680_v18, %v4685_v14  ;;  %2515 = vmatprep.mubr.f32.mxu1 %v6719_v21  ;;  %v4693_v34 = vpop.permute.xlu1 %4692  ;;  %v2957_v35 = vsel %vm2952_vm11, %v4684_v15, %v4679_v20  ;;  %v2953_v36 = vsel %vm2952_vm11, %v4679_v20, %v4684_v15  ;;  %v2962_v15 = vld [vmem:[%s6717_s2 + $0x198] sm:$0xff]  ;;  %v3223_v20 = vld [vmem:[%s6717_s2 + $0x1b0] sm:$0xff] }
  0xf1   : > { %4363 = vmatprep.subr.bf16.mxu1 %v4362_v22  ;;  %v4695_v37 = vunpack.i.h.bf16 %v4693_v34  ;;  %v4694_v38 = vunpack.i.l.bf16 %v4693_v34  ;;  %v4688_v39 = vpop.permute.xlu0 %4687  ;;  %v2958_v40 = vsel %vm2952_vm11, %v4685_v14, %v4680_v18  ;;  %v4376_v45 = vpack.c.bf16 %v2954_v23, %v2953_v36  ;;  %v5565_v22 = vld [vmem:[%s5114_s30] sm:$0xff]  ;;  %v5568_v23 = vld [vmem:[%s5114_s30 + $0x10] sm:$0xff]  ;;  %v5579_v34 = vld [vmem:[%s5114_s30 + $0x38] sm:$0xff] }
  0xf2   : > { %v4690_v12 = vunpack.i.h.bf16 %v4688_v39  ;;  %v4689_v41 = vunpack.i.l.bf16 %v4688_v39  ;;  %v4374_v42 = vpack.c.bf16 %v2958_v40, %v2957_v35  ;;  %v5557_v18 = vpack.c.bf16 %v5553_v17, %v5550_v16  ;;  %v3224_v36 = vld [vmem:[%s6717_s2 + $0x1b8] sm:$0xff] }
  0xf3   : > { %4172 = vmatmul.mubr.msk.f32.gmra.mrb[34].mxu1 %vm240_vm2, %v2438_v30  ;;  %v5572_v30 = vpack.c.bf16 %v5568_v23, %v5565_v22 }
  0xf4   : > { %4365 = vmatpush1.bf16.msra.mxu1 %v4364_v32  ;;  %v2956_v43 = vsel %vm2952_vm11, %v4690_v12, %v4695_v37  ;;  %2771 = vmatprep.mubr.f32.mxu1 %v6719_v21  ;;  %v4703_v46 = vpop.permute.xlu1 %4702  ;;  %v2959_v47 = vsel %vm2952_vm11, %v4694_v38, %v4689_v41  ;;  %v2955_v48 = vsel %vm2952_vm11, %v4689_v41, %v4694_v38  ;;  %v5576_v32 = vld [vmem:[%s5114_s30 + $0x28] sm:$0xff]  ;;  %v5595_v38 = vld [vmem:[%s5114_s30 + $0x30] sm:$0xff]  ;;  %v3474_v41 = vld [vmem:[%s6717_s2] sm:$0xff] }
  0xf5   : > { %4375 = vmatprep.subr.bf16.mxu1 %v4374_v42  ;;  %v4705_v49 = vunpack.i.h.bf16 %v4703_v46  ;;  %v4704_v50 = vunpack.i.l.bf16 %v4703_v46  ;;  %v4698_v51 = vpop.permute.xlu0 %4697  ;;  %v2960_v19 = vsel %vm2952_vm11, %v4695_v37, %v4690_v12  ;;  %v4380_v55 = vpack.c.bf16 %v2956_v43, %v2955_v48  ;;  %v5592_v37 = vld [vmem:[%s5114_s30 + $0x20] sm:$0xff]  ;;  %s5044_s30 = smov 98  }
  0xf6   : > { %v4700_v52 = vunpack.i.h.bf16 %v4698_v51  ;;  %v4699_v53 = vunpack.i.l.bf16 %v4698_v51  ;;  %v4378_v54 = vpack.c.bf16 %v2960_v19, %v2959_v47  ;;  %v5583_v35 = vpack.c.bf16 %v5579_v34, %v5576_v32 }
  0xf7   : > { %4177 = vmatmul.mubr.msk.f32.vlgmr.msra.gmra.mrb[36].mxu1 %vm240_vm2, %v2699_v44  ;;  %v5599_v39 = vpack.c.bf16 %v5595_v38, %v5592_v37  ;;  %vm2035_vm11 = vcmp.lt.s32.totalorder %v5220_v31, 126 }
  0xf8   : > { %4377 = vmatpush1.bf16.msra.mxu1 %v4376_v45  ;;  %v3216_v56 = vsel %vm3214_vm12, %v4700_v52, %v4705_v49  ;;  %2777 = vmatprep.mubr.f32.mxu1 %v6719_v21  ;;  %v4713_v58 = vpop.permute.xlu1 %4712  ;;  %v3219_v59 = vsel %vm3214_vm12, %v4704_v50, %v4699_v53  ;;  %v3215_v60 = vsel %vm3214_vm12, %v4699_v53, %v4704_v50 }
  0xf9   : > { %4379 = vmatprep.subr.bf16.mxu1 %v4378_v54  ;;  %v4715_v61 = vunpack.i.h.bf16 %v4713_v58  ;;  %v4714_v63 = vunpack.i.l.bf16 %v4713_v58  ;;  %v4708_v0 = vpop.permute.xlu0 %4707  ;;  %v3220_v1 = vsel %vm3214_vm12, %v4705_v49, %v4700_v52  ;;  %v4392_v5 = vpack.c.bf16 %v3216_v56, %v3215_v60 }
  0xfa   : > { %v4710_v2 = vunpack.i.h.bf16 %v4708_v0  ;;  %v4709_v3 = vunpack.i.l.bf16 %v4708_v0  ;;  %v4390_v4 = vpack.c.bf16 %v3220_v1, %v3219_v59 }
  0xfb   : > { %4178 = vmatmul.mubr.msk.f32.gmra.mrb[38].mxu1 %vm240_vm2, %v2700_v57 }
  0xfc   : > { %4381 = vmatpush1.bf16.msra.mxu1 %v4380_v55  ;;  %3033 = vmatprep.mubr.f32.mxu1 %v6719_v21  ;;  %v3221_v7 = vsel %vm3214_vm12, %v4714_v63, %v4709_v3  ;;  %v3218_v9 = vsel %vm3214_vm12, %v4710_v2, %v4715_v61  ;;  %v3217_v10 = vsel %vm3214_vm12, %v4709_v3, %v4714_v63 }
  0xfd   : > { %4391 = vmatprep.subr.bf16.mxu1 %v4390_v4  ;;  %v3222_v11 = vsel %vm3214_vm12, %v4715_v61, %v4710_v2  ;;  %v4396_v14 = vpack.c.bf16 %v3218_v9, %v3217_v10  ;;  %v238_v10 = vld [vmem:[%s6717_s2 + $0x40] sm:$0xff]  ;;  %vm2821_vm12 = vcmp.lt.s32.totalorder %v5220_v31, 98 }
  0xfe   : > { %v4394_v13 = vpack.c.bf16 %v3222_v11, %v3221_v7 }
  0xff   : > { %4183 = vmatmul.mubr.msk.f32.vlgmr.msra.gmra.mrb[40].mxu1 %vm240_vm2, %v2961_v6 }
 0x100   : > { %4393 = vmatpush1.bf16.msra.mxu1 %v4392_v5  ;;  %3039 = vmatprep.mubr.f32.mxu1 %v6719_v21 }
 0x101   : > { %4395 = vmatprep.subr.bf16.mxu1 %v4394_v13 }
 0x103   : > { %4184 = vmatmul.mubr.msk.f32.gmra.mrb[42].mxu1 %vm240_vm2, %v2962_v15 }
 0x104   : > { %4397 = vmatpush1.bf16.msra.mxu1 %v4396_v14  ;;  %3295 = vmatprep.mubr.f32.mxu1 %v6719_v21 }
 0x105   : > { %4407 = vmatprep.subr.bf16.mxu1 %v5557_v18 }
 0x107   : > { %4189 = vmatmul.mubr.msk.f32.vlgmr.msra.gmra.mrb[44].mxu1 %vm240_vm2, %v3223_v20 }
 0x108   : > { %4409 = vmatpush1.bf16.msra.mxu1 %v5572_v30  ;;  %3301 = vmatprep.mubr.f32.mxu1 %v6719_v21 }
 0x109   : > { %v5601_v40 = vpop.permute.xlu1 %3583  ;;  %4411 = vmatprep.subr.bf16.mxu1 %v5583_v35 }
 0x10a   : > { %v5604_v12 = vpop.permute.xlu0 %3478 }
 0x10b   : > { %4190 = vmatmul.mubr.msk.f32.gmra.mrb[46].mxu1 %vm240_vm2, %v3224_v36  ;;  %v239_v36 = vld [vmem:[%s6717_s2 + $0x48] sm:$0xff] }
 0x10c   : > { %4413 = vmatpush1.bf16.msra.mxu1 %v5599_v39  ;;  %3548 = vmatprep.mubr.f32.mxu1 %v6719_v21 }
 0x10e   : > { %v5612_v42 = vpop.permute.xlu1 %3605 }
 0x10f   : > { %4195 = vmatmul.mubr.msk.f32.vlgmr.msra.gmra.mrb[48].mxu1 %vm240_vm2, %v3474_v41  ;;  %v5615_v43 = vpop.permute.xlu0 %3629 }
 0x110   : > { %3860 = vmatprep.mubr.f32.mxu1 %v6719_v21 }
 0x112   : > { %v4722_v44 = vpop.permute.xlu1 %4721 }
 0x113   : > { %v4724_v46 = vunpack.i.h.bf16 %v4722_v44  ;;  %v4723_v47 = vunpack.i.l.bf16 %v4722_v44 }
 0x114   : > { %v5618_v45 = vpop.permute.xlu0 %3653 }
 0x116   : > { %v4727_v48 = vpop.permute.xlu1 %4726 }
 0x117   : > { %v4729_v49 = vunpack.i.h.bf16 %v4727_v48  ;;  %v4728_v50 = vunpack.i.l.bf16 %v4727_v48 }
 0x119   : > { %v230_v51 = vsel %vm229_vm13, %v4723_v47, %v4728_v50  ;;  %v231_v19 = vsel %vm229_vm13, %v4724_v46, %v4729_v49  ;;  %v234_v52 = vsel %vm229_vm13, %v4728_v50, %v4723_v47  ;;  %v235_v53 = vsel %vm229_vm13, %v4729_v49, %v4724_v46  ;;  %v5629_v54 = vpop.permute.xlu0 %3671 }
 0x11a   : > { %v4734_v55 = vpop.permute.xlu1 %4733  ;;  %v4206_v56 = vpack.c.bf16 %v231_v19, %v230_v51  ;;  %v4208_v57 = vpack.c.bf16 %v235_v53, %v234_v52 }
 0x11b   : > { %v4736_v58 = vunpack.i.h.bf16 %v4734_v55  ;;  %v4735_v59 = vunpack.i.l.bf16 %v4734_v55 }
 0x11c   : > { %4207 = vmatprep.subr.bf16.mxu0 %v4206_v56 }
 0x11d   : > { %4209 = vmatpush1.bf16.msra.mxu0 %v4208_v57 }
 0x11e   : > { %v4739_v60 = vpop.permute.xlu1 %4738  ;;  %v5631_v61 = vpop.permute.xlu0 %3695 }
 0x11f   : > { %v4741_v63 = vunpack.i.h.bf16 %v4739_v60  ;;  %v4740_v0 = vunpack.i.l.bf16 %v4739_v60 }
 0x121   : > { %v232_v1 = vsel %vm229_vm13, %v4735_v59, %v4740_v0  ;;  %v233_v2 = vsel %vm229_vm13, %v4736_v58, %v4741_v63  ;;  %v236_v3 = vsel %vm229_vm13, %v4740_v0, %v4735_v59  ;;  %v237_v4 = vsel %vm229_vm13, %v4741_v63, %v4736_v58 }
 0x122   : > { %v5641_v5 = vpop.permute.xlu1 %3719  ;;  %v4210_v6 = vpack.c.bf16 %v233_v2, %v232_v1  ;;  %v4212_v7 = vpack.c.bf16 %v237_v4, %v236_v3  ;;  %v4751_v9 = vpop.permute.xlu0 %4750  ;;  %v497_v1 = vld [vmem:[%s6717_s2 + $0x60] sm:$0xff]  ;;  %v498_v2 = vld [vmem:[%s6717_s2 + $0x68] sm:$0xff]  ;;  %v6724_v3 = vmov 8   ;;  %v4986_v4 = vld [vmem:[%s6717_s2 + $0x10] sm:$0xff]  ;;  %vm3083_vm13 = vcmp.lt.s32.totalorder %v5220_v31, 96 }
 0x123   : > { %v4753_v11 = vunpack.i.h.bf16 %v4751_v9  ;;  %v4752_v13 = vunpack.i.l.bf16 %v4751_v9  ;;  %4755 = vset.pattern.permute.xlu0 %v6724_v3 }
 0x124   : > { %4211 = vmatprep.subr.bf16.mxu0 %v4210_v6  ;;  %3767 = vperm.xlu0 %4755, %v4986_v4  }
 0x125   : > { %4213 = vmatpush1.bf16.msra.mxu0 %v4212_v7 }
 0x126   : > { %v4746_v14 = vpop.permute.xlu1 %4745 }
 0x127   : > { %v4748_v15 = vunpack.i.h.bf16 %v4746_v14  ;;  %v4747_v20 = vunpack.i.l.bf16 %v4746_v14 }
 0x128   : > { %4120 = vmatmul.mubr.msk.f32.vlgmr.msra.gmra.mrb[0].mxu0 %vm240_vm2, %v238_v10  ;;  %4766 = vset.pattern.permute.xlu0 %v6721_v8 }
 0x129   : > { %317 = vmatprep.mubr.f32.mxu0 %v6719_v21  ;;  %v494_v41 = vsel %vm488_vm14, %v4753_v11, %v4748_v15  ;;  %v493_v44 = vsel %vm488_vm14, %v4752_v13, %v4747_v20  ;;  %v489_v46 = vsel %vm488_vm14, %v4747_v20, %v4752_v13  ;;  %v490_v47 = vsel %vm488_vm14, %v4748_v15, %v4753_v11 }
 0x12a   : > { %v5660_v48 = vpop.permute.xlu1 %3743  ;;  %v4224_v49 = vpack.c.bf16 %v494_v41, %v493_v44  ;;  %v4222_v50 = vpack.c.bf16 %v490_v47, %v489_v46 }
 0x12c   : > { %4121 = vmatmul.mubr.msk.f32.gmra.mrb[2].mxu0 %vm240_vm2, %v239_v36  ;;  %4223 = vmatprep.subr.bf16.mxu0 %v4222_v50 }
 0x12d   : > { %4225 = vmatpush1.bf16.msra.mxu0 %v4224_v49  ;;  %569 = vmatprep.mubr.f32.mxu0 %v6719_v21 }
 0x12e   : > { %v4758_v51 = vpop.permute.xlu1 %4757 }
 0x12f   : > { %v4760_v19 = vunpack.i.h.bf16 %v4758_v51  ;;  %v4759_v52 = vunpack.i.l.bf16 %v4758_v51 }
 0x132   : > { %v4763_v53 = vpop.permute.xlu1 %4762 }
 0x133   : > { %v4765_v55 = vunpack.i.h.bf16 %v4763_v53  ;;  %v4764_v56 = vunpack.i.l.bf16 %v4763_v53 }
 0x135   : > { %v495_v57 = vsel %vm488_vm14, %v4764_v56, %v4759_v52  ;;  %v496_v58 = vsel %vm488_vm14, %v4765_v55, %v4760_v19  ;;  %v491_v59 = vsel %vm488_vm14, %v4759_v52, %v4764_v56  ;;  %v492_v60 = vsel %vm488_vm14, %v4760_v19, %v4765_v55 }
 0x136   : > { %v4228_v63 = vpack.c.bf16 %v496_v58, %v495_v57  ;;  %v4226_v0 = vpack.c.bf16 %v492_v60, %v491_v59  ;;  %vm3345_vm14 = vcmp.lt.s32.totalorder %v5220_v31, 94 }
 0x138   : > { %4227 = vmatprep.subr.bf16.mxu0 %v4226_v0 }
 0x139   : > { %4229 = vmatpush1.bf16.msra.mxu0 %v4228_v63 }
 0x13c   : > { %4126 = vmatmul.mubr.msk.f32.vlgmr.msra.gmra.mrb[4].mxu0 %vm240_vm2, %v497_v1 }
 0x13d   : > { %575 = vmatprep.mubr.f32.mxu0 %v6719_v21 }
 0x140   : > { %4127 = vmatmul.mubr.msk.f32.gmra.mrb[6].mxu0 %vm240_vm2, %v498_v2 }
 0x141   : > { %831 = vmatprep.mubr.f32.mxu0 %v6719_v21 }
 0x182   : > { %v5687_v6 = vpop.f32.mrb[0].mxu1 }
 0x183   : > { %v5689_v7 = vpop.f32.mrb[1].mxu1 }
 0x186   : > { %v5691_v9 = vpop.f32.mrb[2].mxu1 }
 0x187   : > { %v5693_v10 = vpop.f32.mrb[3].mxu1 }
 0x18a   : > { %v5695_v11 = vpop.f32.mrb[4].mxu1 }
 0x18b   : > { %v5697_v13 = vpop.f32.mrb[5].mxu1 }
 0x18e   : > { %v5699_v14 = vpop.f32.mrb[6].mxu1 }
 0x18f   : > { %v5701_v15 = vpop.f32.mrb[7].mxu1 }
 0x192   : > { %v5703_v20 = vpop.f32.mrb[8].mxu1 }
 0x193   : > { %v5705_v36 = vpop.f32.mrb[9].mxu1 }
 0x196   : > { %v5707_v41 = vpop.f32.mrb[10].mxu1 }
 0x197   : > { %v5709_v44 = vpop.f32.mrb[11].mxu1 }
 0x19a   : > { %v5711_v46 = vpop.f32.mrb[12].mxu1 }
 0x19b   : > { %v5713_v47 = vpop.f32.mrb[13].mxu1 }
 0x19e   : > { %v5715_v49 = vpop.f32.mrb[14].mxu1 }
 0x19f   : > { %v5717_v50 = vpop.f32.mrb[15].mxu1 }
 0x1a2   : > { %v5719_v51 = vpop.f32.mrb[16].mxu1 }
 0x1a3   : > { %v5721_v19 = vpop.f32.mrb[17].mxu1 }
 0x1a6   : > { %v5723_v52 = vpop.f32.mrb[18].mxu1 }
 0x1a7   : > { %v5725_v53 = vpop.f32.mrb[19].mxu1 }
 0x1aa   : > { %v5727_v55 = vpop.f32.mrb[20].mxu1 }
 0x1ab   : > { %v5729_v56 = vpop.f32.mrb[21].mxu1 }
 0x1ac   : > { %6741 = vst [vmem:[#allocation4_spill] sm:$0xff] %v5729_v56 }
 0x1ae   : > { %v5731_v57 = vpop.f32.mrb[22].mxu1 }
 0x1af   : > { %6742 = vst [vmem:[#allocation5_spill] sm:$0xff] %v5731_v57  ;;  %v5733_v58 = vpop.f32.mrb[23].mxu1 }
 0x1b0   : > { %6743 = vst [vmem:[#allocation6_spill] sm:$0xff] %v5733_v58 }
 0x1b2   : > { %v5735_v59 = vpop.f32.mrb[24].mxu1 }
 0x1b3   : > { %6744 = vst [vmem:[#allocation7_spill] sm:$0xff] %v5735_v59  ;;  %v5737_v60 = vpop.f32.mrb[25].mxu1 }
 0x1b4   : > { %6745 = vst [vmem:[#allocation8_spill] sm:$0xff] %v5737_v60 }
 0x1b6   : > { %v5739_v63 = vpop.f32.mrb[26].mxu1 }
 0x1b7   : > { %6746 = vst [vmem:[#allocation9_spill] sm:$0xff] %v5739_v63  ;;  %v5741_v0 = vpop.f32.mrb[27].mxu1 }
 0x1b8   : > { %6747 = vst [vmem:[#allocation10_spill] sm:$0xff] %v5741_v0 }
 0x1ba   : > { %v5743_v1 = vpop.f32.mrb[28].mxu1 }
 0x1bb   : > { %6748 = vst [vmem:[#allocation11_spill] sm:$0xff] %v5743_v1  ;;  %v5745_v2 = vpop.f32.mrb[29].mxu1 }
 0x1bc   : > { %6749 = vst [vmem:[#allocation12_spill] sm:$0xff] %v5745_v2 }
 0x1be   : > { %v5747_v4 = vpop.f32.mrb[30].mxu1 }
 0x1bf   : > { %6750 = vst [vmem:[#allocation13_spill] sm:$0xff] %v5747_v4  ;;  %v5749_v21 = vpop.f32.mrb[31].mxu1 }
 0x1c0   : > { %6751 = vst [vmem:[#allocation14_spill] sm:$0xff] %v5749_v21 }
 0x1c2   : > { %v5751_v8 = vpop.f32.mrb[32].mxu1 }
 0x1c3   : > { %6752 = vst [vmem:[#allocation15_spill] sm:$0xff] %v5751_v8  ;;  %v5753_v62 = vpop.f32.mrb[33].mxu1 }
 0x1c4   : > { %6753 = vst [vmem:[#allocation16_spill] sm:$0xff] %v5753_v62 }
 0x1c6   : > { %v5755_v3 = vpop.f32.mrb[34].mxu1 }
 0x1c7   : > { %6754 = vst [vmem:[#allocation17_spill] sm:$0xff] %v5755_v3  ;;  %v5757_v27 = vpop.f32.mrb[35].mxu1 }
 0x1c8   : > { %6755 = vst [vmem:[#allocation18_spill] sm:$0xff] %v5757_v27 }
 0x1ca   : > { %v5759_v33 = vpop.f32.mrb[36].mxu1 }
 0x1cb   : > { %6756 = vst [vmem:[#allocation19_spill] sm:$0xff] %v5759_v33  ;;  %v5761_v26 = vpop.f32.mrb[37].mxu1 }
 0x1cc   : > { %6757 = vst [vmem:[#allocation20_spill] sm:$0xff] %v5761_v26 }
 0x1ce   : > { %v5763_v25 = vpop.f32.mrb[38].mxu1 }
 0x1cf   : > { %6758 = vst [vmem:[#allocation21_spill] sm:$0xff] %v5763_v25  ;;  %v5765_v29 = vpop.f32.mrb[39].mxu1 }
 0x1d0   : > { %6759 = vst [vmem:[#allocation22_spill] sm:$0xff] %v5765_v29 }
 0x1d2   : > { %v5767_v24 = vpop.f32.mrb[40].mxu1 }
 0x1d3   : > { %6760 = vst [vmem:[#allocation23_spill] sm:$0xff] %v5767_v24  ;;  %v5769_v28 = vpop.f32.mrb[41].mxu1 }
 0x1d4   : > { %6761 = vst [vmem:[#allocation24_spill] sm:$0xff] %v5769_v28 }
 0x1d6   : > { %v5771_v21 = vpop.f32.mrb[42].mxu1 }
 0x1d7   : > { %6762 = vst [vmem:[#allocation25_spill] sm:$0xff] %v5771_v21  ;;  %v5773_v8 = vpop.f32.mrb[43].mxu1 }
 0x1d8   : > { %6763 = vst [vmem:[#allocation26_spill] sm:$0xff] %v5773_v8 }
 0x1da   : > { %v5775_v62 = vpop.f32.mrb[44].mxu1 }
 0x1db   : > { %6764 = vst [vmem:[#allocation27_spill] sm:$0xff] %v5775_v62  ;;  %v5777_v3 = vpop.f32.mrb[45].mxu1 }
 0x1dc   : > { %6765 = vst [vmem:[#allocation28_spill] sm:$0xff] %v5777_v3 }
 0x1de   : > { %v5779_v27 = vpop.f32.mrb[46].mxu1 }
 0x1df   : > { %6766 = vst [vmem:[#allocation29_spill] sm:$0xff] %v5779_v27  ;;  %v5781_v33 = vpop.f32.mrb[47].mxu1 }
 0x1e0   : > { %6767 = vst [vmem:[#allocation30_spill] sm:$0xff] %v5781_v33 }
 0x1e2   : > { %v3550_v26 = vpop.f32.mrb[48].mxu1 }
 0x1e3   : > { %v3551_v25 = vadd.f32 %v3550_v26, %v5604_v12  ;;  %v3552_v29 = vpop.f32.mrb[49].mxu1 }
 0x1e4   : > { %v3553_v28 = vadd.f32 %v3552_v29, %v5604_v12  ;;  %v4125_v12 = vld [vmem:[%s6716_s1 + $0x12] ss:$8 sm:$0x3] }
 0x1e5   : > { %v3555_v4 = vmul.f32 0.1, %v3551_v25 }
 0x1e6   : > { %v3556_v27 = vmul.f32 0.1, %v3553_v28 }
 0x1e7   : > { %v5784_v24 = vmax.f32 %v3551_v25, %v3555_v4  ;;  %v6768_v25 = vlaneseq }
 0x1e8   : > { %v5795_v26 = vmax.f32 %v3553_v28, %v3556_v27  ;;  %v4122_v27 = vld [vmem:[%s6716_s1 + $0x11] ss:$8 sm:$0x3] }
 0x1e9   : > { %3612 = vrot.lane.b32.xlu1 %v5784_v24, %s5037_s8  ;;  %3565 = vrot.lane.b32.xlu0 %v5784_v24, %s5038_s11  ;;  %v5798_v4 = vshrl.u32 %v6768_v25, 7 }
 0x1eb   : > { %v5805_v29 = vsub.s32 0, %v5798_v4  ;;  %v5811_v33 = vsub.s32 1, %v5798_v4 }
 0x1ed   : > { %3678 = vrot.lane.b32.xlu1 %v5784_v24, %s5021_s10  ;;  %3588 = vrot.lane.b32.xlu0 %v5784_v24, %s5018_s7  ;;  %v457_v28 = vrot.slane %v4125_v12, %v5805_v29  ;;  %v330_v25 = vrot.slane %v4122_v27, %v5805_v29  ;;  %v461_v3 = vrot.slane %v4125_v12, %v5811_v33 }
 0x1ee   : > { %v334_v62 = vrot.slane %v4122_v27, %v5811_v33  ;;  %v5836_v12 = vpack.i.bf16 %v5568_v23, %v5565_v22 }
 0x1ef   : > { %v464_v21 = vmul.f32 %v457_v28, %v5687_v6  ;;  %v465_v0 = vmul.f32 %v461_v3, %v5689_v7  ;;  %v466_v6 = vmul.f32 %v457_v28, %v5691_v9  ;;  %v467_v7 = vmul.f32 %v461_v3, %v5693_v10  ;;  %v4128_v3 = vld [vmem:[%s6716_s1 + $0x13] ss:$8 sm:$0x3]  ;;  %v4131_v9 = vld [vmem:[%s6716_s1 + $0x14] ss:$8 sm:$0x3] }
 0x1f0   : > { %v588_v10 = vrot.slane %v4128_v3, %v5805_v29 }
 0x1f1   : > { %3567 = vrot.lane.b32.xlu1 %v5795_v26, %s5038_s11  ;;  %3636 = vrot.lane.b32.xlu0 %v5784_v24, %s5020_s9 }
 0x1f5   : > { %3590 = vrot.lane.b32.xlu1 %v5795_v26, %s5018_s7  ;;  %3702 = vrot.lane.b32.xlu0 %v5784_v24, %s5039_s22 }
 0x1f9   : > { %3614 = vrot.lane.b32.xlu1 %v5795_v26, %s5037_s8  ;;  %3726 = vrot.lane.b32.xlu0 %v5784_v24, %s5023_s17 }
 0x1fb   : > { %v313_v8 = vpop.f32.mrb[0].mxu0 }
 0x1fc   : > { %v337_v2 = vmul.f32 %v330_v25, %v313_v8  ;;  %v315_v1 = vpop.f32.mrb[1].mxu0 }
 0x1fd   : > { %v338_v63 = vmul.f32 %v334_v62, %v315_v1  ;;  %3638 = vrot.lane.b32.xlu1 %v5795_v26, %s5020_s9  ;;  %3680 = vrot.lane.b32.xlu0 %v5795_v26, %s5021_s10 }
 0x1fe   : > { %v468_v60 = vadd.f32 %v464_v21, %v337_v2  ;;  %v3560_v21 = vld [vmem:[%s6717_s2 + $0x18] sm:$0xff] }
 0x1ff   : > { %v469_v27 = vadd.f32 %v465_v0, %v338_v63  ;;  %v319_v59 = vpop.f32.mrb[2].mxu0 }
 0x200   : > { %v339_v8 = vmul.f32 %v330_v25, %v319_v59  ;;  %v321_v58 = vpop.f32.mrb[3].mxu0  ;;  %v723_v59 = vrot.slane %v4131_v9, %v5811_v33  ;;  %v4782_v25 = vpack.i.bf16 %v5579_v34, %v5576_v32 }
 0x201   : > { %v340_v1 = vmul.f32 %v334_v62, %v321_v58  ;;  %4768 = vrot.lane.b32.xlu1 %v5836_v12, %s5040_s24  ;;  %3750 = vrot.lane.b32.xlu0 %v5784_v24, %s5041_s25  ;;  %v5851_v62 = vpack.i.bf16 %v5595_v38, %v5592_v37  ;;  %v592_v37 = vrot.slane %v4128_v3, %v5811_v33 }
 0x202   : > { %v470_v22 = vadd.f32 %v466_v6, %v339_v8  ;;  %v5871_v38 = vpack.i.bf16 %v5553_v17, %v5550_v16  ;;  %v719_v58 = vrot.slane %v4131_v9, %v5805_v29  ;;  %v727_v6 = vmul.f32 %v723_v59, %v5697_v13 }
 0x203   : > { %v471_v23 = vadd.f32 %v467_v7, %v340_v1 }
 0x204   : > { %v726_v16 = vmul.f32 %v719_v58, %v5695_v11  ;;  %v728_v32 = vmul.f32 %v719_v58, %v5699_v14  ;;  %v729_v11 = vmul.f32 %v723_v59, %v5701_v15  ;;  %v3786_v14 = vld [vmem:[%s6717_s2 + $0x28] sm:$0xff]  ;;  %v5935_v15 = vpop.permute.xlu0 %3767  ;;  %v3620_v59 = vsub.s32 2, %v5798_v4 }
 0x205   : > { %3704 = vrot.lane.b32.xlu1 %v5795_v26, %s5039_s22  ;;  %3776 = vperm.xlu0 %4766, %v3560_v21  }
 0x209   : > { %3728 = vrot.lane.b32.xlu1 %v5795_v26, %s5023_s17  ;;  %4778 = vrot.lane.b32.xlu0 %v5851_v62, %s5040_s24 }
 0x20d   : > { %3752 = vrot.lane.b32.xlu1 %v5795_v26, %s5041_s25  ;;  %4788 = vrot.lane.b32.xlu0 %v5836_v12, %s5038_s11 }
 0x20f   : > { %v571_v63 = vpop.f32.mrb[4].mxu0 }
 0x210   : > { %v595_v0 = vmul.f32 %v588_v10, %v571_v63  ;;  %v573_v2 = vpop.f32.mrb[5].mxu0 }
 0x211   : > { %v596_v28 = vmul.f32 %v592_v37, %v573_v2  ;;  %4773 = vrot.lane.b32.xlu1 %v5871_v38, %s5040_s24  ;;  %4798 = vrot.lane.b32.xlu0 %v5851_v62, %s5038_s11  ;;  %v5956_v2 = vld [vmem:[%s6716_s1 + $0x8] sm:$0xff] }
 0x212   : > { %v599_v17 = vadd.f32 %v595_v0, %v468_v60  ;;  %v5945_v0 = vld [vmem:[%s6717_s2 + $0x30] sm:$0xff] }
 0x213   : > { %v600_v8 = vadd.f32 %v596_v28, %v469_v27  ;;  %v577_v7 = vpop.f32.mrb[6].mxu0 }
 0x214   : > { %v597_v1 = vmul.f32 %v588_v10, %v577_v7  ;;  %v579_v21 = vpop.f32.mrb[7].mxu0  ;;  %v5883_v3 = vadd.f32 %v726_v16, %v599_v17  ;;  %v5974_v17 = vrot.slane %v5956_v2, %v5811_v33 }
 0x215   : > { %v598_v9 = vmul.f32 %v592_v37, %v579_v21  ;;  %4808 = vrot.lane.b32.xlu0 %v5836_v12, %s5037_s8  ;;  %4783 = vrot.lane.b32.xlu1 %v4782_v25, %s5040_s24  ;;  %v5888_v63 = vadd.f32 %v727_v6, %v600_v8  ;;  %s5046_s24 = smov 94  }
 0x216   : > { %v601_v34 = vadd.f32 %v597_v1, %v470_v22  ;;  %v6769_v22 = vmov 1   ;;  %6773 = vst [vmem:[#allocation34_spill] sm:$0xff] %v5974_v17 }
 0x217   : > { %v602_v13 = vadd.f32 %v598_v9, %v471_v23 }
 0x218   : > { %v5892_v60 = vadd.f32 %v728_v32, %v601_v34  ;;  %v5991_v34 = vrot.slane %v5956_v2, %v3620_v59 }
 0x219   : > { %4818 = vrot.lane.b32.xlu0 %v5851_v62, %s5037_s8  ;;  %4793 = vrot.lane.b32.xlu1 %v5871_v38, %s5038_s11  ;;  %v5898_v27 = vadd.f32 %v729_v11, %v602_v13  ;;  %v3644_v11 = vsub.s32 3, %v5798_v4  ;;  %v3662_v13 = vsub.s32 4, %v5798_v4 }
 0x21a   : > { %6775 = vst [vmem:[#allocation36_spill] sm:$0xff] %v5991_v34 }
 0x21d   : > { %4828 = vrot.lane.b32.xlu0 %v5836_v12, %s5042_s18  ;;  %4803 = vrot.lane.b32.xlu1 %v4782_v25, %s5038_s11 }
 0x221   : > { %4838 = vrot.lane.b32.xlu0 %v5851_v62, %s5042_s18  ;;  %4813 = vrot.lane.b32.xlu1 %v5871_v38, %s5037_s8 }
 0x225   : > { %4848 = vrot.lane.b32.xlu0 %v5836_v12, %s5043_s21  ;;  %4823 = vrot.lane.b32.xlu1 %v4782_v25, %s5037_s8 }
 0x229   : > { %4858 = vrot.lane.b32.xlu0 %v5851_v62, %s5043_s21  ;;  %4833 = vrot.lane.b32.xlu1 %v5871_v38, %s5042_s18 }
 0x22d   : > { %4868 = vrot.lane.b32.xlu0 %v5836_v12, %s5039_s22  ;;  %4843 = vrot.lane.b32.xlu1 %v4782_v25, %s5042_s18 }
 0x231   : > { %4878 = vrot.lane.b32.xlu0 %v5851_v62, %s5039_s22  ;;  %4853 = vrot.lane.b32.xlu1 %v5871_v38, %s5043_s21 }
 0x235   : > { %4888 = vrot.lane.b32.xlu0 %v5836_v12, %s5041_s25  ;;  %4863 = vrot.lane.b32.xlu1 %v4782_v25, %s5043_s21  ;;  %s4030_s21 = scalar_lea.vmem (%p5097_p5), %s6718_s3, %s4205_s6 }
 0x239   : > { %4898 = vrot.lane.b32.xlu0 %v5851_v62, %s5041_s25  ;;  %4873 = vrot.lane.b32.xlu1 %v5871_v38, %s5039_s22 }
 0x23d   : > { %4908 = vrot.lane.b32.xlu0 %v5836_v12, %s5044_s30  ;;  %4883 = vrot.lane.b32.xlu1 %v4782_v25, %s5039_s22 }
 0x241   : > { %4918 = vrot.lane.b32.xlu0 %v5851_v62, %s5044_s30  ;;  %4893 = vrot.lane.b32.xlu1 %v5871_v38, %s5041_s25 }
 0x245   : > { %4928 = vrot.lane.b32.xlu0 %v5836_v12, %s5045_s23  ;;  %4903 = vrot.lane.b32.xlu1 %v4782_v25, %s5041_s25 }
 0x249   : > { %4938 = vrot.lane.b32.xlu0 %v5851_v62, %s5045_s23  ;;  %4913 = vrot.lane.b32.xlu1 %v5871_v38, %s5044_s30 }
 0x24d   : > { %4948 = vrot.lane.b32.xlu0 %v5836_v12, %s5046_s24  ;;  %4923 = vrot.lane.b32.xlu1 %v4782_v25, %s5044_s30 }
 0x251   : > { %4958 = vrot.lane.b32.xlu0 %v5851_v62, %s5046_s24  ;;  %4933 = vrot.lane.b32.xlu1 %v5871_v38, %s5045_s23 }
 0x255   : > { %3789 = vperm.xlu0 %4766, %v3786_v14   ;;  %4943 = vrot.lane.b32.xlu1 %v4782_v25, %s5045_s23  ;;  %v6776_v14 = vmov 4  }
 0x259   : > { %4953 = vrot.lane.b32.xlu1 %v5871_v38, %s5046_s24  ;;  %4968 = vset.pattern.permute.xlu0 %v6769_v22  ;;  %v5951_v38 = vld [vmem:[%s6716_s1] sm:$0xff]  ;;  %v6777_v22 = vmov 2  }
 0x25a   : > { %3893 = vperm.xlu0 %4968, %v5945_v0   ;;  %v5962_v28 = vrot.slane %v5951_v38, %v5805_v29  ;;  %v5970_v16 = vrot.slane %v5951_v38, %v5811_v33  ;;  %v5984_v21 = vrot.slane %v5951_v38, %v3620_v59 }
 0x25b   : > { %v3613_v23 = vpop.permute.xlu1 %3612  ;;  %v3566_v10 = vpop.permute.xlu0 %3565 }
 0x25c   : > { %6770 = vst [vmem:[#allocation31_spill] sm:$0xff] %v5962_v28  ;;  %6772 = vst [vmem:[#allocation33_spill] sm:$0xff] %v5970_v16 }
 0x25d   : > { %4963 = vrot.lane.b32.xlu1 %v4782_v25, %s5046_s24  ;;  %v5966_v25 = vrot.slane %v5956_v2, %v5805_v29  ;;  %6774 = vst [vmem:[#allocation35_spill] sm:$0xff] %v5984_v21 }
 0x25e   : > { %4971 = vset.pattern.permute.xlu0 %v6776_v14 }
 0x25f   : > { %v5939_v12 = vpop.permute.xlu1 %3678  ;;  %v3589_v62 = vpop.permute.xlu0 %3588  ;;  %6771 = vst [vmem:[#allocation32_spill] sm:$0xff] %v5966_v25  ;;  %3935 = vperm.xlu0 %4971, %v5945_v0  }
 0x261   : > { %3879 = vperm.xlu1 %4967, %v5945_v0  }
 0x263   : > { %v3568_v37 = vpop.permute.xlu1 %3567  ;;  %v3637_v58 = vpop.permute.xlu0 %3636 }
 0x264   : > { %v3569_v9 = vsel %vm1012_vm15, %v3566_v10, %v3568_v37  ;;  %v3570_v32 = vsel %vm1012_vm15, %v3568_v37, %v3566_v10 }
 0x265   : > { %4969 = vset.pattern.permute.xlu1 %v6777_v22  ;;  %v3579_v10 = vmul.f32 %v5962_v28, %v3570_v32  ;;  %v3580_v37 = vmul.f32 %v5966_v25, %v3569_v9  ;;  %v6012_v22 = vrot.slane %v5951_v38, %v3644_v11  ;;  %v6018_v32 = vrot.slane %v5951_v38, %v3662_v13 }
 0x266   : > { %3909 = vperm.xlu1 %4969, %v5945_v0   ;;  %v6021_v9 = vrot.slane %v5956_v2, %v3662_v13  ;;  %v3686_v25 = vsub.s32 5, %v5798_v4 }
 0x267   : > { %v3591_v6 = vpop.permute.xlu1 %3590  ;;  %v5976_v8 = vpop.permute.xlu0 %3702  ;;  %6778 = vst [vmem:[#allocation37_spill] sm:$0xff] %v6018_v32  ;;  %v3587_v28 = vmul.f32 %v5601_v40, %v3580_v37  ;;  %v3668_v37 = vmul.f32 %v6018_v32, %v5784_v24 }
 0x268   : > { %v3592_v7 = vsel %vm1143_vm4, %v3589_v62, %v3591_v6  ;;  %v3593_v1 = vsel %vm1143_vm4, %v3591_v6, %v3589_v62  ;;  %6779 = vst [vmem:[#allocation38_spill] sm:$0xff] %v6021_v9 }
 0x269   : > { %v3602_v62 = vmul.f32 %v5970_v16, %v3593_v1  ;;  %v3603_v6 = vmul.f32 %v5974_v17, %v3592_v7  ;;  %v6015_v17 = vrot.slane %v5956_v2, %v3644_v11  ;;  %v3586_v11 = vmul.f32 %v5601_v40, %v3579_v10 }
 0x26a   : > { %v3669_v40 = vmul.f32 %v6021_v9, %v5795_v26  ;;  %v6044_v10 = vrot.slane %v5951_v38, %v3686_v25 }
 0x26b   : > { %v3615_v57 = vpop.permute.xlu1 %3614  ;;  %v5999_v56 = vpop.permute.xlu0 %3726 }
 0x26c   : > { %v3616_v59 = vsel %vm1274_vm0, %v3613_v23, %v3615_v57  ;;  %v3617_v14 = vsel %vm1274_vm0, %v3615_v57, %v3613_v23  ;;  %v3608_v57 = vmul.f32 %v5612_v42, %v3602_v62  ;;  %v3609_v23 = vmul.f32 %v5612_v42, %v3603_v6 }
 0x26d   : > { %v3626_v1 = vmul.f32 %v5984_v21, %v3617_v14  ;;  %v3627_v7 = vmul.f32 %v5991_v34, %v3616_v59  ;;  %v3710_v59 = vsub.s32 6, %v5798_v4  ;;  %v6780_v34 = vmov 3  }
 0x26e   : > { %4970 = vset.pattern.permute.xlu1 %v6780_v34  ;;  %v6781_v21 = vmov 5  }
 0x26f   : > { %v3639_v14 = vpop.permute.xlu1 %3638  ;;  %4972 = vset.pattern.permute.xlu0 %v6781_v21  ;;  %3925 = vperm.xlu1 %4970, %v5945_v0   ;;  %v3632_v42 = vmul.f32 %v5615_v43, %v3626_v1  ;;  %v3633_v62 = vmul.f32 %v5615_v43, %v3627_v7  ;;  %v3681_v6 = vpop.permute.xlu0 %3680  ;;  %v3610_v43 = vadd.f32 %v3608_v57, %v3586_v11  ;;  %v6782_v57 = vmov 6  }
 0x270   : > { %v3640_v13 = vsel %vm1667_vm6, %v3637_v58, %v3639_v14  ;;  %v3641_v16 = vsel %vm1667_vm6, %v3639_v14, %v3637_v58  ;;  %3951 = vperm.xlu0 %4972, %v5945_v0   ;;  %v6047_v58 = vrot.slane %v5956_v2, %v3686_v25  ;;  %v3611_v1 = vadd.f32 %v3609_v23, %v3587_v28 }
 0x271   : > { %v3650_v34 = vmul.f32 %v6012_v22, %v3641_v16  ;;  %v3651_v21 = vmul.f32 %v6015_v17, %v3640_v13  ;;  %v3682_v13 = vsel %vm1904_vm7, %v5939_v12, %v3681_v6  ;;  %v6060_v25 = vrot.slane %v5951_v38, %v3710_v59 }
 0x272   : > { %v6063_v9 = vrot.slane %v5956_v2, %v3710_v59  ;;  %v3634_v28 = vadd.f32 %v3632_v42, %v3610_v43  ;;  %v3635_v23 = vadd.f32 %v3633_v62, %v3611_v1  ;;  %v3734_v11 = vsub.s32 7, %v5798_v4 }
 0x273   : > { %v3656_v16 = vmul.f32 %v5618_v45, %v3650_v34  ;;  %v3657_v7 = vmul.f32 %v5618_v45, %v3651_v21  ;;  %v6053_v14 = vpop.permute.xlu1 %4768  ;;  %4973 = vset.pattern.permute.xlu1 %v6782_v57  ;;  %v3683_v45 = vsel %vm1904_vm7, %v3681_v6, %v5939_v12  ;;  %v6783_v34 = vmov 8  }
 0x274   : > { %3967 = vperm.xlu1 %4973, %v5945_v0   ;;  %4975 = vset.pattern.permute.xlu0 %v6783_v34  ;;  %v3675_v59 = vmul.f32 %v5629_v54, %v3669_v40  ;;  %v3674_v57 = vmul.f32 %v5629_v54, %v3668_v37  ;;  %v3692_v62 = vmul.f32 %v6044_v10, %v3682_v13  ;;  %v6784_v37 = vmov 7   ;;  %v4197_v34 = vld [vmem:[%s6716_s1 + $0x18] ss:$0 sm:$0xff] }
 0x275   : > { %3999 = vperm.xlu0 %4975, %v5945_v0   ;;  %v3658_v21 = vadd.f32 %v3656_v16, %v3634_v28  ;;  %v3659_v32 = vadd.f32 %v3657_v7, %v3635_v23  ;;  %v3693_v43 = vmul.f32 %v6047_v58, %v3683_v45  ;;  %v6086_v40 = vrot.slane %v5951_v38, %v3734_v11 }
 0x276   : > { %v6089_v54 = vrot.slane %v5956_v2, %v3734_v11  ;;  %v6785_v16 = vmov 0  }
 0x277   : > { %v3705_v42 = vpop.permute.xlu1 %3704  ;;  %v3677_v7 = vadd.f32 %v3675_v59, %v3659_v32  ;;  %v3676_v13 = vadd.f32 %v3674_v57, %v3658_v21  ;;  %v3699_v23 = vmul.f32 %v5631_v61, %v3693_v43  ;;  %v3751_v59 = vpop.permute.xlu0 %3750 }
 0x278   : > { %v3706_v4 = vsel %vm2297_vm1, %v5976_v8, %v3705_v42  ;;  %v3707_v12 = vsel %vm2297_vm1, %v3705_v42, %v5976_v8  ;;  %4974 = vset.pattern.permute.xlu1 %v6784_v37  ;;  %v3698_v8 = vmul.f32 %v5631_v61, %v3692_v62  ;;  %v4196_v61 = vld [vmem:[%s6716_s1 + $0x10] ss:$0 sm:$0xff] }
 0x279   : > { %v3716_v6 = vmul.f32 %v6060_v25, %v3706_v4  ;;  %v3717_v1 = vmul.f32 %v6063_v9, %v3707_v12  ;;  %3983 = vperm.xlu1 %4974, %v5945_v0   ;;  %4976 = vset.pattern.permute.xlu0 %v6785_v16 }
 0x27a   : > { %v3700_v21 = vadd.f32 %v3698_v8, %v3676_v13  ;;  %v4770_v8 = vunpack.i.l.bf16 %v6053_v14 }
 0x27b   : > { %v3729_v28 = vpop.permute.xlu1 %3728  ;;  %v3722_v0 = vmul.f32 %v5641_v5, %v3716_v6  ;;  %v3723_v32 = vmul.f32 %v5641_v5, %v3717_v1 }
 0x27c   : > { %v3730_v38 = vsel %vm2428_vm9, %v5999_v56, %v3729_v28  ;;  %v3731_v2 = vsel %vm2428_vm9, %v3729_v28, %v5999_v56  ;;  %v3701_v56 = vadd.f32 %v3699_v23, %v3677_v7  ;;  %v4771_v28 = vunpack.i.h.bf16 %v6053_v14 }
 0x27d   : > { %v3740_v45 = vmul.f32 %v6086_v40, %v3730_v38  ;;  %v3741_v11 = vmul.f32 %v6089_v54, %v3731_v2  ;;  %4977 = vset.pattern.permute.xlu1 %v6785_v16  ;;  %v3724_v4 = vadd.f32 %v3722_v0, %v3700_v21 }
 0x27e   : > { %v3725_v12 = vadd.f32 %v3723_v32, %v3701_v56 }
 0x27f   : > { %v3746_v57 = vmul.f32 %v5660_v48, %v3740_v45  ;;  %v3747_v5 = vmul.f32 %v5660_v48, %v3741_v11  ;;  %v3753_v42 = vpop.permute.xlu1 %3752 }
 0x280   : > { %v3754_v62 = vsel %vm2559_vm3, %v3751_v59, %v3753_v42  ;;  %v3755_v43 = vsel %vm2559_vm3, %v3753_v42, %v3751_v59 }
 0x281   : > { %v3764_v6 = vmul.f32 %v4196_v61, %v3754_v62  ;;  %v3765_v1 = vmul.f32 %v4197_v34, %v3755_v43  ;;  %v3749_v13 = vadd.f32 %v3747_v5, %v3725_v12  ;;  %v3748_v48 = vadd.f32 %v3746_v57, %v3724_v4 }
 0x283   : > { %v3770_v37 = vmul.f32 %v5935_v15, %v3764_v6  ;;  %v3771_v16 = vmul.f32 %v5935_v15, %v3765_v1  ;;  %v4774_v7 = vpop.permute.xlu1 %4773 }
 0x284   : > { %v4776_v23 = vunpack.i.h.bf16 %v4774_v7  ;;  %v4775_v38 = vunpack.i.l.bf16 %v4774_v7  ;;  %v3777_v2 = vpop.permute.xlu0 %3776 }
 0x285   : > { %v3773_v0 = vadd.f32 %v3771_v16, %v3749_v13  ;;  %v3772_v32 = vadd.f32 %v3770_v37, %v3748_v48 }
 0x286   : > { %v755_v45 = vsel %vm750_vm5, %v4775_v38, %v4770_v8  ;;  %v756_v11 = vsel %vm750_vm5, %v4776_v23, %v4771_v28  ;;  %v751_v15 = vsel %vm750_vm5, %v4770_v8, %v4775_v38  ;;  %v752_v61 = vsel %vm750_vm5, %v4771_v28, %v4776_v23 }
 0x287   : > { %v4240_v34 = vpack.c.bf16 %v756_v11, %v755_v45  ;;  %v3779_v21 = vadd.f32 %v3777_v2, %v3772_v32  ;;  %v3780_v14 = vadd.f32 %v3777_v2, %v3773_v0  ;;  %v4784_v56 = vpop.permute.xlu1 %4783  ;;  %v4238_v59 = vpack.c.bf16 %v752_v61, %v751_v15 }
 0x288   : > { %v4786_v57 = vunpack.i.h.bf16 %v4784_v56  ;;  %v4785_v5 = vunpack.i.l.bf16 %v4784_v56  ;;  %v4779_v42 = vpop.permute.xlu0 %4778 }
 0x289   : > { %v3781_v62 = vmul.f32 0.1, %v3779_v21  ;;  %v3782_v43 = vmul.f32 0.1, %v3780_v14  ;;  %v4781_v4 = vunpack.i.h.bf16 %v4779_v42  ;;  %v4780_v12 = vunpack.i.l.bf16 %v4779_v42  ;;  %4239 = vmatprep.subr.bf16.mxu0 %v4238_v59 }
 0x28a   : > { %4241 = vmatpush1.bf16.msra.mxu0 %v4240_v34 }
 0x28b   : > { %v3783_v6 = vmax.f32 %v3779_v21, %v3781_v62  ;;  %v3784_v1 = vmax.f32 %v3780_v14, %v3782_v43  ;;  %v758_v37 = vsel %vm750_vm5, %v4786_v57, %v4781_v4  ;;  %v757_v16 = vsel %vm750_vm5, %v4785_v5, %v4780_v12  ;;  %v4794_v7 = vpop.permute.xlu1 %4793  ;;  %v759_v62 = vld [vmem:[%s6717_s2 + $0x80] sm:$0xff] }
 0x28c   : > { %v4244_v13 = vpack.c.bf16 %v758_v37, %v757_v16  ;;  %v4796_v48 = vunpack.i.h.bf16 %v4794_v7  ;;  %v4795_v28 = vunpack.i.l.bf16 %v4794_v7  ;;  %v4789_v8 = vpop.permute.xlu0 %4788  ;;  %v753_v23 = vsel %vm750_vm5, %v4780_v12, %v4785_v5  ;;  %v3785_v43 = vld [vmem:[%s6717_s2 + $0x20] sm:$0xff] }
 0x28d   : > { %v4416_v38 = vpack.c.bf16 %v3783_v6, %v5784_v24  ;;  %v4791_v2 = vunpack.i.h.bf16 %v4789_v8  ;;  %v4790_v0 = vunpack.i.l.bf16 %v4789_v8  ;;  %v754_v32 = vsel %vm750_vm5, %v4781_v4, %v4786_v57 }
 0x28e   : > { %v4242_v45 = vpack.c.bf16 %v754_v32, %v753_v23  ;;  %v4414_v11 = vpack.c.bf16 %v3784_v1, %v5795_v26 }
 0x28f   : > { %v1018_v15 = vsel %vm1012_vm15, %v4796_v48, %v4791_v2  ;;  %v1017_v61 = vsel %vm1012_vm15, %v4795_v28, %v4790_v0  ;;  %v4804_v34 = vpop.permute.xlu1 %4803  ;;  %v1013_v21 = vsel %vm1012_vm15, %v4790_v0, %v4795_v28  ;;  %v1014_v24 = vsel %vm1012_vm15, %v4791_v2, %v4796_v48  ;;  %v760_v2 = vld [vmem:[%s6717_s2 + $0x88] sm:$0xff] }
 0x290   : > { %4243 = vmatprep.subr.bf16.mxu0 %v4242_v45  ;;  %4415 = vmatprep.subr.bf16.mxu1 %v4414_v11  ;;  %v4806_v14 = vunpack.i.h.bf16 %v4804_v34  ;;  %v4805_v56 = vunpack.i.l.bf16 %v4804_v34  ;;  %v4799_v59 = vpop.permute.xlu0 %4798  ;;  %v4254_v57 = vpack.c.bf16 %v1014_v24, %v1013_v21  ;;  %v4256_v26 = vpack.c.bf16 %v1018_v15, %v1017_v61 }
 0x291   : > { %4245 = vmatpush1.bf16.msra.mxu0 %v4244_v13  ;;  %v4801_v5 = vunpack.i.h.bf16 %v4799_v59  ;;  %v4800_v42 = vunpack.i.l.bf16 %v4799_v59  ;;  %4417 = vmatpush1.bf16.msra.mxu1 %v4416_v38  ;;  %v6786_v38 = vmov 0.0  }
 0x292   : > { %4255 = vmatprep.subr.bf16.mxu0 %v4254_v57  ;;  %v1021_v57 = vld [vmem:[%s6717_s2 + $0xa0] sm:$0xff] }
 0x293   : > { %v1020_v4 = vsel %vm1012_vm15, %v4806_v14, %v4801_v5  ;;  %v1019_v12 = vsel %vm1012_vm15, %v4805_v56, %v4800_v42  ;;  %v4814_v6 = vpop.permute.xlu1 %4813  ;;  %v1015_v1 = vsel %vm1012_vm15, %v4800_v42, %v4805_v56  ;;  %v1016_v37 = vsel %vm1012_vm15, %v4801_v5, %v4806_v14 }
 0x294   : > { %4132 = vmatmul.mubr.msk.f32.vlgmr.msra.gmra.mrb[8].mxu0 %vm240_vm2, %v759_v62  ;;  %4198 = vmatmul.mubr.msk.f32.vlgmr.msra.gmra.mrb[50].mxu1 %vm3792_vm8, %v3785_v43  ;;  %v4816_v16 = vunpack.i.h.bf16 %v4814_v6  ;;  %v4815_v7 = vunpack.i.l.bf16 %v4814_v6  ;;  %v4809_v13 = vpop.permute.xlu0 %4808  ;;  %v4258_v48 = vpack.c.bf16 %v1016_v37, %v1015_v1  ;;  %v4260_v28 = vpack.c.bf16 %v1020_v4, %v1019_v12 }
 0x295   : > { %4257 = vmatpush1.bf16.msra.mxu0 %v4256_v26  ;;  %v4811_v8 = vunpack.i.h.bf16 %v4809_v13  ;;  %v4810_v23 = vunpack.i.l.bf16 %v4809_v13  ;;  %837 = vmatprep.mubr.f32.mxu0 %v6786_v38  ;;  %v1022_v13 = vld [vmem:[%s6717_s2 + $0xa8] sm:$0xff] }
 0x296   : > { %4259 = vmatprep.subr.bf16.mxu0 %v4258_v48 }
 0x297   : > { %v1280_v0 = vsel %vm1274_vm0, %v4816_v16, %v4811_v8  ;;  %v1279_v32 = vsel %vm1274_vm0, %v4815_v7, %v4810_v23  ;;  %v4824_v45 = vpop.permute.xlu1 %4823  ;;  %v1275_v11 = vsel %vm1274_vm0, %v4810_v23, %v4815_v7  ;;  %v1276_v15 = vsel %vm1274_vm0, %v4811_v8, %v4816_v16 }
 0x298   : > { %4133 = vmatmul.mubr.msk.f32.gmra.mrb[10].mxu0 %vm240_vm2, %v760_v2  ;;  %v4826_v61 = vunpack.i.h.bf16 %v4824_v45  ;;  %v4825_v34 = vunpack.i.l.bf16 %v4824_v45  ;;  %v4819_v21 = vpop.permute.xlu0 %4818  ;;  %v4270_v24 = vpack.c.bf16 %v1276_v15, %v1275_v11  ;;  %v4272_v14 = vpack.c.bf16 %v1280_v0, %v1279_v32 }
 0x299   : > { %4261 = vmatpush1.bf16.msra.mxu0 %v4260_v28  ;;  %v4821_v56 = vunpack.i.h.bf16 %v4819_v21  ;;  %v4820_v59 = vunpack.i.l.bf16 %v4819_v21  ;;  %1093 = vmatprep.mubr.f32.mxu0 %v6786_v38  ;;  %v1283_v21 = vld [vmem:[%s6717_s2 + $0xc0] sm:$0xff] }
 0x29a   : > { %4271 = vmatprep.subr.bf16.mxu0 %v4270_v24 }
 0x29b   : > { %v1282_v26 = vsel %vm1274_vm0, %v4826_v61, %v4821_v56  ;;  %v1281_v5 = vsel %vm1274_vm0, %v4825_v34, %v4820_v59  ;;  %v4834_v42 = vpop.permute.xlu1 %4833  ;;  %v1277_v62 = vsel %vm1274_vm0, %v4820_v59, %v4825_v34  ;;  %v1278_v43 = vsel %vm1274_vm0, %v4821_v56, %v4826_v61 }
 0x29c   : > { %4138 = vmatmul.mubr.msk.f32.vlgmr.msra.gmra.mrb[12].mxu0 %vm240_vm2, %v1021_v57  ;;  %v4836_v4 = vunpack.i.h.bf16 %v4834_v42  ;;  %v4835_v12 = vunpack.i.l.bf16 %v4834_v42  ;;  %v4829_v6 = vpop.permute.xlu0 %4828  ;;  %v4274_v1 = vpack.c.bf16 %v1278_v43, %v1277_v62  ;;  %v4276_v37 = vpack.c.bf16 %v1282_v26, %v1281_v5  ;;  %v1284_v62 = vld [vmem:[%s6717_s2 + $0xc8] sm:$0xff] }
 0x29d   : > { %4273 = vmatpush1.bf16.msra.mxu0 %v4272_v14  ;;  %v4831_v16 = vunpack.i.h.bf16 %v4829_v6  ;;  %v4830_v7 = vunpack.i.l.bf16 %v4829_v6  ;;  %1099 = vmatprep.mubr.f32.mxu0 %v6786_v38 }
 0x29e   : > { %4275 = vmatprep.subr.bf16.mxu0 %v4274_v1 }
 0x29f   : > { %v1542_v48 = vsel %vm1536_vm10, %v4836_v4, %v4831_v16  ;;  %v1541_v28 = vsel %vm1536_vm10, %v4835_v12, %v4830_v7  ;;  %v4844_v8 = vpop.permute.xlu1 %4843  ;;  %v1537_v23 = vsel %vm1536_vm10, %v4830_v7, %v4835_v12  ;;  %v1538_v2 = vsel %vm1536_vm10, %v4831_v16, %v4836_v4  ;;  %v1545_v16 = vld [vmem:[%s6717_s2 + $0xe0] sm:$0xff] }
 0x2a0   : > { %4139 = vmatmul.mubr.msk.f32.gmra.mrb[14].mxu0 %vm240_vm2, %v1022_v13  ;;  %v4846_v0 = vunpack.i.h.bf16 %v4844_v8  ;;  %v4845_v32 = vunpack.i.l.bf16 %v4844_v8  ;;  %v4839_v45 = vpop.permute.xlu0 %4838  ;;  %v4286_v11 = vpack.c.bf16 %v1538_v2, %v1537_v23  ;;  %v4288_v15 = vpack.c.bf16 %v1542_v48, %v1541_v28 }
 0x2a1   : > { %4277 = vmatpush1.bf16.msra.mxu0 %v4276_v37  ;;  %v4841_v61 = vunpack.i.h.bf16 %v4839_v45  ;;  %v4840_v34 = vunpack.i.l.bf16 %v4839_v45  ;;  %1355 = vmatprep.mubr.f32.mxu0 %v6786_v38  ;;  %v1546_v45 = vld [vmem:[%s6717_s2 + $0xe8] sm:$0xff] }
 0x2a2   : > { %4287 = vmatprep.subr.bf16.mxu0 %v4286_v11 }
 0x2a3   : > { %v1544_v24 = vsel %vm1536_vm10, %v4846_v0, %v4841_v61  ;;  %v1543_v14 = vsel %vm1536_vm10, %v4845_v32, %v4840_v34  ;;  %v1539_v56 = vsel %vm1536_vm10, %v4840_v34, %v4845_v32  ;;  %v1540_v59 = vsel %vm1536_vm10, %v4841_v61, %v4846_v0  ;;  %v4854_v57 = vpop.permute.xlu1 %4853 }
 0x2a4   : > { %4144 = vmatmul.mubr.msk.f32.vlgmr.msra.gmra.mrb[16].mxu0 %vm240_vm2, %v1283_v21  ;;  %v4849_v26 = vpop.permute.xlu0 %4848  ;;  %v4290_v5 = vpack.c.bf16 %v1540_v59, %v1539_v56  ;;  %v4292_v42 = vpack.c.bf16 %v1544_v24, %v1543_v14  ;;  %v4856_v12 = vunpack.i.h.bf16 %v4854_v57  ;;  %v4855_v6 = vunpack.i.l.bf16 %v4854_v57 }
 0x2a5   : > { %4289 = vmatpush1.bf16.msra.mxu0 %v4288_v15  ;;  %1361 = vmatprep.mubr.f32.mxu0 %v6786_v38  ;;  %v4851_v43 = vunpack.i.h.bf16 %v4849_v26  ;;  %v4850_v4 = vunpack.i.l.bf16 %v4849_v26  ;;  %v1782_v26 = vld [vmem:[%s6717_s2 + $0x100] sm:$0xff] }
 0x2a6   : > { %4291 = vmatprep.subr.bf16.mxu0 %v4290_v5 }
 0x2a7   : > { %v4864_v1 = vpop.permute.xlu1 %4863  ;;  %v2040_v7 = vsel %vm2035_vm11, %v4855_v6, %v4850_v4  ;;  %v2041_v13 = vsel %vm2035_vm11, %v4856_v12, %v4851_v43  ;;  %v2036_v32 = vsel %vm2035_vm11, %v4850_v4, %v4855_v6 }
 0x2a8   : > { %4145 = vmatmul.mubr.msk.f32.gmra.mrb[18].mxu0 %vm240_vm2, %v1284_v62  ;;  %v4859_v37 = vpop.permute.xlu0 %4858  ;;  %v4866_v8 = vunpack.i.h.bf16 %v4864_v1  ;;  %v4865_v23 = vunpack.i.l.bf16 %v4864_v1  ;;  %v4318_v11 = vpack.c.bf16 %v2041_v13, %v2040_v7  ;;  %v1783_v13 = vld [vmem:[%s6717_s2 + $0x108] sm:$0xff] }
 0x2a9   : > { %4293 = vmatpush1.bf16.msra.mxu0 %v4292_v42  ;;  %1617 = vmatprep.mubr.f32.mxu0 %v6786_v38  ;;  %v4861_v48 = vunpack.i.h.bf16 %v4859_v37  ;;  %v4860_v28 = vunpack.i.l.bf16 %v4859_v37 }
 0x2aa   : > { %4303 = vmatprep.subr.bf16.mxu0 %v5557_v18  ;;  %v2037_v18 = vsel %vm2035_vm11, %v4851_v43, %v4856_v12 }
 0x2ab   : > { %v4874_v2 = vpop.permute.xlu1 %4873  ;;  %v2043_v24 = vsel %vm2035_vm11, %v4866_v8, %v4861_v48  ;;  %v4320_v59 = vpack.c.bf16 %v2037_v18, %v2036_v32  ;;  %v2038_v57 = vsel %vm2035_vm11, %v4860_v28, %v4865_v23 }
 0x2ac   : > { %4150 = vmatmul.mubr.msk.f32.vlgmr.msra.gmra.mrb[20].mxu0 %vm240_vm2, %v1545_v16  ;;  %v4869_v0 = vpop.permute.xlu0 %4868  ;;  %v4876_v34 = vunpack.i.h.bf16 %v4874_v2  ;;  %v4875_v21 = vunpack.i.l.bf16 %v4874_v2 }
 0x2ad   : > { %4305 = vmatpush1.bf16.msra.mxu0 %v5572_v30  ;;  %1623 = vmatprep.mubr.f32.mxu0 %v6786_v38  ;;  %v4871_v15 = vunpack.i.h.bf16 %v4869_v0  ;;  %v4870_v61 = vunpack.i.l.bf16 %v4869_v0  ;;  %v2042_v30 = vsel %vm2035_vm11, %v4865_v23, %v4860_v28 }
 0x2ae   : > { %4307 = vmatprep.subr.bf16.mxu0 %v5583_v35  ;;  %v2039_v35 = vsel %vm2035_vm11, %v4861_v48, %v4866_v8  ;;  %v4322_v5 = vpack.c.bf16 %v2043_v24, %v2042_v30 }
 0x2af   : > { %v4884_v14 = vpop.permute.xlu1 %4883  ;;  %v2302_v42 = vsel %vm2297_vm1, %v4875_v21, %v4870_v61  ;;  %v4324_v1 = vpack.c.bf16 %v2039_v35, %v2038_v57  ;;  %v2298_v16 = vsel %vm2297_vm1, %v4870_v61, %v4875_v21  ;;  %v2299_v7 = vsel %vm2297_vm1, %v4871_v15, %v4876_v34 }
 0x2b0   : > { %4151 = vmatmul.mubr.msk.f32.gmra.mrb[22].mxu0 %vm240_vm2, %v1546_v45  ;;  %v4879_v56 = vpop.permute.xlu0 %4878  ;;  %v4886_v4 = vunpack.i.h.bf16 %v4884_v14  ;;  %v4885_v12 = vunpack.i.l.bf16 %v4884_v14 }
 0x2b1   : > { %4309 = vmatpush1.bf16.msra.mxu0 %v5599_v39  ;;  %1854 = vmatprep.mubr.f32.mxu0 %v6786_v38  ;;  %v2303_v39 = vsel %vm2297_vm1, %v4876_v34, %v4871_v15  ;;  %v4881_v62 = vunpack.i.h.bf16 %v4879_v56  ;;  %v4880_v43 = vunpack.i.l.bf16 %v4879_v56  ;;  %v2044_v34 = vld [vmem:[%s6717_s2 + $0x120] sm:$0xff] }
 0x2b2   : > { %4319 = vmatprep.subr.bf16.mxu0 %v4318_v11  ;;  %v4334_v48 = vpack.c.bf16 %v2303_v39, %v2302_v42  ;;  %v4336_v11 = vpack.c.bf16 %v2299_v7, %v2298_v16 }
 0x2b3   : > { %v4894_v6 = vpop.permute.xlu1 %4893  ;;  %v2304_v0 = vsel %vm2297_vm1, %v4885_v12, %v4880_v43  ;;  %v2305_v32 = vsel %vm2297_vm1, %v4886_v4, %v4881_v62  ;;  %v2300_v15 = vsel %vm2297_vm1, %v4880_v43, %v4885_v12  ;;  %v2301_v61 = vsel %vm2297_vm1, %v4881_v62, %v4886_v4  ;;  %v2045_v62 = vld [vmem:[%s6717_s2 + $0x128] sm:$0xff] }
 0x2b4   : > { %4156 = vmatmul.mubr.msk.f32.vlgmr.msra.gmra.mrb[24].mxu0 %vm240_vm2, %v1782_v26  ;;  %v4889_v37 = vpop.permute.xlu0 %4888  ;;  %v4896_v23 = vunpack.i.h.bf16 %v4894_v6  ;;  %v4895_v2 = vunpack.i.l.bf16 %v4894_v6  ;;  %v4338_v21 = vpack.c.bf16 %v2305_v32, %v2304_v0  ;;  %v4340_v26 = vpack.c.bf16 %v2301_v61, %v2300_v15 }
 0x2b5   : > { %4321 = vmatpush1.bf16.msra.mxu0 %v4320_v59  ;;  %1860 = vmatprep.mubr.f32.mxu0 %v6786_v38  ;;  %v4891_v28 = vunpack.i.h.bf16 %v4889_v37  ;;  %v4890_v8 = vunpack.i.l.bf16 %v4889_v37 }
 0x2b6   : > { %4323 = vmatprep.subr.bf16.mxu0 %v4322_v5 }
 0x2b7   : > { %v4904_v18 = vpop.permute.xlu1 %4903  ;;  %v2564_v30 = vsel %vm2559_vm3, %v4895_v2, %v4890_v8  ;;  %v2565_v24 = vsel %vm2559_vm3, %v4896_v23, %v4891_v28  ;;  %v2560_v42 = vsel %vm2559_vm3, %v4890_v8, %v4895_v2  ;;  %v2561_v39 = vsel %vm2559_vm3, %v4891_v28, %v4896_v23  ;;  %v2306_v23 = vld [vmem:[%s6717_s2 + $0x140] sm:$0xff] }
 0x2b8   : > { %4157 = vmatmul.mubr.msk.f32.gmra.mrb[26].mxu0 %vm240_vm2, %v1783_v13  ;;  %v4899_v45 = vpop.permute.xlu0 %4898  ;;  %v4906_v59 = vunpack.i.h.bf16 %v4904_v18  ;;  %v4905_v57 = vunpack.i.l.bf16 %v4904_v18  ;;  %v4350_v43 = vpack.c.bf16 %v2565_v24, %v2564_v30 }
 0x2b9   : > { %4325 = vmatpush1.bf16.msra.mxu0 %v4324_v1  ;;  %2116 = vmatprep.mubr.f32.mxu0 %v6786_v38  ;;  %v4901_v14 = vunpack.i.h.bf16 %v4899_v45  ;;  %v4900_v56 = vunpack.i.l.bf16 %v4899_v45 }
 0x2ba   : > { %4335 = vmatprep.subr.bf16.mxu0 %v4334_v48  ;;  %v4352_v48 = vpack.c.bf16 %v2561_v39, %v2560_v42 }
 0x2bb   : > { %v4914_v35 = vpop.permute.xlu1 %4913  ;;  %v2566_v37 = vsel %vm2559_vm3, %v4905_v57, %v4900_v56  ;;  %v2567_v16 = vsel %vm2559_vm3, %v4906_v59, %v4901_v14  ;;  %v2562_v28 = vsel %vm2559_vm3, %v4900_v56, %v4905_v57  ;;  %v2563_v8 = vsel %vm2559_vm3, %v4901_v14, %v4906_v59  ;;  %v2307_v14 = vld [vmem:[%s6717_s2 + $0x148] sm:$0xff] }
 0x2bc   : > { %4162 = vmatmul.mubr.msk.f32.vlgmr.msra.gmra.mrb[28].mxu0 %vm240_vm2, %v2044_v34  ;;  %v4909_v5 = vpop.permute.xlu0 %4908  ;;  %v4916_v6 = vunpack.i.h.bf16 %v4914_v35  ;;  %v4915_v1 = vunpack.i.l.bf16 %v4914_v35  ;;  %v4354_v2 = vpack.c.bf16 %v2567_v16, %v2566_v37  ;;  %v4356_v34 = vpack.c.bf16 %v2563_v8, %v2562_v28 }
 0x2bd   : > { %4337 = vmatpush1.bf16.msra.mxu0 %v4336_v11  ;;  %2122 = vmatprep.mubr.f32.mxu0 %v6786_v38  ;;  %v4911_v4 = vunpack.i.h.bf16 %v4909_v5  ;;  %v4910_v12 = vunpack.i.l.bf16 %v4909_v5 }
 0x2be   : > { %4339 = vmatprep.subr.bf16.mxu0 %v4338_v21 }
 0x2bf   : > { %v4924_v7 = vpop.permute.xlu1 %4923  ;;  %v2826_v0 = vsel %vm2821_vm12, %v4915_v1, %v4910_v12  ;;  %v2827_v32 = vsel %vm2821_vm12, %v4916_v6, %v4911_v4  ;;  %v2822_v30 = vsel %vm2821_vm12, %v4910_v12, %v4915_v1  ;;  %v2823_v24 = vsel %vm2821_vm12, %v4911_v4, %v4916_v6  ;;  %v2568_v6 = vld [vmem:[%s6717_s2 + $0x160] sm:$0xff] }
 0x2c0   : > { %4163 = vmatmul.mubr.msk.f32.gmra.mrb[30].mxu0 %vm240_vm2, %v2045_v62  ;;  %v4919_v13 = vpop.permute.xlu0 %4918  ;;  %v4926_v11 = vunpack.i.h.bf16 %v4924_v7  ;;  %v4925_v15 = vunpack.i.l.bf16 %v4924_v7  ;;  %v4366_v56 = vpack.c.bf16 %v2827_v32, %v2826_v0 }
 0x2c1   : > { %4341 = vmatpush1.bf16.msra.mxu0 %v4340_v26  ;;  %2378 = vmatprep.mubr.f32.mxu0 %v6786_v38  ;;  %v4921_v18 = vunpack.i.h.bf16 %v4919_v13  ;;  %v4920_v45 = vunpack.i.l.bf16 %v4919_v13 }
 0x2c2   : > { %4351 = vmatprep.subr.bf16.mxu0 %v4350_v43  ;;  %v4368_v43 = vpack.c.bf16 %v2823_v24, %v2822_v30 }
 0x2c3   : > { %v4934_v61 = vpop.permute.xlu1 %4933  ;;  %v2828_v5 = vsel %vm2821_vm12, %v4925_v15, %v4920_v45  ;;  %v2829_v42 = vsel %vm2821_vm12, %v4926_v11, %v4921_v18  ;;  %v2824_v4 = vsel %vm2821_vm12, %v4920_v45, %v4925_v15  ;;  %v2825_v12 = vsel %vm2821_vm12, %v4921_v18, %v4926_v11  ;;  %v2569_v18 = vld [vmem:[%s6717_s2 + $0x168] sm:$0xff] }
 0x2c4   : > { %4168 = vmatmul.mubr.msk.f32.vlgmr.msra.gmra.mrb[32].mxu0 %vm240_vm2, %v2306_v23  ;;  %v4929_v21 = vpop.permute.xlu0 %4928  ;;  %v4936_v35 = vunpack.i.h.bf16 %v4934_v61  ;;  %v4935_v26 = vunpack.i.l.bf16 %v4934_v61  ;;  %v4370_v1 = vpack.c.bf16 %v2829_v42, %v2828_v5  ;;  %v4372_v23 = vpack.c.bf16 %v2825_v12, %v2824_v4 }
 0x2c5   : > { %4353 = vmatpush1.bf16.msra.mxu0 %v4352_v48  ;;  %2384 = vmatprep.mubr.f32.mxu0 %v6786_v38  ;;  %v4931_v59 = vunpack.i.h.bf16 %v4929_v21  ;;  %v4930_v57 = vunpack.i.l.bf16 %v4929_v21 }
 0x2c6   : > { %4355 = vmatprep.subr.bf16.mxu0 %v4354_v2 }
 0x2c7   : > { %v4944_v39 = vpop.permute.xlu1 %4943  ;;  %v3088_v37 = vsel %vm3083_vm13, %v4935_v26, %v4930_v57  ;;  %v3089_v16 = vsel %vm3083_vm13, %v4936_v35, %v4931_v59  ;;  %v3084_v0 = vsel %vm3083_vm13, %v4930_v57, %v4935_v26  ;;  %v3085_v32 = vsel %vm3083_vm13, %v4931_v59, %v4936_v35  ;;  %v2830_v59 = vld [vmem:[%s6717_s2 + $0x180] sm:$0xff] }
 0x2c8   : > { %4169 = vmatmul.mubr.msk.f32.gmra.mrb[34].mxu0 %vm240_vm2, %v2307_v14  ;;  %v4939_v62 = vpop.permute.xlu0 %4938  ;;  %v4946_v48 = vunpack.i.h.bf16 %v4944_v39  ;;  %v4945_v28 = vunpack.i.l.bf16 %v4944_v39  ;;  %v4382_v45 = vpack.c.bf16 %v3089_v16, %v3088_v37  ;;  %v4384_v14 = vpack.c.bf16 %v3085_v32, %v3084_v0  ;;  %v3093_v32 = vld [vmem:[%s6717_s2 + $0x1a8] sm:$0xff] }
 0x2c9   : > { %4357 = vmatpush1.bf16.msra.mxu0 %v4356_v34  ;;  %2640 = vmatprep.mubr.f32.mxu0 %v6786_v38  ;;  %v4941_v7 = vunpack.i.h.bf16 %v4939_v62  ;;  %v4940_v13 = vunpack.i.l.bf16 %v4939_v62 }
 0x2ca   : > { %4367 = vmatprep.subr.bf16.mxu0 %v4366_v56 }
 0x2cb   : > { %v4954_v8 = vpop.permute.xlu1 %4953  ;;  %v3090_v21 = vsel %vm3083_vm13, %v4945_v28, %v4940_v13  ;;  %v3091_v30 = vsel %vm3083_vm13, %v4946_v48, %v4941_v7  ;;  %v3086_v56 = vsel %vm3083_vm13, %v4940_v13, %v4945_v28  ;;  %v3087_v57 = vsel %vm3083_vm13, %v4941_v7, %v4946_v48  ;;  %v3092_v28 = vld [vmem:[%s6717_s2 + $0x1a0] sm:$0xff] }
 0x2cc   : > { %4174 = vmatmul.mubr.msk.f32.vlgmr.msra.gmra.mrb[36].mxu0 %vm240_vm2, %v2568_v6  ;;  %v4949_v2 = vpop.permute.xlu0 %4948  ;;  %v4956_v61 = vunpack.i.h.bf16 %v4954_v8  ;;  %v4955_v34 = vunpack.i.l.bf16 %v4954_v8  ;;  %v4386_v26 = vpack.c.bf16 %v3091_v30, %v3090_v21  ;;  %v4388_v12 = vpack.c.bf16 %v3087_v57, %v3086_v56  ;;  %v2831_v6 = vld [vmem:[%s6717_s2 + $0x188] sm:$0xff] }
 0x2cd   : > { %4369 = vmatpush1.bf16.msra.mxu0 %v4368_v43  ;;  %2646 = vmatprep.mubr.f32.mxu0 %v6786_v38  ;;  %v4951_v11 = vunpack.i.h.bf16 %v4949_v2  ;;  %v4950_v15 = vunpack.i.l.bf16 %v4949_v2 }
 0x2ce   : > { %4371 = vmatprep.subr.bf16.mxu0 %v4370_v1 }
 0x2cf   : > { %v4964_v24 = vpop.permute.xlu1 %4963  ;;  %v3350_v5 = vsel %vm3345_vm14, %v4955_v34, %v4950_v15  ;;  %v3351_v42 = vsel %vm3345_vm14, %v4956_v61, %v4951_v11  ;;  %v3346_v1 = vsel %vm3345_vm14, %v4950_v15, %v4955_v34  ;;  %v3347_v37 = vsel %vm3345_vm14, %v4951_v11, %v4956_v61  ;;  %v4134_v11 = vld [vmem:[%s6716_s1 + $0x15] ss:$8 sm:$0x3]  ;;  %v4137_v15 = vld [vmem:[%s6716_s1 + $0x16] ss:$8 sm:$0x3] }
 0x2d0   : > { %4175 = vmatmul.mubr.msk.f32.gmra.mrb[38].mxu0 %vm240_vm2, %v2569_v18  ;;  %v4959_v35 = vpop.permute.xlu0 %4958  ;;  %v4966_v43 = vunpack.i.h.bf16 %v4964_v24  ;;  %v4965_v4 = vunpack.i.l.bf16 %v4964_v24  ;;  %v4398_v16 = vpack.c.bf16 %v3351_v42, %v3350_v5  ;;  %v4400_v48 = vpack.c.bf16 %v3347_v37, %v3346_v1  ;;  %v3354_v18 = vld [vmem:[%s6717_s2 + $0x1c0] sm:$0xff]  ;;  %v4140_v5 = vld [vmem:[%s6716_s1 + $0x17] ss:$8 sm:$0x3] }
 0x2d1   : > { %4373 = vmatpush1.bf16.msra.mxu0 %v4372_v23  ;;  %2902 = vmatprep.mubr.f32.mxu0 %v6786_v38  ;;  %v4961_v39 = vunpack.i.h.bf16 %v4959_v35  ;;  %v4960_v62 = vunpack.i.l.bf16 %v4959_v35  ;;  %v850_v61 = vrot.slane %v4134_v11, %v5805_v29  ;;  %v854_v34 = vrot.slane %v4134_v11, %v5811_v33 }
 0x2d2   : > { %4383 = vmatprep.subr.bf16.mxu0 %v4382_v45  ;;  %v3355_v45 = vld [vmem:[%s6717_s2 + $0x1c8] sm:$0xff]  ;;  %v985_v30 = vrot.slane %v4137_v15, %v5811_v33 }
 0x2d3   : > { %v3352_v7 = vsel %vm3345_vm14, %v4965_v4, %v4960_v62  ;;  %v3353_v13 = vsel %vm3345_vm14, %v4966_v43, %v4961_v39  ;;  %v3348_v8 = vsel %vm3345_vm14, %v4960_v62, %v4965_v4  ;;  %v3349_v23 = vsel %vm3345_vm14, %v4961_v39, %v4966_v43  ;;  %v4143_v43 = vld [vmem:[%s6716_s1 + $0x20] ss:$8 sm:$0x3] }
 0x2d4   : > { %4180 = vmatmul.mubr.msk.f32.vlgmr.msra.gmra.mrb[40].mxu0 %vm240_vm2, %v2830_v59  ;;  %v4402_v2 = vpack.c.bf16 %v3353_v13, %v3352_v7  ;;  %v4404_v0 = vpack.c.bf16 %v3349_v23, %v3348_v8  ;;  %v3790_v21 = vpop.permute.xlu0 %3789  ;;  %v989_v62 = vmul.f32 %v985_v30, %v5705_v36  ;;  %v1116_v7 = vrot.slane %v4140_v5, %v5811_v33 }
 0x2d5   : > { %4385 = vmatpush1.bf16.msra.mxu0 %v4384_v14  ;;  %2908 = vmatprep.mubr.f32.mxu0 %v6786_v38  ;;  %v1243_v36 = vrot.slane %v4143_v43, %v5805_v29 }
 0x2d6   : > { %4387 = vmatprep.subr.bf16.mxu0 %v4386_v26 }
 0x2d7   : > { %v1250_v11 = vmul.f32 %v1243_v36, %v5711_v46 }
 0x2d8   : > { %4181 = vmatmul.mubr.msk.f32.gmra.mrb[42].mxu0 %vm240_vm2, %v2831_v6 }
 0x2d9   : > { %4389 = vmatpush1.bf16.msra.mxu0 %v4388_v12  ;;  %3164 = vmatprep.mubr.f32.mxu0 %v6786_v38 }
 0x2da   : > { %4399 = vmatprep.subr.bf16.mxu0 %v4398_v16 }
 0x2dc   : > { %4186 = vmatmul.mubr.msk.f32.vlgmr.msra.gmra.mrb[44].mxu0 %vm240_vm2, %v3092_v28  ;;  %v1247_v28 = vrot.slane %v4143_v43, %v5811_v33 }
 0x2dd   : > { %4401 = vmatpush1.bf16.msra.mxu0 %v4400_v48  ;;  %3170 = vmatprep.mubr.f32.mxu0 %v6786_v38 }
 0x2de   : > { %4403 = vmatprep.subr.bf16.mxu0 %v4402_v2 }
 0x2e0   : > { %4187 = vmatmul.mubr.msk.f32.gmra.mrb[46].mxu0 %vm240_vm2, %v3093_v32 }
 0x2e1   : > { %4405 = vmatpush1.bf16.msra.mxu0 %v4404_v0  ;;  %3426 = vmatprep.mubr.f32.mxu0 %v6786_v38 }
 0x2e4   : > { %4192 = vmatmul.mubr.msk.f32.vlgmr.msra.gmra.mrb[48].mxu0 %vm240_vm2, %v3354_v18 }
 0x2e5   : > { %3432 = vmatprep.mubr.f32.mxu0 %v6786_v38  ;;  %v981_v38 = vrot.slane %v4137_v15, %v5805_v29 }
 0x2e7   : > { %v988_v42 = vmul.f32 %v981_v38, %v5703_v20  ;;  %v990_v13 = vmul.f32 %v981_v38, %v5707_v41 }
 0x2e8   : > { %4193 = vmatmul.mubr.msk.f32.gmra.mrb[50].mxu0 %vm240_vm2, %v3355_v45  ;;  %v4146_v45 = vld [vmem:[%s6716_s1 + $0x21] ss:$8 sm:$0x3] }
 0x2e9   : > { %v1374_v46 = vrot.slane %v4146_v45, %v5805_v29 }
 0x367   : > { %v833_v24 = vpop.f32.mrb[8].mxu0  ;;  %v3862_v14 = vpop.f32.mrb[50].mxu1 }
 0x368   : > { %v857_v56 = vmul.f32 %v850_v61, %v833_v24  ;;  %v835_v59 = vpop.f32.mrb[9].mxu0  ;;  %v6418_v57 = vadd.f32 %v3862_v14, %v3790_v21  ;;  %v3864_v35 = vpop.f32.mrb[51].mxu1 }
 0x369   : > { %v858_v26 = vmul.f32 %v854_v34, %v835_v59  ;;  %v6446_v2 = vadd.f32 %v3864_v35, %v3790_v21  ;;  %v1252_v59 = vmul.f32 %v1243_v36, %v5715_v49 }
 0x36a   : > { %v861_v39 = vadd.f32 %v857_v56, %v5883_v3  ;;  %3900 = vrot.lane.b32.xlu0 %v6418_v57, %s5037_s8  ;;  %3869 = vrot.lane.b32.xlu1 %v6418_v57, %s5038_s11  ;;  %v1112_v3 = vrot.slane %v4140_v5, %v5805_v29  ;;  %v1378_v56 = vrot.slane %v4146_v45, %v5811_v33 }
 0x36b   : > { %v862_v4 = vadd.f32 %v858_v26, %v5888_v63  ;;  %v839_v12 = vpop.f32.mrb[10].mxu0  ;;  %v991_v63 = vmul.f32 %v985_v30, %v5709_v44  ;;  %v1251_v44 = vmul.f32 %v1247_v28, %v5713_v47  ;;  %v1253_v26 = vmul.f32 %v1247_v28, %v5717_v50 }
 0x36c   : > { %v859_v6 = vmul.f32 %v850_v61, %v839_v12  ;;  %v841_v1 = vpop.f32.mrb[11].mxu0  ;;  %v992_v20 = vadd.f32 %v988_v42, %v861_v39 }
 0x36d   : > { %v860_v37 = vmul.f32 %v854_v34, %v841_v1  ;;  %v993_v16 = vadd.f32 %v989_v62, %v862_v4 }
 0x36e   : > { %v863_v48 = vadd.f32 %v859_v6, %v5892_v60  ;;  %3958 = vrot.lane.b32.xlu0 %v6418_v57, %s5039_s22  ;;  %3884 = vrot.lane.b32.xlu1 %v6418_v57, %s5018_s7  ;;  %v4152_v6 = vld [vmem:[%s6716_s1 + $0x23] ss:$8 sm:$0x3] }
 0x36f   : > { %v864_v8 = vadd.f32 %v860_v37, %v5898_v27  ;;  %v1095_v23 = vpop.f32.mrb[12].mxu0  ;;  %v4149_v27 = vld [vmem:[%s6716_s1 + $0x22] ss:$8 sm:$0x3] }
 0x370   : > { %v1119_v41 = vmul.f32 %v1112_v3, %v1095_v23  ;;  %v1097_v0 = vpop.f32.mrb[13].mxu0  ;;  %v994_v32 = vadd.f32 %v990_v13, %v863_v48  ;;  %v1505_v35 = vrot.slane %v4149_v27, %v5805_v29  ;;  %v1509_v5 = vrot.slane %v4149_v27, %v5811_v33 }
 0x371   : > { %v1120_v18 = vmul.f32 %v1116_v7, %v1097_v0  ;;  %v995_v60 = vadd.f32 %v991_v63, %v864_v8  ;;  %v1636_v48 = vrot.slane %v4152_v6, %v5805_v29  ;;  %v1640_v8 = vrot.slane %v4152_v6, %v5811_v33 }
 0x372   : > { %v1123_v15 = vadd.f32 %v1119_v41, %v992_v20  ;;  %3871 = vrot.lane.b32.xlu0 %v6446_v2, %s5038_s11  ;;  %3916 = vrot.lane.b32.xlu1 %v6418_v57, %s5020_s9  ;;  %v1512_v1 = vmul.f32 %v1505_v35, %v5719_v51  ;;  %v1513_v50 = vmul.f32 %v1509_v5, %v5721_v19  ;;  %s4119_s11 = sshll.u32 %s177_s28, 5 }
 0x373   : > { %v1124_v61 = vadd.f32 %v1120_v18, %v993_v16  ;;  %v1101_v34 = vpop.f32.mrb[14].mxu0  ;;  %v1514_v19 = vmul.f32 %v1505_v35, %v5723_v52  ;;  %v1515_v0 = vmul.f32 %v1509_v5, %v5725_v53  ;;  %v4158_v52 = vld [vmem:[%s6716_s1 + $0x25] ss:$8 sm:$0x3]  ;;  %s6644_s12 = scalar_lea.vmem [#allocation3], %s4119_s11 }
 0x374   : > { %v1121_v38 = vmul.f32 %v1112_v3, %v1101_v34  ;;  %v1103_v21 = vpop.f32.mrb[15].mxu0  ;;  %v1254_v30 = vadd.f32 %v1250_v11, %v1123_v15  ;;  %v4155_v3 = vld [vmem:[%s6716_s1 + $0x24] ss:$8 sm:$0x3] }
 0x375   : > { %v1122_v24 = vmul.f32 %v1116_v7, %v1103_v21  ;;  %v1255_v14 = vadd.f32 %v1251_v44, %v1124_v61  ;;  %v209_v7 = vld [vmem:[%s6717_s2 + $0x1d0] sm:$0xff]  ;;  %v1767_v23 = vrot.slane %v4155_v3, %v5805_v29  ;;  %v6787_v53 = vld [vmem:[#allocation4_spill] sm:$0xff]  ;;  %v6788_v5 = vld [vmem:[#allocation5_spill] sm:$0xff] }
 0x376   : > { %v1125_v47 = vadd.f32 %v1121_v38, %v994_v32  ;;  %3886 = vrot.lane.b32.xlu0 %v6446_v2, %s5018_s7  ;;  %3942 = vrot.lane.b32.xlu1 %v6418_v57, %s5021_s10  ;;  %v1771_v32 = vrot.slane %v4155_v3, %v5811_v33  ;;  %v4161_v21 = vld [vmem:[%s6716_s1 + $0x26] ss:$8 sm:$0x3] }
 0x377   : > { %v1126_v42 = vadd.f32 %v1122_v24, %v995_v60  ;;  %v1357_v39 = vpop.f32.mrb[16].mxu0  ;;  %v1774_v61 = vmul.f32 %v1767_v23, %v5727_v55  ;;  %v210_v24 = vld [vmem:[%s6717_s2 + $0x1d8] sm:$0xff] }
 0x378   : > { %v1381_v62 = vmul.f32 %v1374_v46, %v1357_v39  ;;  %v1359_v43 = vpop.f32.mrb[17].mxu0  ;;  %v1256_v4 = vadd.f32 %v1252_v59, %v1125_v47  ;;  %v1775_v38 = vmul.f32 %v1771_v32, %v6787_v53  ;;  %v1873_v59 = vrot.slane %v4158_v52, %v5805_v29 }
 0x379   : > { %v1382_v12 = vmul.f32 %v1378_v56, %v1359_v43  ;;  %v1257_v49 = vadd.f32 %v1253_v26, %v1126_v42  ;;  %v1877_v26 = vrot.slane %v4158_v52, %v5811_v33  ;;  %v1776_v42 = vmul.f32 %v1767_v23, %v6788_v5  ;;  %v6789_v43 = vld [vmem:[#allocation6_spill] sm:$0xff] }
 0x37a   : > { %v1385_v20 = vadd.f32 %v1381_v62, %v1254_v30  ;;  %3944 = vrot.lane.b32.xlu0 %v6446_v2, %s5021_s10  ;;  %3974 = vrot.lane.b32.xlu1 %v6418_v57, %s5023_s17  ;;  %v2004_v39 = vrot.slane %v4161_v21, %v5805_v29 }
 0x37b   : > { %v1386_v37 = vadd.f32 %v1382_v12, %v1255_v14  ;;  %v1363_v16 = vpop.f32.mrb[18].mxu0  ;;  %v2008_v12 = vrot.slane %v4161_v21, %v5811_v33 }
 0x37c   : > { %v1383_v51 = vmul.f32 %v1374_v46, %v1363_v16  ;;  %v1365_v13 = vpop.f32.mrb[19].mxu0  ;;  %v1516_v36 = vadd.f32 %v1512_v1, %v1385_v20  ;;  %v4164_v16 = vld [vmem:[%s6716_s1 + $0x27] ss:$8 sm:$0x3] }
 0x37d   : > { %v1384_v63 = vmul.f32 %v1378_v56, %v1365_v13  ;;  %v1517_v28 = vadd.f32 %v1513_v50, %v1386_v37 }
 0x37e   : > { %v1387_v41 = vadd.f32 %v1383_v51, %v1256_v4  ;;  %3462 = vperm.xlu0 %4976, %v209_v7   ;;  %3902 = vrot.lane.b32.xlu1 %v6446_v2, %s5037_s8  ;;  %v1777_v4 = vmul.f32 %v1771_v32, %v6789_v43  ;;  %v6790_v7 = vld [vmem:[#allocation7_spill] sm:$0xff] }
 0x37f   : > { %v1388_v18 = vadd.f32 %v1384_v63, %v1257_v49  ;;  %v1619_v60 = vpop.f32.mrb[20].mxu0  ;;  %v2011_v51 = vmul.f32 %v2004_v39, %v6790_v7  ;;  %v4167_v63 = vld [vmem:[%s6716_s1 + $0x30] ss:$8 sm:$0x3] }
 0x380   : > { %v1643_v45 = vmul.f32 %v1636_v48, %v1619_v60  ;;  %v1621_v11 = vpop.f32.mrb[21].mxu0  ;;  %v1518_v15 = vadd.f32 %v1514_v19, %v1387_v41  ;;  %v2139_v60 = vrot.slane %v4164_v16, %v5811_v33 }
 0x381   : > { %v1644_v44 = vmul.f32 %v1640_v8, %v1621_v11  ;;  %v1519_v27 = vadd.f32 %v1515_v0, %v1388_v18  ;;  %v2135_v0 = vrot.slane %v4164_v16, %v5805_v29  ;;  %v6797_v16 = vld [vmem:[#allocation14_spill] sm:$0xff] }
 0x382   : > { %v1647_v34 = vadd.f32 %v1643_v45, %v1516_v36  ;;  %3992 = vrot.lane.b32.xlu0 %v6446_v2, %s5041_s25  ;;  %3918 = vrot.lane.b32.xlu1 %v6446_v2, %s5020_s9  ;;  %v6791_v36 = vld [vmem:[#allocation8_spill] sm:$0xff]  ;;  %v6792_v45 = vld [vmem:[#allocation9_spill] sm:$0xff] }
 0x383   : > { %v1648_v30 = vadd.f32 %v1644_v44, %v1517_v28  ;;  %v1625_v46 = vpop.f32.mrb[22].mxu0  ;;  %v2013_v11 = vmul.f32 %v2004_v39, %v6792_v45  ;;  %v3868_v39 = vld [vmem:[%s6717_s2 + $0x38] sm:$0xff] }
 0x384   : > { %v1645_v55 = vmul.f32 %v1636_v48, %v1625_v46  ;;  %v1627_v14 = vpop.f32.mrb[23].mxu0  ;;  %v1778_v56 = vadd.f32 %v1774_v61, %v1647_v34  ;;  %v2012_v48 = vmul.f32 %v2008_v12, %v6791_v36  ;;  %v2270_v61 = vrot.slane %v4167_v63, %v5811_v33  ;;  %v4179_v45 = vld [vmem:[%s6716_s1 + $0x34] ss:$8 sm:$0x3] }
 0x385   : > { %v1646_v35 = vmul.f32 %v1640_v8, %v1627_v14  ;;  %v1779_v47 = vadd.f32 %v1775_v38, %v1648_v30  ;;  %v6794_v14 = vld [vmem:[#allocation11_spill] sm:$0xff] }
 0x386   : > { %v1649_v62 = vadd.f32 %v1645_v55, %v1518_v15  ;;  %3467 = vperm.xlu1 %4977, %v210_v24   ;;  %v2266_v15 = vrot.slane %v4167_v63, %v5805_v29  ;;  %v4170_v55 = vld [vmem:[%s6716_s1 + $0x31] ss:$8 sm:$0x3]  ;;  %v2276_v7 = vmul.f32 %v2270_v61, %v6797_v16 }
 0x387   : > { %v1650_v49 = vadd.f32 %v1646_v35, %v1519_v27  ;;  %v1856_v6 = vpop.f32.mrb[24].mxu0  ;;  %v6793_v27 = vld [vmem:[#allocation10_spill] sm:$0xff]  ;;  %v6795_v35 = vld [vmem:[#allocation12_spill] sm:$0xff] }
 0x388   : > { %v1880_v1 = vmul.f32 %v1873_v59, %v1856_v6  ;;  %v1858_v20 = vpop.f32.mrb[25].mxu0  ;;  %v1780_v50 = vadd.f32 %v1776_v42, %v1649_v62  ;;  %v2014_v52 = vmul.f32 %v2008_v12, %v6793_v27  ;;  %v2397_v12 = vrot.slane %v4170_v55, %v5805_v29 }
 0x389   : > { %v1881_v3 = vmul.f32 %v1877_v26, %v1858_v20  ;;  %v1781_v37 = vadd.f32 %v1777_v4, %v1650_v49  ;;  %v6796_v20 = vld [vmem:[#allocation13_spill] sm:$0xff] }
 0x38a   : > { %v1884_v13 = vadd.f32 %v1880_v1, %v1778_v56  ;;  %3990 = vrot.lane.b32.xlu1 %v6418_v57, %s5041_s25  ;;  %v2273_v56 = vmul.f32 %v2266_v15, %v6794_v14  ;;  %v2401_v1 = vrot.slane %v4170_v55, %v5811_v33  ;;  %v6801_v55 = vld [vmem:[#allocation18_spill] sm:$0xff] }
 0x38b   : > { %v1885_v28 = vadd.f32 %v1881_v3, %v1779_v47  ;;  %v1862_v8 = vpop.f32.mrb[26].mxu0  ;;  %v2274_v47 = vmul.f32 %v2270_v61, %v6795_v35 }
 0x38c   : > { %v1882_v19 = vmul.f32 %v1873_v59, %v1862_v8  ;;  %v1864_v23 = vpop.f32.mrb[27].mxu0  ;;  %v2015_v41 = vadd.f32 %v2011_v51, %v1884_v13 }
 0x38d   : > { %v1883_v32 = vmul.f32 %v1877_v26, %v1864_v23  ;;  %v2016_v18 = vadd.f32 %v2012_v48, %v1885_v28  ;;  %v4173_v26 = vld [vmem:[%s6716_s1 + $0x32] ss:$8 sm:$0x3]  ;;  %v4176_v23 = vld [vmem:[%s6716_s1 + $0x33] ss:$8 sm:$0x3] }
 0x38e   : > { %v1886_v44 = vadd.f32 %v1882_v19, %v1780_v50  ;;  %3960 = vrot.lane.b32.xlu1 %v6446_v2, %s5039_s22  ;;  %v2275_v50 = vmul.f32 %v2266_v15, %v6796_v20  ;;  %v2528_v3 = vrot.slane %v4173_v26, %v5805_v29  ;;  %v2532_v51 = vrot.slane %v4173_v26, %v5811_v33 }
 0x38f   : > { %v1887_v34 = vadd.f32 %v1883_v32, %v1781_v37  ;;  %v2118_v53 = vpop.f32.mrb[28].mxu0  ;;  %v2659_v61 = vrot.slane %v4176_v23, %v5805_v29 }
 0x390   : > { %v2142_v38 = vmul.f32 %v2135_v0, %v2118_v53  ;;  %v2120_v21 = vpop.f32.mrb[29].mxu0  ;;  %v2017_v30 = vadd.f32 %v2013_v11, %v1886_v44  ;;  %v2538_v14 = vmul.f32 %v2532_v51, %v6801_v55 }
 0x391   : > { %v2143_v46 = vmul.f32 %v2139_v60, %v2120_v21  ;;  %v2018_v24 = vadd.f32 %v2014_v52, %v1887_v34  ;;  %v6800_v21 = vld [vmem:[#allocation17_spill] sm:$0xff] }
 0x392   : > { %v2146_v59 = vadd.f32 %v2142_v38, %v2015_v41  ;;  %3976 = vrot.lane.b32.xlu1 %v6446_v2, %s5023_s17  ;;  %v6798_v41 = vld [vmem:[#allocation15_spill] sm:$0xff]  ;;  %v2663_v38 = vrot.slane %v4176_v23, %v5811_v33 }
 0x393   : > { %v2147_v5 = vadd.f32 %v2143_v46, %v2016_v18  ;;  %v2124_v42 = vpop.f32.mrb[30].mxu0  ;;  %v6799_v18 = vld [vmem:[#allocation16_spill] sm:$0xff]  ;;  %v2790_v46 = vrot.slane %v4179_v45, %v5805_v29 }
 0x394   : > { %v2144_v62 = vmul.f32 %v2135_v0, %v2124_v42  ;;  %v2126_v43 = vpop.f32.mrb[31].mxu0  ;;  %v2277_v4 = vadd.f32 %v2273_v56, %v2146_v59  ;;  %v2535_v0 = vmul.f32 %v2528_v3, %v6798_v41  ;;  %v2794_v56 = vrot.slane %v4179_v45, %v5811_v33 }
 0x395   : > { %v2145_v49 = vmul.f32 %v2139_v60, %v2126_v43  ;;  %v2278_v6 = vadd.f32 %v2274_v47, %v2147_v5  ;;  %v2536_v60 = vmul.f32 %v2532_v51, %v6799_v18  ;;  %v6802_v43 = vld [vmem:[#allocation19_spill] sm:$0xff] }
 0x396   : > { %v2148_v37 = vadd.f32 %v2144_v62, %v2017_v30  ;;  %4008 = vperm.xlu1 %4977, %v3868_v39   ;;  %v2537_v30 = vmul.f32 %v2528_v3, %v6800_v21  ;;  %v4182_v62 = vld [vmem:[%s6716_s1 + $0x35] ss:$8 sm:$0x3] }
 0x397   : > { %v2149_v13 = vadd.f32 %v2145_v49, %v2018_v24  ;;  %v2380_v36 = vpop.f32.mrb[32].mxu0  ;;  %v6803_v49 = vld [vmem:[#allocation20_spill] sm:$0xff] }
 0x398   : > { %v2404_v48 = vmul.f32 %v2397_v12, %v2380_v36  ;;  %v2382_v63 = vpop.f32.mrb[33].mxu0  ;;  %v2279_v28 = vadd.f32 %v2275_v50, %v2148_v37  ;;  %v2925_v36 = vrot.slane %v4182_v62, %v5811_v33 }
 0x399   : > { %v2405_v8 = vmul.f32 %v2401_v1, %v2382_v63  ;;  %v2280_v19 = vadd.f32 %v2276_v7, %v2149_v13  ;;  %v2921_v7 = vrot.slane %v4182_v62, %v5805_v29 }
 0x39a   : > { %v2408_v32 = vadd.f32 %v2404_v48, %v2277_v4  ;;  %v2797_v4 = vmul.f32 %v2790_v46, %v6802_v43  ;;  %v6804_v48 = vld [vmem:[#allocation21_spill] sm:$0xff] }
 0x39b   : > { %v2409_v11 = vadd.f32 %v2405_v8, %v2278_v6  ;;  %v2386_v15 = vpop.f32.mrb[34].mxu0  ;;  %v2798_v6 = vmul.f32 %v2794_v56, %v6803_v49  ;;  %v2799_v63 = vmul.f32 %v2790_v46, %v6804_v48 }
 0x39c   : > { %v2406_v44 = vmul.f32 %v2397_v12, %v2386_v15  ;;  %v2388_v27 = vpop.f32.mrb[35].mxu0  ;;  %v2539_v52 = vadd.f32 %v2535_v0, %v2408_v32 }
 0x39d   : > { %v2407_v34 = vmul.f32 %v2401_v1, %v2388_v27  ;;  %v2540_v53 = vadd.f32 %v2536_v60, %v2409_v11  ;;  %v4185_v1 = vld [vmem:[%s6716_s1 + $0x36] ss:$8 sm:$0x3] }
 0x39e   : > { %v2410_v24 = vadd.f32 %v2406_v44, %v2279_v28  ;;  %v3052_v28 = vrot.slane %v4185_v1, %v5805_v29  ;;  %v3056_v41 = vrot.slane %v4185_v1, %v5811_v33  ;;  %v4188_v44 = vld [vmem:[%s6716_s1 + $0x37] ss:$8 sm:$0x3] }
 0x39f   : > { %v2411_v59 = vadd.f32 %v2407_v34, %v2280_v19  ;;  %v2642_v35 = vpop.f32.mrb[36].mxu0  ;;  %v6805_v19 = vld [vmem:[#allocation22_spill] sm:$0xff]  ;;  %v6806_v27 = vld [vmem:[#allocation23_spill] sm:$0xff]  ;;  %v6807_v34 = vld [vmem:[#allocation24_spill] sm:$0xff] }
 0x3a0   : > { %v2666_v47 = vmul.f32 %v2659_v61, %v2642_v35  ;;  %v2644_v26 = vpop.f32.mrb[37].mxu0  ;;  %v2541_v5 = vadd.f32 %v2537_v30, %v2410_v24  ;;  %v2800_v23 = vmul.f32 %v2794_v56, %v6805_v19  ;;  %v3187_v35 = vrot.slane %v4188_v44, %v5811_v33 }
 0x3a1   : > { %v2667_v42 = vmul.f32 %v2663_v38, %v2644_v26  ;;  %v2542_v39 = vadd.f32 %v2538_v14, %v2411_v59  ;;  %v3183_v14 = vrot.slane %v4188_v44, %v5805_v29 }
 0x3a2   : > { %v2670_v12 = vadd.f32 %v2666_v47, %v2539_v52  ;;  %v3059_v52 = vmul.f32 %v3052_v28, %v6806_v27  ;;  %v6808_v47 = vld [vmem:[#allocation25_spill] sm:$0xff] }
 0x3a3   : > { %v2671_v20 = vadd.f32 %v2667_v42, %v2540_v53  ;;  %v2648_v50 = vpop.f32.mrb[38].mxu0  ;;  %v3060_v53 = vmul.f32 %v3056_v41, %v6807_v34  ;;  %v3061_v26 = vmul.f32 %v3052_v28, %v6808_v47 }
 0x3a4   : > { %v2668_v3 = vmul.f32 %v2659_v61, %v2648_v50  ;;  %v2650_v37 = vpop.f32.mrb[39].mxu0  ;;  %v2801_v16 = vadd.f32 %v2797_v4, %v2670_v12 }
 0x3a5   : > { %v2669_v51 = vmul.f32 %v2663_v38, %v2650_v37  ;;  %v2802_v13 = vadd.f32 %v2798_v6, %v2671_v20  ;;  %v4191_v38 = vld [vmem:[%s6716_s1 + $0x40] ss:$8 sm:$0x3]  ;;  %v6810_v37 = vld [vmem:[#allocation27_spill] sm:$0xff] }
 0x3a6   : > { %v2672_v8 = vadd.f32 %v2668_v3, %v2541_v5  ;;  %v3314_v5 = vrot.slane %v4191_v38, %v5805_v29  ;;  %v3318_v43 = vrot.slane %v4191_v38, %v5811_v33  ;;  %v4194_v3 = vld [vmem:[%s6716_s1 + $0x41] ss:$8 sm:$0x3] }
 0x3a7   : > { %v2673_v0 = vadd.f32 %v2669_v51, %v2542_v39  ;;  %v2904_v32 = vpop.f32.mrb[40].mxu0  ;;  %v6809_v39 = vld [vmem:[#allocation26_spill] sm:$0xff]  ;;  %v6811_v51 = vld [vmem:[#allocation28_spill] sm:$0xff]  ;;  %v3445_v19 = vrot.slane %v4194_v3, %v5805_v29 }
 0x3a8   : > { %v2928_v18 = vmul.f32 %v2921_v7, %v2904_v32  ;;  %v2906_v60 = vpop.f32.mrb[41].mxu0  ;;  %v2803_v45 = vadd.f32 %v2799_v63, %v2672_v8  ;;  %v3062_v62 = vmul.f32 %v3056_v41, %v6809_v39  ;;  %v6812_v32 = vld [vmem:[#allocation29_spill] sm:$0xff] }
 0x3a9   : > { %v2929_v11 = vmul.f32 %v2925_v36, %v2906_v60  ;;  %v2804_v15 = vadd.f32 %v2800_v23, %v2673_v0  ;;  %v3449_v0 = vrot.slane %v4194_v3, %v5811_v33  ;;  %v3880_v33 = vpop.permute.xlu1 %3879 }
 0x3aa   : > { %v2932_v61 = vadd.f32 %v2928_v18, %v2801_v16  ;;  %v3321_v16 = vmul.f32 %v3314_v5, %v6810_v37  ;;  %v3323_v18 = vmul.f32 %v3314_v5, %v6812_v32 }
 0x3ab   : > { %v2933_v21 = vadd.f32 %v2929_v11, %v2802_v13  ;;  %v2910_v30 = vpop.f32.mrb[42].mxu0  ;;  %v3322_v13 = vmul.f32 %v3318_v43, %v6811_v51 }
 0x3ac   : > { %v2930_v46 = vmul.f32 %v2921_v7, %v2910_v30  ;;  %v2912_v24 = vpop.f32.mrb[43].mxu0  ;;  %v3063_v55 = vadd.f32 %v3059_v52, %v2932_v61 }
 0x3ad   : > { %v2931_v56 = vmul.f32 %v2925_v36, %v2912_v24  ;;  %v3064_v59 = vadd.f32 %v3060_v53, %v2933_v21 }
 0x3ae   : > { %v2934_v42 = vadd.f32 %v2930_v46, %v2803_v45  ;;  %v6813_v45 = vld [vmem:[#allocation30_spill] sm:$0xff] }
 0x3af   : > { %v2935_v4 = vadd.f32 %v2931_v56, %v2804_v15  ;;  %v3166_v12 = vpop.f32.mrb[44].mxu0  ;;  %v3324_v11 = vmul.f32 %v3318_v43, %v6813_v45  ;;  %v3910_v56 = vpop.permute.xlu1 %3909  ;;  %v6817_v45 = vld [vmem:[#allocation32_spill] sm:$0xff] }
 0x3b0   : > { %v3190_v49 = vmul.f32 %v3183_v14, %v3166_v12  ;;  %v3168_v6 = vpop.f32.mrb[45].mxu0  ;;  %v3065_v1 = vadd.f32 %v3061_v26, %v2934_v42 }
 0x3b1   : > { %v3191_v20 = vmul.f32 %v3187_v35, %v3168_v6  ;;  %v3066_v50 = vadd.f32 %v3062_v62, %v2935_v4 }
 0x3b2   : > { %v3194_v7 = vadd.f32 %v3190_v49, %v3063_v55 }
 0x3b3   : > { %v3195_v36 = vadd.f32 %v3191_v20, %v3064_v59  ;;  %v3172_v48 = vpop.f32.mrb[46].mxu0  ;;  %v3926_v59 = vpop.permute.xlu1 %3925 }
 0x3b4   : > { %v3192_v63 = vmul.f32 %v3183_v14, %v3172_v48  ;;  %v3174_v28 = vpop.f32.mrb[47].mxu0  ;;  %v3325_v8 = vadd.f32 %v3321_v16, %v3194_v7 }
 0x3b5   : > { %v3193_v23 = vmul.f32 %v3187_v35, %v3174_v28  ;;  %v3326_v41 = vadd.f32 %v3322_v13, %v3195_v36  ;;  %v3894_v35 = vpop.permute.xlu0 %3893 }
 0x3b6   : > { %v3196_v60 = vadd.f32 %v3192_v63, %v3065_v1 }
 0x3b7   : > { %v3197_v15 = vadd.f32 %v3193_v23, %v3066_v50  ;;  %v3428_v44 = vpop.f32.mrb[48].mxu0  ;;  %v6606_v47 = vpop.permute.xlu1 %3967  ;;  %v6815_v23 = vld [vmem:[#allocation34_spill] sm:$0xff] }
 0x3b8   : > { %v3452_v27 = vmul.f32 %v3445_v19, %v3428_v44  ;;  %v3430_v52 = vpop.f32.mrb[49].mxu0  ;;  %v3327_v61 = vadd.f32 %v3323_v18, %v3196_v60  ;;  %v6816_v18 = vld [vmem:[#allocation31_spill] sm:$0xff] }
 0x3b9   : > { %v3453_v34 = vmul.f32 %v3449_v0, %v3430_v52  ;;  %v3328_v53 = vadd.f32 %v3324_v11, %v3197_v15  ;;  %v3936_v26 = vpop.permute.xlu0 %3935 }
 0x3ba   : > { %v3456_v38 = vadd.f32 %v3452_v27, %v3325_v8  ;;  %v6814_v8 = vld [vmem:[#allocation33_spill] sm:$0xff]  ;;  %v6818_v27 = vld [vmem:[#allocation35_spill] sm:$0xff] }
 0x3bb   : > { %v3457_v21 = vadd.f32 %v3453_v34, %v3326_v41  ;;  %v3434_v30 = vpop.f32.mrb[50].mxu0  ;;  %v6610_v42 = vpop.permute.xlu1 %3983 }
 0x3bc   : > { %v3454_v29 = vmul.f32 %v3445_v19, %v3434_v30  ;;  %v3436_v46 = vpop.f32.mrb[51].mxu0 }
 0x3bd   : > { %v3455_v24 = vmul.f32 %v3449_v0, %v3436_v46  ;;  %v6608_v5 = vpop.permute.xlu0 %3951 }
 0x3be   : > { %v6602_v55 = vadd.f32 %v3454_v29, %v3327_v61  ;;  %v6819_v61 = vld [vmem:[#allocation36_spill] sm:$0xff] }
 0x3bf   : > { %v6604_v14 = vadd.f32 %v3455_v24, %v3328_v53 }
 0x3c1   : > { %v6612_v39 = vpop.permute.xlu0 %3999 }
 0x3dc   : > { %v3870_v62 = vpop.permute.xlu1 %3869  ;;  %v3901_v4 = vpop.permute.xlu0 %3900 }
 0x3e0   : > { %v3885_v43 = vpop.permute.xlu1 %3884  ;;  %v3959_v49 = vpop.permute.xlu0 %3958 }
 0x3e4   : > { %v3917_v12 = vpop.permute.xlu1 %3916  ;;  %v3872_v1 = vpop.permute.xlu0 %3871 }
 0x3e5   : > { %v3873_v51 = vsel %vm1012_vm15, %v3870_v62, %v3872_v1  ;;  %v3874_v13 = vsel %vm1012_vm15, %v3872_v1, %v3870_v62 }
 0x3e6   : > { %v3875_v60 = vmul.f32 %v3874_v13, %v6816_v18  ;;  %v3876_v11 = vmul.f32 %v3873_v51, %v6817_v45 }
 0x3e8   : > { %v3943_v6 = vpop.permute.xlu1 %3942  ;;  %v3887_v50 = vpop.permute.xlu0 %3886  ;;  %v3882_v24 = vmul.f32 %v3880_v33, %v3875_v60  ;;  %v3883_v62 = vmul.f32 %v3880_v33, %v3876_v11 }
 0x3e9   : > { %v3888_v16 = vsel %vm1143_vm4, %v3885_v43, %v3887_v50  ;;  %v3889_v7 = vsel %vm1143_vm4, %v3887_v50, %v3885_v43 }
 0x3ea   : > { %v3890_v19 = vmul.f32 %v3889_v7, %v6814_v8  ;;  %v3891_v41 = vmul.f32 %v3888_v16, %v6815_v23  ;;  %v6821_v7 = vld [vmem:[#allocation38_spill] sm:$0xff] }
 0x3ec   : > { %v6614_v20 = vpop.permute.xlu1 %3974  ;;  %v3945_v37 = vpop.permute.xlu0 %3944 }
 0x3ed   : > { %v3947_v33 = vsel %vm1904_vm7, %v3945_v37, %v3943_v6 }
 0x3f0   : > { %v3903_v3 = vpop.permute.xlu1 %3902 }
 0x3f1   : > { %v3904_v48 = vsel %vm1274_vm0, %v3901_v4, %v3903_v3  ;;  %v3905_v63 = vsel %vm1274_vm0, %v3903_v3, %v3901_v4 }
 0x3f2   : > { %v3906_v52 = vmul.f32 %v3905_v63, %v6818_v27  ;;  %v3907_v34 = vmul.f32 %v3904_v48, %v6819_v61 }
 0x3f4   : > { %v3919_v36 = vpop.permute.xlu1 %3918  ;;  %v3912_v43 = vmul.f32 %v3910_v56, %v3906_v52  ;;  %v3913_v4 = vmul.f32 %v3910_v56, %v3907_v34 }
 0x3f5   : > { %v3920_v15 = vsel %vm1667_vm6, %v3917_v12, %v3919_v36  ;;  %v3921_v44 = vsel %vm1667_vm6, %v3919_v36, %v3917_v12  ;;  %v3946_v36 = vsel %vm1904_vm7, %v3943_v6, %v3945_v37 }
 0x3f6   : > { %v3922_v29 = vmul.f32 %v3921_v44, %v6012_v22  ;;  %v3923_v46 = vmul.f32 %v3920_v15, %v6015_v17  ;;  %v3933_v17 = vmul.f32 %v6446_v2, %v6821_v7  ;;  %v4987_v15 = vld [vmem:[%s6716_s1 + $0x10] ss:$0 sm:$0xff] }
 0x3f8   : > { %v3928_v3 = vmul.f32 %v3926_v59, %v3922_v29  ;;  %v3929_v16 = vmul.f32 %v3926_v59, %v3923_v46  ;;  %v3939_v8 = vmul.f32 %v3936_v26, %v3933_v17  ;;  %v3948_v59 = vmul.f32 %v3946_v36, %v6044_v10 }
 0x3fd   : > { %v3463_v28 = vpop.permute.xlu0 %3462 }
 0x3fe   : > { %v3470_v0 = vadd.f32 %v3463_v28, %v3456_v38  ;;  %v3471_v32 = vadd.f32 %v3463_v28, %v3457_v21  ;;  %v3896_v38 = vmul.f32 %v3894_v35, %v3890_v19  ;;  %v3897_v21 = vmul.f32 %v3894_v35, %v3891_v41  ;;  %v6820_v35 = vld [vmem:[#allocation37_spill] sm:$0xff] }
 0x3ff   : > { %v3932_v22 = vmul.f32 %v6418_v57, %v6820_v35 }
 0x400   : > { %v4013_v53 = vadd.f32 %v6418_v57, %v3470_v0  ;;  %v4014_v30 = vadd.f32 %v6446_v2, %v3471_v32  ;;  %v3898_v1 = vadd.f32 %v3896_v38, %v3882_v24  ;;  %v3899_v50 = vadd.f32 %v3897_v21, %v3883_v62 }
 0x401   : > { %v3938_v28 = vmul.f32 %v3936_v26, %v3932_v22  ;;  %v3949_v57 = vmul.f32 %v3947_v33, %v6047_v58  ;;  %v3993_v32 = vpop.permute.xlu0 %3992  ;;  %v3954_v26 = vmul.f32 %v6608_v5, %v3948_v59 }
 0x402   : > { %4017 = vst [vmem:[%s6644_s12] sm:$0xff] %v4013_v53  ;;  %4018 = vst [vmem:[%s6644_s12 + $0x8] sm:$0xff] %v4014_v30  ;;  %v3914_v51 = vadd.f32 %v3912_v43, %v3898_v1  ;;  %v3915_v13 = vadd.f32 %v3913_v4, %v3899_v50 }
 0x403   : > { %v3955_v10 = vmul.f32 %v6608_v5, %v3949_v57 }
 0x404   : > { %v3930_v48 = vadd.f32 %v3928_v3, %v3914_v51  ;;  %v3931_v63 = vadd.f32 %v3929_v16, %v3915_v13 }
 0x405   : > { %v3468_v12 = vpop.permute.xlu1 %3467 }
 0x406   : > { %v3940_v23 = vadd.f32 %v3938_v28, %v3930_v48  ;;  %v3941_v2 = vadd.f32 %v3939_v8, %v3931_v63 }
 0x408   : > { %v3957_v5 = vadd.f32 %v3955_v10, %v3941_v2  ;;  %v3956_v11 = vadd.f32 %v3954_v26, %v3940_v23 }
 0x409   : > { %v3991_v56 = vpop.permute.xlu1 %3990 }
 0x40a   : > { %v3994_v58 = vsel %vm2559_vm3, %v3991_v56, %v3993_v32  ;;  %v3995_v18 = vsel %vm2559_vm3, %v3993_v32, %v3991_v56 }
 0x40b   : > { %v3996_v44 = vmul.f32 %v4987_v15, %v3994_v58 }
 0x40d   : > { %v3961_v19 = vpop.permute.xlu1 %3960  ;;  %v4002_v38 = vmul.f32 %v6612_v39, %v3996_v44 }
 0x40e   : > { %v3962_v41 = vsel %vm2297_vm1, %v3959_v49, %v3961_v19  ;;  %v3963_v0 = vsel %vm2297_vm1, %v3961_v19, %v3959_v49 }
 0x40f   : > { %v3964_v6 = vmul.f32 %v3962_v41, %v6060_v25  ;;  %v3965_v37 = vmul.f32 %v3963_v0, %v6063_v9 }
 0x411   : > { %v3970_v60 = vmul.f32 %v6606_v47, %v3964_v6  ;;  %v3971_v45 = vmul.f32 %v6606_v47, %v3965_v37  ;;  %v3977_v49 = vpop.permute.xlu1 %3976  ;;  %v4988_v47 = vld [vmem:[%s6716_s1 + $0x18] ss:$0 sm:$0xff] }
 0x412   : > { %v3978_v25 = vsel %vm2428_vm9, %v6614_v20, %v3977_v49  ;;  %v3979_v9 = vsel %vm2428_vm9, %v3977_v49, %v6614_v20  ;;  %v3997_v27 = vmul.f32 %v4988_v47, %v3995_v18 }
 0x413   : > { %v3980_v52 = vmul.f32 %v3978_v25, %v6086_v40  ;;  %v3981_v61 = vmul.f32 %v3979_v9, %v6089_v54  ;;  %v3973_v20 = vadd.f32 %v3971_v45, %v3957_v5  ;;  %v3972_v53 = vadd.f32 %v3970_v60, %v3956_v11 }
 0x414   : > { %v4003_v21 = vmul.f32 %v6612_v39, %v3997_v27  ;;  %v3472_v40 = vadd.f32 %v3468_v12, %v6602_v55  ;;  %v3473_v54 = vadd.f32 %v3468_v12, %v6604_v14  ;;  %v4043_v39 = vld [vmem:[%s6644_s12] sm:$0xff] (%p5097_p5)  ;;  %v4045_v55 = vld [vmem:[%s6644_s12 + $0x8] sm:$0xff] (%p5097_p5) }
 0x415   : > { %v3986_v34 = vmul.f32 %v6610_v42, %v3980_v52  ;;  %v3987_v31 = vmul.f32 %v6610_v42, %v3981_v61  ;;  %v4009_v62 = vpop.permute.xlu1 %4008  ;;  %4044 = vst [vmem:[%s4030_s21] sm:$0xff] (%p5097_p5), %v4043_v39  ;;  %4046 = vst [vmem:[%s4030_s21 + $0x8] sm:$0xff] (%p5097_p5), %v4045_v55 }
 0x417   : > { %v3989_v30 = vadd.f32 %v3987_v31, %v3973_v20  ;;  %v3988_v29 = vadd.f32 %v3986_v34, %v3972_v53 }
 0x419   : > { %v4005_v46 = vadd.f32 %v4003_v21, %v3989_v30  ;;  %v4004_v24 = vadd.f32 %v4002_v38, %v3988_v29  ;;  %4027 = sbr.rel (!%p5097_p5) target bundleno = 1064 (0x428), region = 59 }
 0x41b   : > { %v4011_v43 = vadd.f32 %v4009_v62, %v4004_v24  ;;  %v4012_v4 = vadd.f32 %v4009_v62, %v4005_v46 }
 0x41d   : > { %v4015_v42 = vadd.f32 %v4011_v43, %v3472_v40  ;;  %v4016_v1 = vadd.f32 %v4012_v4, %v3473_v54 }
 0x41f   : > { %4019 = vst [vmem:[%s6644_s12 + $0x10] sm:$0xff] %v4015_v42  ;;  %4020 = vst [vmem:[%s6644_s12 + $0x18] sm:$0xff] %v4016_v1 }
 0x426   : > { %v4047_v50 = vld [vmem:[%s6644_s12 + $0x10] sm:$0xff]  ;;  %v4049_v14 = vld [vmem:[%s6644_s12 + $0x18] sm:$0xff] }
 0x427   : > { %4048 = vst [vmem:[%s4030_s21 + $0x20] sm:$0xff] %v4047_v50  ;;  %4050 = vst [vmem:[%s4030_s21 + $0x28] sm:$0xff] %v4049_v14 }
 0x428 PF: > { %p10_p10 = scmp.ge.s32.totalorder %s5084_s16, 4   ;;  %s6822_s12 = smov %s5007_s13 }
 0x429   : > { %s6823_s13 = smov %s5095_s19  ;;  %s6824_s14 = smov %s5084_s16 }
 0x42a   :  { %12 = sbr.rel (!%p10_p10) target bundleno = 2 (0x2), region = 138 }

</bundles_post_ra>
